<compile_context>
chip_gen: v7x
topology: tpu7x:2x2x1
jax: 0.10.0
libtpu: 0.0.40
codegen_flags: <defaults>
</compile_context>

<pallas_src>
import functools
import math

import numpy as np

import jax
import jax.numpy as jnp
from jax import lax
from jax.experimental import pallas as pl
from jax.experimental.pallas import tpu as pltpu


_TRANS_B = (((1,), (1,)), ((), ()))      # contract the minor dim of both operands


def _round_up(x, m):
    return ((x + m - 1) // m) * m


def dqn_kernel(x_ref, oh_ref, w1p_ref, w2_ref, e_ref, w51_ref, w61_ref,
               a2_ref, w62_ref, p_ref, out_ref, *, J, K):
    """One grid step over ROWS = (batch, node) rows; output is a lane-dense
    (1, ROWS) row of Q values."""
    f32 = jnp.float32
    hi = lax.Precision.HIGHEST

    x = x_ref[...]                      # (ROWS, F)
    oh = oh_ref[...]                    # (ROWS, N)  one-hot node id per row

    # ---- Q1 = relu(feat1 @ W1) @ W2 ------------------------------------ MXU
    # W1 is zero-padded to (F, D) so no lane slice of x is needed.
    q1h = jnp.dot(x, w1p_ref[...], preferred_element_type=f32, precision=hi)
    q1h = jnp.maximum(q1h, 0.0)                                    # (ROWS, D)
    q1 = lax.dot_general(w2_ref[...], q1h, _TRANS_B,
                         preferred_element_type=f32, precision=hi)  # (1, ROWS)

    # ---- extract [exp(W3)*b, d, -sigma] as rows ------------------------ MXU
    eds = lax.dot_general(e_ref[...], x, _TRANS_B,
                          preferred_element_type=f32, precision=hi)  # (3, ROWS)

    # ---- g branch in transposed layout: rows = (dd, j, k), cols = ROWS --
    bias1 = lax.dot_general(w61_ref[...], oh, _TRANS_B,
                            preferred_element_type=f32, precision=hi)  # (K*J*K, ROWS)
    g1 = jnp.dot(w51_ref[...], eds, preferred_element_type=f32,
                 precision=hi) + bias1
    g1 = jnp.maximum(g1, 0.0)                                       # (K*J*K, ROWS)

    bias2 = lax.dot_general(w62_ref[...], oh, _TRANS_B,
                            preferred_element_type=f32, precision=hi)  # (J*K, ROWS)
    g2 = jnp.dot(a2_ref[...], g1, preferred_element_type=f32,
                 precision=hi) + bias2
    g2 = jnp.maximum(g2, 0.0)          # = exp(W4) * relu(...)  (exp(W4) folded)

    # ---- min over k within each group j: cyclic row permutations (MXU) +
    #      elementwise minimum (VPU); afterwards every row of a group holds
    #      the group minimum.  Then max over j the same way. ---------------
    m = g2
    for s in range(K - 1):
        m = jnp.minimum(m, jnp.dot(p_ref[s], g2,
                                   preferred_element_type=f32, precision=hi))
    r = m
    for s in range(J - 1):
        r = jnp.maximum(r, jnp.dot(p_ref[K - 1 + s], m,
                                   preferred_element_type=f32, precision=hi))

    # ---- Q = Q1 - exp(W3)*b + exp(W4)*gmax, lane-dense (1, ROWS) --------
    out_ref[0] = q1 - eds[0:1, :] + r[0:1, :]


def prepare_params(params, *, g_hidden, J, K, N):
    """Build the constant weight slabs / selection / permutation matrices once
    per parameter update (hoisted out of the per-call forward path)."""
    f32 = jnp.float32
    D = 2 * g_hidden + 3
    F = D + 3
    JK = J * K
    KJK = K * JK

    w1 = params['1'].astype(f32)                                   # (D, D)
    w1p = jnp.concatenate([w1, jnp.zeros((3, D), f32)], axis=0)    # (F, D)
    w2row = params['2'].astype(f32).reshape(1, D)                  # (1, D)

    e3 = jnp.exp(params['3'].astype(f32)).reshape(())
    e4 = jnp.exp(params['4'].astype(f32)).reshape(())

    # E (3, F): rows select [exp(W3)*b, d, -sigma] from a state row.
    E = jnp.zeros((3, F), f32)
    E = E.at[0, D].set(e3)
    E = E.at[1, D + 1].set(1.0)
    E = E.at[2, D + 2].set(-1.0)

    # g-branch row index l = dd*J*K + j*K + k.
    e51 = jnp.exp(params['51'].astype(f32))                        # (J, K, 2, K)=(j,k,i,dd)
    w51_2 = jnp.transpose(e51, (2, 3, 0, 1)).reshape(2, KJK)       # (i, l)
    w51m = jnp.concatenate([jnp.zeros((1, KJK), f32), w51_2],
                           axis=0).T                               # (KJK, 3)

    # W61 (j,k,n,dd) -> (dd,j,k,n) -> (KJK, N)   (raw bias, no exp)
    w61m = jnp.transpose(params['61'].astype(f32), (3, 0, 1, 2)).reshape(KJK, N)

    # A2 (JK, KJK): dd-contraction with exp(W52), exp(W4) folded in.
    e52 = jnp.exp(params['52'].astype(f32))[..., 0].reshape(JK, K)  # (j*K+k, dd)
    a2 = jnp.concatenate([jnp.diag(e4 * e52[:, dd]) for dd in range(K)],
                         axis=1)                                   # (JK, K*JK)

    # W62 (j,k,n,1) -> (JK, N), exp(W4) folded in.
    w62m = e4 * params['62'].astype(f32)[..., 0].reshape(JK, N)

    # Cyclic 0/1 permutation matrices: first K-1 shift k within a group,
    # then J-1 shift whole groups.
    perms = []
    for s in range(1, K):
        P = np.zeros((JK, JK), np.float32)
        for j in range(J):
            for k in range(K):
                P[j * K + k, j * K + ((k + s) % K)] = 1.0
        perms.append(P)
    for s in range(1, J):
        P = np.zeros((JK, JK), np.float32)
        for j in range(J):
            for k in range(K):
                P[j * K + k, ((j + s) % J) * K + k] = 1.0
        perms.append(P)
    if not perms:                       # degenerate J == K == 1 placeholder
        perms.append(np.eye(JK, dtype=np.float32))
    pall = jnp.asarray(np.stack(perms, axis=0))                    # (S, JK, JK)

    return {'w1p': w1p, 'w2row': w2row, 'E': E, 'w51m': w51m, 'w61m': w61m,
            'a2': a2, 'w62m': w62m, 'pall': pall}


@functools.partial(jax.jit, static_argnames=("J", "K", "N", "rows_target"))
def dqn_forward(states, prepped, *, J, K, N, rows_target=512):
    f32 = jnp.float32
    B = states.shape[0]
    F = states.shape[2]
    R = B * N

    # ---- tile selection: ROWS multiple of 128, T >= 2 and even when there is
    #      more than one 128-row tile of work (v7x megacore balance). --------
    target = _round_up(max(rows_target, 128), 128)
    T = -(-R // target)
    if R > 128:
        T = max(T, 2)
    if T > 1 and T % 2 == 1:
        T += 1
    ROWS = _round_up(-(-R // T), 128)
    R_pad = T * ROWS

    x2d = states.astype(f32).reshape(R, F)
    if R_pad != R:
        x2d = jnp.pad(x2d, ((0, R_pad - R), (0, 0)))

    node = jnp.arange(R_pad, dtype=jnp.int32) % N
    oh = (node[:, None] == jnp.arange(N, dtype=jnp.int32)[None, :]).astype(f32)

    w1p = prepped['w1p']
    w2row = prepped['w2row']
    E = prepped['E']
    w51m = prepped['w51m']
    w61m = prepped['w61m']
    a2 = prepped['a2']
    w62m = prepped['w62m']
    pall = prepped['pall']

    in_specs = [
        pl.BlockSpec((ROWS, F), lambda t: (t, 0)),                 # states rows
        pl.BlockSpec((ROWS, N), lambda t: (t, 0)),                 # node one-hot
        pl.BlockSpec(w1p.shape, lambda t: (0, 0)),                 # W1 (padded)
        pl.BlockSpec(w2row.shape, lambda t: (0, 0)),               # W2 row
        pl.BlockSpec(E.shape, lambda t: (0, 0)),                   # extractor
        pl.BlockSpec(w51m.shape, lambda t: (0, 0)),                # exp(W51)
        pl.BlockSpec(w61m.shape, lambda t: (0, 0)),                # W61
        pl.BlockSpec(a2.shape, lambda t: (0, 0)),                  # exp(W52)*exp(W4)
        pl.BlockSpec(w62m.shape, lambda t: (0, 0)),                # W62*exp(W4)
        pl.BlockSpec(pall.shape, lambda t: (0, 0, 0)),             # permutations
    ]

    out = pl.pallas_call(
        functools.partial(dqn_kernel, J=J, K=K),
        out_shape=jax.ShapeDtypeStruct((T, 1, ROWS), f32),
        grid=(T,),
        in_specs=in_specs,
        out_specs=pl.BlockSpec((1, 1, ROWS), lambda t: (t, 0, 0)),
        compiler_params=pltpu.CompilerParams(
            dimension_semantics=("parallel",),
            vmem_limit_bytes=32 * 1024 * 1024),
    )(x2d, oh, w1p, w2row, E, w51m, w61m, a2, w62m, pall)

    # rows are ordered b*N + n, so a flat slice + reshape restores (B, N, 1)
    return out.reshape(-1)[:R].reshape(B, N, 1)


def dqn_reference(states, params, *, g_hidden):
    """Pure-JAX reference mirroring the PyTorch forward exactly."""
    G = 2 * g_hidden
    v = states[:, :, :G]
    s = states[:, :, G:G + 1]
    C = states[:, :, G + 1:G + 2]
    h = states[:, :, G + 2:G + 3]
    b = states[:, :, G + 3:G + 4]
    d = states[:, :, G + 4:G + 5]
    sigma = states[:, :, G + 5:G + 6]

    hi = lax.Precision.HIGHEST
    feat1 = jnp.concatenate([v, s, C, h], axis=2)
    q1 = jax.nn.relu(jnp.matmul(feat1, params['1'], precision=hi))
    q1 = jnp.matmul(q1, params['2'], precision=hi)
    q2 = jnp.matmul(-b, jnp.exp(params['3']), precision=hi)

    feat2 = jnp.concatenate([d, -sigma], axis=2)
    g1 = jnp.einsum('bni,jkid->bjknd', feat2, jnp.exp(params['51']),
                    precision=hi)
    g1 = jax.nn.relu(g1 + params['61'])
    g1 = jnp.einsum('bjkni,jkid->bjknd', g1, jnp.exp(params['52']),
                    precision=hi)
    g1 = jax.nn.relu(g1 + params['62'])
    g1 = g1[..., 0]
    g1 = jnp.min(g1, axis=2)
    g1 = jnp.max(g1, axis=1)
    q3 = jnp.matmul(g1[..., None], jnp.exp(params['4']), precision=hi)
    return q1 + q2 + q3


if __name__ == "__main__":
    configs = [
        dict(g_hidden=16, J=3, K=4, N=8, B=33),   # multi-step grid + row padding
        dict(g_hidden=4, J=2, K=3, N=5, B=3),     # tiny / single-step path
    ]

    key = jax.random.PRNGKey(0)

    def kaiming_uniform(k, shape, fan_in):
        # kaiming_uniform_(a=sqrt(5)) => bound = 1/sqrt(fan_in)
        bound = 1.0 / math.sqrt(fan_in)
        return jax.random.uniform(k, shape, jnp.float32, -bound, bound)

    for cfg in configs:
        g_hidden, J, K, N, B = (cfg['g_hidden'], cfg['J'], cfg['K'],
                                cfg['N'], cfg['B'])
        D = 2 * g_hidden + 3
        F = 2 * g_hidden + 6

        key, *ks = jax.random.split(key, 10)
        params = {
            '1':  kaiming_uniform(ks[0], (D, D), D),
            '2':  kaiming_uniform(ks[1], (D, 1), 1),
            '3':  kaiming_uniform(ks[2], (1, 1), 1),
            '4':  kaiming_uniform(ks[3], (1, 1), 1),
            '51': kaiming_uniform(ks[4], (J, K, 2, K), K * 2 * K),
            '61': kaiming_uniform(ks[5], (J, K, N, K), K * N * K),
            '52': kaiming_uniform(ks[6], (J, K, K, 1), K * K),
            '62': kaiming_uniform(ks[7], (J, K, N, 1), K * N),
        }
        states = jax.random.normal(ks[8], (B, N, F), jnp.float32)

        # Parameter preprocessing is hoisted: done once per parameter set.
        prepped = prepare_params(params, g_hidden=g_hidden, J=J, K=K, N=N)

        out = dqn_forward(states, prepped, J=J, K=K, N=N, rows_target=512)
        out = jax.block_until_ready(out)

        ref = dqn_reference(states, params, g_hidden=g_hidden)
        assert out.shape == (B, N, 1), out.shape
        assert bool(jnp.all(jnp.isfinite(out)))
        err = float(jnp.max(jnp.abs(out - ref)))
        assert bool(jnp.allclose(out, ref, rtol=2e-3, atol=2e-3)), (
            f"max abs err = {err}")

    print("KERNEL_OK")
</pallas_src>

<mosaic_0001>
module attributes {stable_mosaic.version = 11 : i64} {
  func.func @dqn_kernel(%arg0: i32, %arg1: memref<256x38xf32, #tpu.memory_space<vmem>>, %arg2: memref<256x8xf32, #tpu.memory_space<vmem>>, %arg3: memref<38x35xf32, #tpu.memory_space<vmem>>, %arg4: memref<1x35xf32, #tpu.memory_space<vmem>>, %arg5: memref<3x38xf32, #tpu.memory_space<vmem>>, %arg6: memref<48x3xf32, #tpu.memory_space<vmem>>, %arg7: memref<48x8xf32, #tpu.memory_space<vmem>>, %arg8: memref<12x48xf32, #tpu.memory_space<vmem>>, %arg9: memref<12x8xf32, #tpu.memory_space<vmem>>, %arg10: memref<5x12x12xf32, #tpu.memory_space<vmem>>, %arg11: memref<1x1x256xf32, #tpu.memory_space<vmem>>) attributes {dimension_semantics = [#tpu.dimension_semantics<parallel>], iteration_bounds = array<i64: 2>, scalar_prefetch = 0 : i64, scratch_operands = 0 : i64, tpu.core_type = #tpu.core_type<tc>, window_params = [{transform_indices = @transform_0, window_bounds = array<i64: 256, 38>}, {transform_indices = @transform_1, window_bounds = array<i64: 256, 8>}, {pipeline_mode = #tpu.pipeline_mode<synchronous>, transform_indices = @transform_2, window_bounds = array<i64: 38, 35>}, {pipeline_mode = #tpu.pipeline_mode<synchronous>, transform_indices = @transform_3, window_bounds = array<i64: 1, 35>}, {pipeline_mode = #tpu.pipeline_mode<synchronous>, transform_indices = @transform_4, window_bounds = array<i64: 3, 38>}, {pipeline_mode = #tpu.pipeline_mode<synchronous>, transform_indices = @transform_5, window_bounds = array<i64: 48, 3>}, {pipeline_mode = #tpu.pipeline_mode<synchronous>, transform_indices = @transform_6, window_bounds = array<i64: 48, 8>}, {pipeline_mode = #tpu.pipeline_mode<synchronous>, transform_indices = @transform_7, window_bounds = array<i64: 12, 48>}, {pipeline_mode = #tpu.pipeline_mode<synchronous>, transform_indices = @transform_8, window_bounds = array<i64: 12, 8>}, {pipeline_mode = #tpu.pipeline_mode<synchronous>, transform_indices = @transform_9, window_bounds = array<i64: 5, 12, 12>}, {transform_indices = @transform_10, window_bounds = array<i64: 1, 1, 256>}]} {
    %c0 = arith.constant 0 : index
    %c0_0 = arith.constant 0 : index
    %0 = vector.load %arg1[%c0, %c0_0] : memref<256x38xf32, #tpu.memory_space<vmem>>, vector<256x38xf32>
    %c0_1 = arith.constant 0 : index
    %c0_2 = arith.constant 0 : index
    %1 = vector.load %arg2[%c0_1, %c0_2] : memref<256x8xf32, #tpu.memory_space<vmem>>, vector<256x8xf32>
    %c0_3 = arith.constant 0 : index
    %c0_4 = arith.constant 0 : index
    %2 = vector.load %arg3[%c0_3, %c0_4] : memref<38x35xf32, #tpu.memory_space<vmem>>, vector<38x35xf32>
    %cst = arith.constant dense<0.000000e+00> : vector<256x35xf32>
    %3 = tpu.matmul %0, %2, %cst {dimension_numbers = #tpu.dot_dimension_numbers<[1], [0], [0], [1], [0, 0, 1, 1], [], []>, precision = #tpu.contract_precision<fp32>} : vector<256x38xf32>, vector<38x35xf32>, vector<256x35xf32> -> vector<256x35xf32>
    %cst_5 = arith.constant 0.000000e+00 : f32
    %4 = vector.broadcast %cst_5 : f32 to vector<256x35xf32>
    %5 = arith.maximumf %3, %4 : vector<256x35xf32>
    %c0_6 = arith.constant 0 : index
    %c0_7 = arith.constant 0 : index
    %6 = vector.load %arg4[%c0_6, %c0_7] : memref<1x35xf32, #tpu.memory_space<vmem>>, vector<1x35xf32>
    %cst_8 = arith.constant dense<0.000000e+00> : vector<1x256xf32>
    %7 = tpu.matmul %6, %5, %cst_8 {dimension_numbers = #tpu.dot_dimension_numbers<[1], [1], [0], [0], [0, 0, 1, 0], [], []>, precision = #tpu.contract_precision<fp32>} : vector<1x35xf32>, vector<256x35xf32>, vector<1x256xf32> -> vector<1x256xf32>
    %c0_9 = arith.constant 0 : index
    %c0_10 = arith.constant 0 : index
    %8 = vector.load %arg5[%c0_9, %c0_10] : memref<3x38xf32, #tpu.memory_space<vmem>>, vector<3x38xf32>
    %cst_11 = arith.constant dense<0.000000e+00> : vector<3x256xf32>
    %9 = tpu.matmul %8, %0, %cst_11 {dimension_numbers = #tpu.dot_dimension_numbers<[1], [1], [0], [0], [0, 0, 1, 0], [], []>, precision = #tpu.contract_precision<fp32>} : vector<3x38xf32>, vector<256x38xf32>, vector<3x256xf32> -> vector<3x256xf32>
    %c0_12 = arith.constant 0 : index
    %c0_13 = arith.constant 0 : index
    %10 = vector.load %arg7[%c0_12, %c0_13] : memref<48x8xf32, #tpu.memory_space<vmem>>, vector<48x8xf32>
    %cst_14 = arith.constant dense<0.000000e+00> : vector<48x256xf32>
    %11 = tpu.matmul %10, %1, %cst_14 {dimension_numbers = #tpu.dot_dimension_numbers<[1], [1], [0], [0], [0, 0, 1, 0], [], []>, precision = #tpu.contract_precision<fp32>} : vector<48x8xf32>, vector<256x8xf32>, vector<48x256xf32> -> vector<48x256xf32>
    %c0_15 = arith.constant 0 : index
    %c0_16 = arith.constant 0 : index
    %12 = vector.load %arg6[%c0_15, %c0_16] : memref<48x3xf32, #tpu.memory_space<vmem>>, vector<48x3xf32>
    %cst_17 = arith.constant dense<0.000000e+00> : vector<48x256xf32>
    %13 = tpu.matmul %12, %9, %cst_17 {dimension_numbers = #tpu.dot_dimension_numbers<[1], [0], [0], [1], [0, 0, 1, 1], [], []>, precision = #tpu.contract_precision<fp32>} : vector<48x3xf32>, vector<3x256xf32>, vector<48x256xf32> -> vector<48x256xf32>
    %14 = arith.addf %13, %11 : vector<48x256xf32>
    %cst_18 = arith.constant 0.000000e+00 : f32
    %15 = vector.broadcast %cst_18 : f32 to vector<48x256xf32>
    %16 = arith.maximumf %14, %15 : vector<48x256xf32>
    %c0_19 = arith.constant 0 : index
    %c0_20 = arith.constant 0 : index
    %17 = vector.load %arg9[%c0_19, %c0_20] : memref<12x8xf32, #tpu.memory_space<vmem>>, vector<12x8xf32>
    %cst_21 = arith.constant dense<0.000000e+00> : vector<12x256xf32>
    %18 = tpu.matmul %17, %1, %cst_21 {dimension_numbers = #tpu.dot_dimension_numbers<[1], [1], [0], [0], [0, 0, 1, 0], [], []>, precision = #tpu.contract_precision<fp32>} : vector<12x8xf32>, vector<256x8xf32>, vector<12x256xf32> -> vector<12x256xf32>
    %c0_22 = arith.constant 0 : index
    %c0_23 = arith.constant 0 : index
    %19 = vector.load %arg8[%c0_22, %c0_23] : memref<12x48xf32, #tpu.memory_space<vmem>>, vector<12x48xf32>
    %cst_24 = arith.constant dense<0.000000e+00> : vector<12x256xf32>
    %20 = tpu.matmul %19, %16, %cst_24 {dimension_numbers = #tpu.dot_dimension_numbers<[1], [0], [0], [1], [0, 0, 1, 1], [], []>, precision = #tpu.contract_precision<fp32>} : vector<12x48xf32>, vector<48x256xf32>, vector<12x256xf32> -> vector<12x256xf32>
    %21 = arith.addf %20, %18 : vector<12x256xf32>
    %cst_25 = arith.constant 0.000000e+00 : f32
    %22 = vector.broadcast %cst_25 : f32 to vector<12x256xf32>
    %23 = arith.maximumf %21, %22 : vector<12x256xf32>
    %c0_26 = arith.constant 0 : index
    %c0_27 = arith.constant 0 : index
    %c0_28 = arith.constant 0 : index
    %24 = vector.load %arg10[%c0_26, %c0_27, %c0_28] : memref<5x12x12xf32, #tpu.memory_space<vmem>>, vector<1x12x12xf32>
    %25 = vector.shape_cast %24 : vector<1x12x12xf32> to vector<12x12xf32>
    %cst_29 = arith.constant dense<0.000000e+00> : vector<12x256xf32>
    %26 = tpu.matmul %25, %23, %cst_29 {dimension_numbers = #tpu.dot_dimension_numbers<[1], [0], [0], [1], [0, 0, 1, 1], [], []>, precision = #tpu.contract_precision<fp32>} : vector<12x12xf32>, vector<12x256xf32>, vector<12x256xf32> -> vector<12x256xf32>
    %27 = arith.minimumf %23, %26 : vector<12x256xf32>
    %c1 = arith.constant 1 : index
    %c0_30 = arith.constant 0 : index
    %c0_31 = arith.constant 0 : index
    %28 = vector.load %arg10[%c1, %c0_30, %c0_31] : memref<5x12x12xf32, #tpu.memory_space<vmem>>, vector<1x12x12xf32>
    %29 = vector.shape_cast %28 : vector<1x12x12xf32> to vector<12x12xf32>
    %cst_32 = arith.constant dense<0.000000e+00> : vector<12x256xf32>
    %30 = tpu.matmul %29, %23, %cst_32 {dimension_numbers = #tpu.dot_dimension_numbers<[1], [0], [0], [1], [0, 0, 1, 1], [], []>, precision = #tpu.contract_precision<fp32>} : vector<12x12xf32>, vector<12x256xf32>, vector<12x256xf32> -> vector<12x256xf32>
    %31 = arith.minimumf %27, %30 : vector<12x256xf32>
    %c2 = arith.constant 2 : index
    %c0_33 = arith.constant 0 : index
    %c0_34 = arith.constant 0 : index
    %32 = vector.load %arg10[%c2, %c0_33, %c0_34] : memref<5x12x12xf32, #tpu.memory_space<vmem>>, vector<1x12x12xf32>
    %33 = vector.shape_cast %32 : vector<1x12x12xf32> to vector<12x12xf32>
    %cst_35 = arith.constant dense<0.000000e+00> : vector<12x256xf32>
    %34 = tpu.matmul %33, %23, %cst_35 {dimension_numbers = #tpu.dot_dimension_numbers<[1], [0], [0], [1], [0, 0, 1, 1], [], []>, precision = #tpu.contract_precision<fp32>} : vector<12x12xf32>, vector<12x256xf32>, vector<12x256xf32> -> vector<12x256xf32>
    %35 = arith.minimumf %31, %34 : vector<12x256xf32>
    %c3 = arith.constant 3 : index
    %c0_36 = arith.constant 0 : index
    %c0_37 = arith.constant 0 : index
    %36 = vector.load %arg10[%c3, %c0_36, %c0_37] : memref<5x12x12xf32, #tpu.memory_space<vmem>>, vector<1x12x12xf32>
    %37 = vector.shape_cast %36 : vector<1x12x12xf32> to vector<12x12xf32>
    %cst_38 = arith.constant dense<0.000000e+00> : vector<12x256xf32>
    %38 = tpu.matmul %37, %35, %cst_38 {dimension_numbers = #tpu.dot_dimension_numbers<[1], [0], [0], [1], [0, 0, 1, 1], [], []>, precision = #tpu.contract_precision<fp32>} : vector<12x12xf32>, vector<12x256xf32>, vector<12x256xf32> -> vector<12x256xf32>
    %39 = arith.maximumf %35, %38 : vector<12x256xf32>
    %c4 = arith.constant 4 : index
    %c0_39 = arith.constant 0 : index
    %c0_40 = arith.constant 0 : index
    %40 = vector.load %arg10[%c4, %c0_39, %c0_40] : memref<5x12x12xf32, #tpu.memory_space<vmem>>, vector<1x12x12xf32>
    %41 = vector.shape_cast %40 : vector<1x12x12xf32> to vector<12x12xf32>
    %cst_41 = arith.constant dense<0.000000e+00> : vector<12x256xf32>
    %42 = tpu.matmul %41, %35, %cst_41 {dimension_numbers = #tpu.dot_dimension_numbers<[1], [0], [0], [1], [0, 0, 1, 1], [], []>, precision = #tpu.contract_precision<fp32>} : vector<12x12xf32>, vector<12x256xf32>, vector<12x256xf32> -> vector<12x256xf32>
    %43 = arith.maximumf %39, %42 : vector<12x256xf32>
    %44 = vector.extract_strided_slice %9 {offsets = [0, 0], sizes = [1, 256], strides = [1, 1]} : vector<3x256xf32> to vector<1x256xf32>
    %45 = arith.subf %7, %44 : vector<1x256xf32>
    %46 = vector.extract_strided_slice %43 {offsets = [0, 0], sizes = [1, 256], strides = [1, 1]} : vector<12x256xf32> to vector<1x256xf32>
    %47 = arith.addf %45, %46 : vector<1x256xf32>
    %c0_42 = arith.constant 0 : index
    %c0_43 = arith.constant 0 : index
    %c0_44 = arith.constant 0 : index
    %48 = vector.load %arg11[%c0_42, %c0_43, %c0_44] : memref<1x1x256xf32, #tpu.memory_space<vmem>>, vector<1x1x256xf32>
    %49 = vector.shape_cast %48 : vector<1x1x256xf32> to vector<1x256xf32>
    %50 = vector.shape_cast %47 : vector<1x256xf32> to vector<1x1x256xf32>
    tpu.vector_store %arg11[%c0_42, %c0_43, %c0_44], %50 {strides = array<i32>} : memref<1x1x256xf32, #tpu.memory_space<vmem>>, vector<1x1x256xf32>,
    return
  }
  func.func @transform_0(%arg0: i32) -> (i32, i32) {
    %c0_i32 = arith.constant 0 : i32
    %c0_i32_0 = arith.constant 0 : i32
    return %arg0, %c0_i32 : i32, i32
  }
  func.func @transform_1(%arg0: i32) -> (i32, i32) {
    %c0_i32 = arith.constant 0 : i32
    %c0_i32_0 = arith.constant 0 : i32
    return %arg0, %c0_i32 : i32, i32
  }
  func.func @transform_2(%arg0: i32) -> (i32, i32) {
    %c0_i32 = arith.constant 0 : i32
    %c0_i32_0 = arith.constant 0 : i32
    %c0_i32_1 = arith.constant 0 : i32
    return %c0_i32, %c0_i32_0 : i32, i32
  }
  func.func @transform_3(%arg0: i32) -> (i32, i32) {
    %c0_i32 = arith.constant 0 : i32
    %c0_i32_0 = arith.constant 0 : i32
    %c0_i32_1 = arith.constant 0 : i32
    return %c0_i32, %c0_i32_0 : i32, i32
  }
  func.func @transform_4(%arg0: i32) -> (i32, i32) {
    %c0_i32 = arith.constant 0 : i32
    %c0_i32_0 = arith.constant 0 : i32
    %c0_i32_1 = arith.constant 0 : i32
    return %c0_i32, %c0_i32_0 : i32, i32
  }
  func.func @transform_5(%arg0: i32) -> (i32, i32) {
    %c0_i32 = arith.constant 0 : i32
    %c0_i32_0 = arith.constant 0 : i32
    %c0_i32_1 = arith.constant 0 : i32
    return %c0_i32, %c0_i32_0 : i32, i32
  }
  func.func @transform_6(%arg0: i32) -> (i32, i32) {
    %c0_i32 = arith.constant 0 : i32
    %c0_i32_0 = arith.constant 0 : i32
    %c0_i32_1 = arith.constant 0 : i32
    return %c0_i32, %c0_i32_0 : i32, i32
  }
  func.func @transform_7(%arg0: i32) -> (i32, i32) {
    %c0_i32 = arith.constant 0 : i32
    %c0_i32_0 = arith.constant 0 : i32
    %c0_i32_1 = arith.constant 0 : i32
    return %c0_i32, %c0_i32_0 : i32, i32
  }
  func.func @transform_8(%arg0: i32) -> (i32, i32) {
    %c0_i32 = arith.constant 0 : i32
    %c0_i32_0 = arith.constant 0 : i32
    %c0_i32_1 = arith.constant 0 : i32
    return %c0_i32, %c0_i32_0 : i32, i32
  }
  func.func @transform_9(%arg0: i32) -> (i32, i32, i32) {
    %c0_i32 = arith.constant 0 : i32
    %c0_i32_0 = arith.constant 0 : i32
    %c0_i32_1 = arith.constant 0 : i32
    %c0_i32_2 = arith.constant 0 : i32
    return %c0_i32, %c0_i32_0, %c0_i32_1 : i32, i32, i32
  }
  func.func @transform_10(%arg0: i32) -> (i32, i32, i32) {
    %c0_i32 = arith.constant 0 : i32
    %c0_i32_0 = arith.constant 0 : i32
    %c0_i32_1 = arith.constant 0 : i32
    return %arg0, %c0_i32, %c0_i32_0 : i32, i32, i32
  }
}

</mosaic_0001>

<bundles_post_ra>
// kernel: dqn_forward.1
= control target key start
LH: loop header
LB: loop body
LE: loop exit
PB: predicated region body
PF: predicated region fallthrough
CT: control target
= control target key end

     0   :  { %s13613_s13 = smov 0   ;;  %s16930_s0 = inlined_call_operand.vmem [shape: f32[512,38], index: 0, kind: input, shape index: {}]   ;;  %s16931_s1 = inlined_call_operand.vmem [shape: f32[512,8], index: 1, kind: input, shape index: {}]   ;;  %s16932_s2 = inlined_call_operand.vmem [shape: f32[38,35], index: 2, kind: input, shape index: {}]   ;;  %s16933_s3 = inlined_call_operand.vmem [shape: f32[1,35], index: 3, kind: input, shape index: {}]   ;;  %s16934_s4 = inlined_call_operand.vmem [shape: f32[3,38], index: 4, kind: input, shape index: {}]   ;;  %s16935_s5 = inlined_call_operand.vmem [shape: f32[48,3], index: 5, kind: input, shape index: {}]   ;;  %s16936_s6 = inlined_call_operand.vmem [shape: f32[48,8], index: 6, kind: input, shape index: {}]   ;;  %s16937_s7 = inlined_call_operand.vmem [shape: f32[12,48], index: 7, kind: input, shape index: {}]   ;;  %s16938_s8 = inlined_call_operand.vmem [shape: f32[12,8], index: 8, kind: input, shape index: {}]   ;;  %s16939_s9 = inlined_call_operand.vmem [shape: f32[5,12,12], index: 9, kind: input, shape index: {}]   ;;  %s16940_s10 = inlined_call_operand.vmem [shape: f32[2,1,256], index: 10, kind: output, shape index: {}]  }
   0x1 LB: > { %s13619_s14 = sadd.s32 4294967295, %s13554_s13   ;;  %p10620_p0 = scmp.ge.s32.totalorder %s13554_s13, 1  ;;  %s13554_s13 = sphi %s13613_s13, %s20_s13  }
   0x2   : > { %p324_p1 = scmp.lt.s32.totalorder %s13554_s13, 3 }
   0x4   : > { %p325_p2 = pnand %p10620_p0, %p324_p1 }
   0x6   : > { %328 = sbr.rel (%p325_p2) target bundleno = 2724 (0xaa4), region = 60 }
   0xd   : > { %v446_v0 = vld [vmem:[%s16932_s2] sm:$0xff]  ;;  %v447_v1 = vld [vmem:[%s16932_s2 + $0x8] sm:$0xff]  ;;  %v448_v2 = vld [vmem:[%s16932_s2 + $0x10] sm:$0xff]  ;;  %vm548_vm0 = vcmask 1045504   ;;  %s10621_s21 = sshll.u32 %s13619_s14, 5  ;;  %vm451_vm1 = vcmask 310272  }
   0xe   : > { %v553_v3 = vand.u32 4294901760, %v446_v0  ;;  %v556_v4 = vand.u32 4294901760, %v447_v1  ;;  %v449_v5 = vld [vmem:[%s16932_s2 + $0x18] sm:$0xff]  ;;  %v559_v6 = vand.u32 4294901760, %v448_v2  ;;  %v450_v7 = vld [vmem:[%s16932_s2 + $0x20] sm:$0x3f] }
   0xf   : > { %v562_v8 = vand.u32 4294901760, %v449_v5  ;;  %p367_p3 = scmp.lt.s32.totalorder %s10621_s21, 63  ;;  %v13647_v13 = vsel %vm548_vm0, %v450_v7, 0  ;;  %vm2416_vm2 = vcmask 285696   ;;  %vm4236_vm3 = vcmask 64512   ;;  %p378_p4 = scmp.lt.s32.totalorder %s13619_s14, 1 }
  0x10   : > { %v13639_v9 = vpack.c.bf16 %v556_v4, %v553_v3  ;;  %v13641_v10 = vsub.f32 %v446_v0, %v553_v3  ;;  %v13643_v11 = vsub.f32 %v447_v1, %v556_v4  ;;  %v13651_v14 = vsub.f32 %v448_v2, %v559_v6 }
  0x11   : > { %v13645_v12 = vpack.c.bf16 %v562_v8, %v559_v6  ;;  %s17915_s21 = smov (!%p367_p3, %s10621_s21), 63  ;;  %v13653_v15 = vsub.f32 %v449_v5, %v562_v8  ;;  %v13662_v18 = vand.u32 4294901760, %v13647_v13  ;;  %vm5476_vm4 = vcmask 1042432   ;;  %s17917_s14 = smov (!%p378_p4, %s13619_s14), 1 }
  0x12   : > { %12095 = vmatprep.subr.bf16.mxu0 %v13639_v9  ;;  %v16942_v16 = vand.u32 4294901760, %v13641_v10  ;;  %v16941_v17 = vand.u32 4294901760, %v13643_v11  ;;  %s10622_s26 = sshll.u32 %s17915_s21, 3  ;;  %vm5457_vm5 = vcmask 23552   ;;  %vm7119_vm6 = vcmask 392192   ;;  %s10625_s17 = sshll.u32 %s17917_s14, 1 }
  0x13   : > { %12097 = vmatpush3.bf16.msra.mxu0 %v13639_v9  ;;  %17312 = vst [vmem:[#allocation2_spill] sm:$0xff] %v13662_v18  ;;  %s13669_s29 = scalar_lea.vmem %s16930_s0, %s10622_s26  ;;  %s15156_s18 = scalar_lea.vmem %s16931_s1, %s10622_s26  ;;  %vm7776_vm7 = vcmask 97280   ;;  %vm7783_vm8 = vcmask 1043456  }
  0x14   : > { %12099 = vmatprep.subr.bf16.mxu0 %v13645_v12  ;;  %v382_v19 = vld [vmem:[%s13669_s29] sm:$0xff]  ;;  %v383_v20 = vld [vmem:[%s13669_s29 + $0x8] sm:$0xff]  ;;  %v384_v21 = vld [vmem:[%s13669_s29 + $0x10] sm:$0xff]  ;;  %v13677_v22 = vsub.f32 %v13641_v10, %v16942_v16  ;;  %v13690_v31 = vsub.f32 %v13643_v11, %v16941_v17  ;;  %s381_s20 = scalar_lea.vmem %s16940_s10, %s10625_s17 }
  0x15   : > { %v453_v25 = vsel %vm451_vm1, %v382_v19, 0  ;;  %v456_v26 = vsel %vm451_vm1, %v383_v20, 0  ;;  %v459_v27 = vsel %vm451_vm1, %v384_v21, 0  ;;  %v385_v28 = vld [vmem:[%s13669_s29 + $0x18] sm:$0xff]  ;;  %v386_v29 = vld [vmem:[%s13669_s29 + $0x20] sm:$0xff]  ;;  %v387_v30 = vld [vmem:[%s13669_s29 + $0x28] sm:$0xff] }
  0x16   : > { %v13693_v32 = vand.u32 4294901760, %v453_v25  ;;  %v13695_v33 = vand.u32 4294901760, %v456_v26  ;;  %v13697_v34 = vand.u32 4294901760, %v459_v27  ;;  %v462_v35 = vsel %vm451_vm1, %v385_v28, 0  ;;  %v388_v36 = vld [vmem:[%s13669_s29 + $0x30] sm:$0xff]  ;;  %v389_v37 = vld [vmem:[%s13669_s29 + $0x38] sm:$0xff] }
  0x17   : > { %12101 = vmatpush3.bf16.msra.mxu0 %v13645_v12  ;;  %v13703_v38 = vand.u32 4294901760, %v462_v35  ;;  %v465_v39 = vsel %vm451_vm1, %v386_v29, 0  ;;  %v468_v40 = vsel %vm451_vm1, %v387_v30, 0  ;;  %v471_v41 = vsel %vm451_vm1, %v388_v36, 0  ;;  %v390_v2 = vld [vmem:[%s13669_s29 + $0x40] sm:$0xff]  ;;  %v391_v3 = vld [vmem:[%s13669_s29 + $0x48] sm:$0xff] }
  0x18   : > { %11754 = vmatprep.subr.mxu0 %v13662_v18  ;;  %v13709_v42 = vsub.f32 %v453_v25, %v13693_v32  ;;  %v13712_v43 = vsub.f32 %v456_v26, %v13695_v33  ;;  %v13715_v44 = vsub.f32 %v459_v27, %v13697_v34  ;;  %v13717_v45 = vand.u32 4294901760, %v465_v39  ;;  %v392_v25 = vld [vmem:[%s13669_s29 + $0x50] sm:$0xff]  ;;  %v393_v26 = vld [vmem:[%s13669_s29 + $0x58] sm:$0xff] }
  0x19   : > { %v13720_v46 = vsub.f32 %v462_v35, %v13703_v38  ;;  %v13722_v47 = vand.u32 4294901760, %v468_v40  ;;  %v13724_v48 = vand.u32 4294901760, %v471_v41  ;;  %v474_v49 = vsel %vm451_vm1, %v389_v37, 0  ;;  %v396_v35 = vld [vmem:[%s13669_s29 + $0x70] sm:$0xff] }
  0x1a   : > { %17313 = vst [vmem:[#allocation3_spill] sm:$0xff] %v13709_v42  ;;  %17314 = vst [vmem:[#allocation4_spill] sm:$0xff] %v13712_v43  ;;  %v13729_v50 = vand.u32 4294901760, %v13709_v42  ;;  %v13732_v51 = vand.u32 4294901760, %v13712_v43  ;;  %v13735_v52 = vand.u32 4294901760, %v13715_v44  ;;  %v13738_v53 = vsub.f32 %v465_v39, %v13717_v45 }
  0x1b   : > { %17315 = vst [vmem:[#allocation5_spill] sm:$0xff] %v13715_v44  ;;  %17316 = vst [vmem:[#allocation6_spill] sm:$0xff] %v13720_v46  ;;  %11755 = vmatpush3.msra.mxu0 %v13662_v18  ;;  %v13741_v54 = vand.u32 4294901760, %v13720_v46  ;;  %v13744_v55 = vsub.f32 %v468_v40, %v13722_v47  ;;  %v13747_v56 = vsub.f32 %v471_v41, %v13724_v48  ;;  %v13749_v57 = vand.u32 4294901760, %v474_v49 }
  0x1c   : > { %17317 = vst [vmem:[#allocation7_spill] sm:$0xff] %v13729_v50  ;;  %17318 = vst [vmem:[#allocation8_spill] sm:$0xff] %v13732_v51  ;;  %v625_v58 = vsub.f32 %v13709_v42, %v13729_v50  ;;  %v635_v59 = vsub.f32 %v13712_v43, %v13732_v51  ;;  %v645_v60 = vsub.f32 %v13715_v44, %v13735_v52  ;;  %v13758_v61 = vand.u32 4294901760, %v13738_v53 }
  0x1d   : > { %17319 = vst [vmem:[#allocation9_spill] sm:$0xff] %v13735_v52  ;;  %17320 = vst [vmem:[#allocation10_spill] sm:$0xff] %v13738_v53  ;;  %v655_v62 = vsub.f32 %v13720_v46, %v13741_v54  ;;  %v13763_v63 = vand.u32 4294901760, %v13744_v55  ;;  %v13766_v0 = vand.u32 4294901760, %v13747_v56  ;;  %v13769_v1 = vsub.f32 %v474_v49, %v13749_v57 }
  0x1e   : > { %17321 = vst [vmem:[#allocation11_spill] sm:$0xff] %v13741_v54  ;;  %17322 = vst [vmem:[#allocation12_spill] sm:$0xff] %v13744_v55  ;;  %v13773_v4 = vand.u32 4294901760, %v625_v58  ;;  %v13775_v5 = vand.u32 4294901760, %v635_v59  ;;  %v13777_v6 = vand.u32 4294901760, %v645_v60  ;;  %v665_v7 = vsub.f32 %v13738_v53, %v13758_v61  ;;  %v394_v59 = vld [vmem:[%s13669_s29 + $0x60] sm:$0xff] }
  0x1f   : > { %17323 = vst [vmem:[#allocation13_spill] sm:$0xff] %v13747_v56  ;;  %17324 = vst [vmem:[#allocation14_spill] sm:$0xff] %v13758_v61  ;;  %v13781_v8 = vand.u32 4294901760, %v655_v62  ;;  %v675_v19 = vsub.f32 %v13744_v55, %v13763_v63  ;;  %v685_v20 = vsub.f32 %v13747_v56, %v13766_v0  ;;  %v13788_v21 = vand.u32 4294901760, %v13769_v1 }
  0x20   : > { %17325 = vst [vmem:[#allocation15_spill] sm:$0xff] %v13763_v63  ;;  %17326 = vst [vmem:[#allocation16_spill] sm:$0xff] %v13766_v0  ;;  %11756 = vmatprep.mubr.f32.mxu0 %v13773_v4  ;;  %v13795_v28 = vand.u32 4294901760, %v665_v7  ;;  %v477_v29 = vsel %vm451_vm1, %v390_v2, 0  ;;  %v480_v30 = vsel %vm451_vm1, %v391_v3, 0  ;;  %v483_v49 = vsel %vm451_vm1, %v392_v25, 0 }
  0x21   : > { %17327 = vst [vmem:[#allocation17_spill] sm:$0xff] %v13769_v1  ;;  %17328 = vst [vmem:[#allocation18_spill] sm:$0xff] %v13773_v4  ;;  %11757 = vmatmul.mubr.f32.vlgmr.msra.gmra.mrb[0].mxu0 %v13775_v5  ;;  %v13802_v36 = vand.u32 4294901760, %v675_v19  ;;  %v13804_v37 = vand.u32 4294901760, %v685_v20  ;;  %v695_v39 = vsub.f32 %v13769_v1, %v13788_v21  ;;  %v13809_v40 = vand.u32 4294901760, %v477_v29 }
  0x22   : > { %17329 = vst [vmem:[#allocation19_spill] sm:$0xff] %v13775_v5  ;;  %17330 = vst [vmem:[#allocation20_spill] sm:$0xff] %v13777_v6  ;;  %11759 = vmatprep.mubr.f32.mxu0 %v13777_v6  ;;  %v13811_v41 = vand.u32 4294901760, %v480_v30  ;;  %v486_v58 = vsel %vm451_vm1, %v393_v26, 0  ;;  %v13820_v2 = vand.u32 4294901760, %v483_v49  ;;  %v947_v20 = vand.u32 4294901760, %v13677_v22 }
  0x23   : > { %17331 = vst [vmem:[#allocation21_spill] sm:$0xff] %v13781_v8  ;;  %17332 = vst [vmem:[#allocation22_spill] sm:$0xff] %v13788_v21  ;;  %v13818_v62 = vand.u32 4294901760, %v695_v39  ;;  %v13822_v3 = vand.u32 4294901760, %v486_v58  ;;  %v13825_v7 = vsub.f32 %v477_v29, %v13809_v40  ;;  %v954_v25 = vand.u32 4294901760, %v13690_v31  ;;  %v395_v26 = vld [vmem:[%s13669_s29 + $0x68] sm:$0xff] }
  0x24   : > { %17333 = vst [vmem:[#allocation23_spill] sm:$0xff] %v13795_v28  ;;  %17334 = vst [vmem:[#allocation24_spill] sm:$0xff] %v13802_v36  ;;  %v13828_v19 = vsub.f32 %v480_v30, %v13811_v41  ;;  %v13838_v60 = vsub.f32 %v483_v49, %v13820_v2  ;;  %v489_v30 = vsel %vm451_vm1, %v394_v59, 0  ;;  %v397_v39 = vld [vmem:[%s13669_s29 + $0x78] sm:$0xff]  ;;  %v492_v59 = vsel %vm451_vm1, %v395_v26, 0  ;;  %v402_v21 = vld [vmem:[%s13669_s29 + $0xa0] sm:$0xff] }
  0x25   : > { %17335 = vst [vmem:[#allocation25_spill] sm:$0xff] %v13804_v37  ;;  %17336 = vst [vmem:[#allocation26_spill] sm:$0xff] %v13818_v62  ;;  %11760 = vmatmul.mubr.f32.gmra.mrb[2].mxu0 %v13781_v8  ;;  %v13841_v29 = vsub.f32 %v486_v58, %v13822_v3  ;;  %v13846_v22 = vand.u32 4294901760, %v13825_v7  ;;  %v12102_v27 = vpack.c.bf16 %v954_v25, %v947_v20  ;;  %v13851_v17 = vand.u32 4294901760, %v489_v30  ;;  %v398_v8 = vld [vmem:[%s13669_s29 + $0x80] sm:$0xff] }
  0x26   : > { %17337 = vst [vmem:[#allocation27_spill] sm:$0xff] %v13825_v7  ;;  %17338 = vst [vmem:[#allocation28_spill] sm:$0xff] %v13828_v19  ;;  %11762 = vmatprep.mubr.f32.mxu0 %v13795_v28  ;;  %v13849_v31 = vand.u32 4294901760, %v13828_v19  ;;  %v13855_v49 = vand.u32 4294901760, %v13838_v60  ;;  %v495_v16 = vsel %vm451_vm1, %v396_v35, 0  ;;  %v13869_v23 = vand.u32 4294901760, %v492_v59 }
  0x27   : > { %17339 = vst [vmem:[#allocation29_spill] sm:$0xff] %v13838_v60  ;;  %17340 = vst [vmem:[#allocation30_spill] sm:$0xff] %v13841_v29  ;;  %v13858_v58 = vand.u32 4294901760, %v13841_v29  ;;  %v705_v24 = vsub.f32 %v13825_v7, %v13846_v22  ;;  %12103 = vmatprep.subr.bf16.mxu0 %v12102_v27  ;;  %v13867_v25 = vsub.f32 %v489_v30, %v13851_v17  ;;  %v13876_v28 = vand.u32 4294901760, %v495_v16 }
  0x28   : > { %17341 = vst [vmem:[#allocation31_spill] sm:$0xff] %v13846_v22  ;;  %17342 = vst [vmem:[#allocation32_spill] sm:$0xff] %v13849_v31  ;;  %v715_v20 = vsub.f32 %v13828_v19, %v13849_v31  ;;  %v725_v26 = vsub.f32 %v13838_v60, %v13855_v49  ;;  %v498_v6 = vsel %vm451_vm1, %v397_v39, 0  ;;  %12105 = vmatpush3.bf16.msra.mxu0 %v12102_v27  ;;  %v17362_v52 = vand.u32 4294901760, %v13651_v14 }
  0x29   : > { %17343 = vst [vmem:[#allocation33_spill] sm:$0xff] %v13855_v49  ;;  %17344 = vst [vmem:[#allocation34_spill] sm:$0xff] %v13858_v58  ;;  %11763 = vmatmul.mubr.f32.gmra.mrb[4].mxu0 %v13802_v36  ;;  %v735_v35 = vsub.f32 %v13841_v29, %v13858_v58  ;;  %v13881_v30 = vand.u32 4294901760, %v705_v24  ;;  %v13886_v36 = vand.u32 4294901760, %v13867_v25  ;;  %v13889_v5 = vsub.f32 %v492_v59, %v13869_v23  ;;  %v406_v29 = vld [vmem:[%s13669_s29 + $0xc0] sm:$0xff] }
  0x2a   : > { %17345 = vst [vmem:[#allocation35_spill] sm:$0xff] %v13867_v25  ;;  %11765 = vmatprep.mubr.f32.mxu0 %v13804_v37  ;;  %v13883_v4 = vand.u32 4294901760, %v715_v20  ;;  %v13891_v58 = vand.u32 4294901760, %v725_v26  ;;  %v13896_v39 = vsub.f32 %v495_v16, %v13876_v28  ;;  %v13898_v24 = vand.u32 4294901760, %v498_v6  ;;  %v399_v20 = vld [vmem:[%s13669_s29 + $0x88] sm:$0xff]  ;;  %v400_v37 = vld [vmem:[%s13669_s29 + $0x90] sm:$0xff] }
  0x2b   : > { %17346 = vst [vmem:[#allocation36_spill] sm:$0xff] %v13881_v30  ;;  %17348 = vst [vmem:[#allocation38_spill] sm:$0xff] %v13886_v36  ;;  %v13893_v49 = vand.u32 4294901760, %v735_v35  ;;  %v745_v59 = vsub.f32 %v13867_v25, %v13886_v36  ;;  %v13907_v31 = vand.u32 4294901760, %v13889_v5  ;;  %v501_v26 = vsel %vm451_vm1, %v398_v8, 0  ;;  %v401_v36 = vld [vmem:[%s13669_s29 + $0x98] sm:$0xff] }
  0x2c   : > { %17347 = vst [vmem:[#allocation37_spill] sm:$0xff] %v13883_v4  ;;  %17349 = vst [vmem:[#allocation39_spill] sm:$0xff] %v13889_v5  ;;  %v13914_v35 = vand.u32 4294901760, %v13896_v39  ;;  %v13917_v22 = vsub.f32 %v498_v6, %v13898_v24  ;;  %v13919_v27 = vand.u32 4294901760, %v501_v26  ;;  %v504_v16 = vsel %vm451_vm1, %v399_v20, 0 }
  0x2d   : > { %17350 = vst [vmem:[#allocation40_spill] sm:$0xff] %v13891_v58  ;;  %17351 = vst [vmem:[#allocation41_spill] sm:$0xff] %v13893_v49  ;;  %11766 = vmatmul.mubr.f32.gmra.mrb[6].mxu0 %v13818_v62  ;;  %v13924_v0 = vand.u32 4294901760, %v745_v59  ;;  %v755_v8 = vsub.f32 %v13889_v5, %v13907_v31  ;;  %v507_v62 = vsel %vm451_vm1, %v400_v37, 0  ;;  %v13938_v54 = vand.u32 4294901760, %v504_v16  ;;  %v403_v37 = vld [vmem:[%s13669_s29 + $0xa8] sm:$0xff] }
  0x2e   : > { %17352 = vst [vmem:[#allocation42_spill] sm:$0xff] %v13896_v39  ;;  %17353 = vst [vmem:[#allocation43_spill] sm:$0xff] %v13907_v31  ;;  %11768 = vmatprep.mubr.f32.mxu0 %v13881_v30  ;;  %v765_v6 = vsub.f32 %v13896_v39, %v13914_v35  ;;  %v13933_v63 = vand.u32 4294901760, %v13917_v22  ;;  %v13936_v61 = vsub.f32 %v501_v26, %v13919_v27  ;;  %v13942_v30 = vand.u32 4294901760, %v507_v62  ;;  %v404_v5 = vld [vmem:[%s13669_s29 + $0xb0] sm:$0xff] }
  0x2f   : > { %17354 = vst [vmem:[#allocation44_spill] sm:$0xff] %v13914_v35  ;;  %17355 = vst [vmem:[#allocation45_spill] sm:$0xff] %v13917_v22  ;;  %v13940_v59 = vand.u32 4294901760, %v755_v8  ;;  %v510_v31 = vsel %vm451_vm1, %v401_v36, 0  ;;  %v513_v20 = vsel %vm451_vm1, %v402_v21, 0  ;;  %v13954_v8 = vsub.f32 %v504_v16, %v13938_v54 }
  0x30   : > { %17356 = vst [vmem:[#allocation46_spill] sm:$0xff] %v13924_v0  ;;  %17357 = vst [vmem:[#allocation47_spill] sm:$0xff] %v13933_v63  ;;  %v775_v35 = vsub.f32 %v13917_v22, %v13933_v63  ;;  %v13951_v26 = vand.u32 4294901760, %v13936_v61  ;;  %v960_v36 = vsub.f32 %v13651_v14, %v17362_v52  ;;  %v13965_v63 = vand.u32 4294901760, %v510_v31 }
  0x31   : > { %17358 = vst [vmem:[#allocation48_spill] sm:$0xff] %v13936_v61  ;;  %17359 = vst [vmem:[#allocation49_spill] sm:$0xff] %v13940_v59  ;;  %11769 = vmatmul.mubr.f32.gmra.mrb[8].mxu0 %v13883_v4  ;;  %v13963_v4 = vsub.f32 %v507_v62, %v13942_v30  ;;  %v13967_v51 = vand.u32 4294901760, %v513_v20  ;;  %v13969_v50 = vand.u32 4294901760, %v765_v6  ;;  %v516_v22 = vsel %vm451_vm1, %v403_v37, 0  ;;  %v405_v6 = vld [vmem:[%s13669_s29 + $0xb8] sm:$0xff] }
  0x32   : > { %17360 = vst [vmem:[#allocation50_spill] sm:$0xff] %v13951_v26  ;;  %17361 = vst [vmem:[#allocation51_spill] sm:$0xff] %v13954_v8  ;;  %11771 = vmatprep.mubr.f32.mxu0 %v13891_v58  ;;  %v13971_v16 = vand.u32 4294901760, %v775_v35  ;;  %v17366_v52 = vand.u32 4294901760, %v13653_v15  ;;  %v13978_v21 = vand.u32 4294901760, %v13954_v8  ;;  %v13981_v62 = vsub.f32 %v510_v31, %v13965_v63 }
  0x33   : > { %17363 = vst [vmem:[#allocation52_spill] sm:$0xff] %v13963_v4  ;;  %17364 = vst [vmem:[#allocation53_spill] sm:$0xff] %v13969_v50  ;;  %v13983_v39 = vand.u32 4294901760, %v516_v22  ;;  %v961_v37 = vand.u32 4294901760, %v960_v36  ;;  %v13994_v31 = vand.u32 4294901760, %v13963_v4  ;;  %v13997_v25 = vsub.f32 %v513_v20, %v13967_v51 }
  0x34   : > { %17365 = vst [vmem:[#allocation54_spill] sm:$0xff] %v13971_v16  ;;  %v967_v58 = vsub.f32 %v13653_v15, %v17366_v52  ;;  %17367 = vst [vmem:[#allocation55_spill] sm:$0xff] %v13978_v21  ;;  %v785_v52 = vsub.f32 %v13936_v61, %v13951_v26  ;;  %v519_v19 = vsel %vm451_vm1, %v404_v5, 0  ;;  %v795_v36 = vsub.f32 %v13954_v8, %v13978_v21  ;;  %v407_v26 = vld [vmem:[%s13669_s29 + $0xc8] sm:$0xff]  ;;  %v408_v61 = vld [vmem:[%s13669_s29 + $0xd0] sm:$0xff] }
  0x35   : > { %17368 = vst [vmem:[#allocation56_spill] sm:$0xff] %v13981_v62  ;;  %11772 = vmatmul.mubr.f32.gmra.mrb[10].mxu0 %v13893_v49  ;;  %17369 = vst [vmem:[#allocation57_spill] sm:$0xff] %v13994_v31  ;;  %v522_v49 = vsel %vm451_vm1, %v405_v6, 0  ;;  %v14005_v35 = vand.u32 4294901760, %v13981_v62  ;;  %v14014_v20 = vsub.f32 %v13647_v13, %v13662_v18  ;;  %v525_v21 = vsel %vm451_vm1, %v406_v29, 0 }
  0x36   : > { %11774 = vmatprep.mubr.f32.mxu0 %v13924_v0  ;;  %17370 = vst [vmem:[#allocation58_spill] sm:$0xff] %v13997_v25  ;;  %v968_v60 = vand.u32 4294901760, %v967_v58  ;;  %v14008_v0 = vsub.f32 %v516_v22, %v13983_v39  ;;  %v14017_v58 = vand.u32 4294901760, %v519_v19  ;;  %v14019_v6 = vand.u32 4294901760, %v522_v49 }
  0x37   : > { %17371 = vst [vmem:[#allocation59_spill] sm:$0xff] %v14005_v35  ;;  %v14023_v22 = vand.u32 4294901760, %v785_v52  ;;  %v805_v8 = vsub.f32 %v13963_v4, %v13994_v31  ;;  %v14028_v13 = vand.u32 4294901760, %v13997_v25  ;;  %v14030_v7 = vand.u32 4294901760, %v525_v21 }
  0x38   : > { %17372 = vst [vmem:[#allocation60_spill] sm:$0xff] %v14008_v0  ;;  %v12106_v5 = vpack.c.bf16 %v968_v60, %v961_v37  ;;  %v14033_v60 = vsub.f32 %v519_v19, %v14017_v58  ;;  %v528_v37 = vsel %vm451_vm1, %v407_v26, 0  ;;  %v531_v29 = vsel %vm451_vm1, %v408_v61, 0  ;;  %v410_v19 = vld [vmem:[%s13669_s29 + $0xe0] sm:$0xff] }
  0x39   : > { %11775 = vmatmul.mubr.f32.gmra.mrb[12].mxu0 %v13940_v59  ;;  %17373 = vst [vmem:[#allocation61_spill] sm:$0xff] %v14023_v22  ;;  %17374 = vst [vmem:[#allocation62_spill] sm:$0xff] %v14028_v13  ;;  %v409_v59 = vld [vmem:[%s13669_s29 + $0xd8] sm:$0xff]  ;;  %v14039_v52 = vand.u32 4294901760, %v14008_v0  ;;  %v14045_v31 = vsub.f32 %v525_v21, %v14030_v7  ;;  %v14047_v4 = vand.u32 4294901760, %v528_v37  ;;  %v14051_v26 = vand.u32 4294901760, %v795_v36 }
  0x3a   : > { %11777 = vmatprep.mubr.f32.mxu0 %v13969_v50  ;;  %12107 = vmatprep.subr.bf16.mxu0 %v12106_v5  ;;  %v14042_v50 = vsub.f32 %v522_v49, %v14019_v6  ;;  %v815_v61 = vsub.f32 %v13981_v62, %v14005_v35  ;;  %v14055_v1 = vand.u32 4294901760, %v531_v29  ;;  %v14061_v49 = vand.u32 4294901760, %v805_v8  ;;  %v411_v35 = vld [vmem:[%s13669_s29 + $0xe8] sm:$0xff] }
  0x3b   : > { %17375 = vst [vmem:[#allocation63_spill] sm:$0xff] %v14039_v52  ;;  %12109 = vmatpush3.bf16.msra.mxu0 %v12106_v5  ;;  %17377 = vst [vmem:[#allocation65_spill] sm:$0xff] %v14045_v31  ;;  %v14058_v5 = vand.u32 4294901760, %v14014_v20  ;;  %v825_v21 = vsub.f32 %v13997_v25, %v14028_v13  ;;  %v534_v36 = vsel %vm451_vm1, %v409_v59, 0  ;;  %v537_v56 = vsel %vm451_vm1, %v410_v19, 0  ;;  %v412_v13 = vld [vmem:[%s13669_s29 + $0xf0] sm:$0xff] }
  0x3c   : > { %17376 = vst [vmem:[#allocation64_spill] sm:$0xff] %v14042_v50  ;;  %17378 = vst [vmem:[#allocation66_spill] sm:$0xff] %v14051_v26  ;;  %v835_v62 = vsub.f32 %v14008_v0, %v14039_v52  ;;  %v14074_v55 = vand.u32 4294901760, %v14042_v50  ;;  %v14077_v8 = vand.u32 4294901760, %v14045_v31  ;;  %v14084_v59 = vand.u32 4294901760, %v815_v61 }
  0x3d   : > { %11778 = vmatmul.mubr.f32.gmra.mrb[14].mxu0 %v13971_v16  ;;  %17379 = vst [vmem:[#allocation67_spill] sm:$0xff] %v14058_v5  ;;  %17380 = vst [vmem:[#allocation68_spill] sm:$0xff] %v14061_v49  ;;  %v14066_v16 = vand.u32 4294901760, %v14033_v60  ;;  %v14087_v19 = vsub.f32 %v531_v29, %v14055_v1  ;;  %v14089_v25 = vand.u32 4294901760, %v534_v36  ;;  %v974_v52 = vsub.f32 %v14014_v20, %v14058_v5  ;;  %v413_v29 = vld [vmem:[%s13669_s29 + $0xf8] sm:$0xff] }
  0x3e   : > { %11780 = vmatprep.mubr.f32.mxu0 %v14023_v22  ;;  %17382 = vst [vmem:[#allocation70_spill] sm:$0xff] %v14074_v55  ;;  %17383 = vst [vmem:[#allocation71_spill] sm:$0xff] %v14077_v8  ;;  %v14080_v22 = vsub.f32 %v528_v37, %v14047_v4  ;;  %v14094_v0 = vand.u32 4294901760, %v825_v21  ;;  %v14098_v18 = vand.u32 4294901760, %v537_v56  ;;  %v540_v61 = vsel %vm451_vm1, %v411_v35, 0 }
  0x3f   : > { %17381 = vst [vmem:[#allocation69_spill] sm:$0xff] %v14066_v16  ;;  %17385 = vst [vmem:[#allocation73_spill] sm:$0xff] %v14084_v59  ;;  %v845_v37 = vsub.f32 %v14033_v60, %v14066_v16  ;;  %v12110_v53 = vpack.c.bf16 %v13643_v11, %v13641_v10  ;;  %v14105_v46 = vand.u32 4294901760, %v835_v62  ;;  %v865_v21 = vsub.f32 %v14045_v31, %v14077_v8 }
  0x40   : > { %17384 = vst [vmem:[#allocation72_spill] sm:$0xff] %v14080_v22  ;;  %17386 = vst [vmem:[#allocation74_spill] sm:$0xff] %v14087_v19  ;;  %v14112_v16 = vand.u32 4294901760, %v14080_v22  ;;  %v14116_v35 = vand.u32 4294901760, %v14087_v19  ;;  %v14121_v5 = vand.u32 4294901760, %v540_v61  ;;  %v975_v62 = vand.u32 4294901760, %v974_v52 }
  0x41   : > { %11781 = vmatmul.mubr.f32.gmra.mrb[16].mxu0 %v14051_v26  ;;  %17387 = vst [vmem:[#allocation75_spill] sm:$0xff] %v14094_v0  ;;  %v543_v26 = vsel %vm451_vm1, %v412_v13, 0  ;;  %17388 = vst [vmem:[#allocation76_spill] sm:$0xff] %v14105_v46  ;;  %v14119_v13 = vsub.f32 %v534_v36, %v14089_v25  ;;  %v14127_v8 = vsub.f32 %v537_v56, %v14098_v18 }
  0x42   : > { %11783 = vmatprep.mubr.f32.mxu0 %v14061_v49  ;;  %v855_v49 = vsub.f32 %v14042_v50, %v14074_v55  ;;  %17389 = vst [vmem:[#allocation77_spill] sm:$0xff] %v14116_v35  ;;  %v14124_v55 = vand.u32 4294901760, %v845_v37  ;;  %v14129_v31 = vand.u32 4294901760, %v543_v26  ;;  %11812 = vmatprep.subr.mxu0 %v975_v62  ;;  %v875_v52 = vsub.f32 %v14080_v22, %v14112_v16 }
  0x43   : > { %17391 = vst [vmem:[#allocation79_spill] sm:$0xff] %v14127_v8  ;;  %11813 = vmatpush3.msra.mxu0 %v975_v62  ;;  %v14138_v36 = vand.u32 4294901760, %v14119_v13  ;;  %v14141_v37 = vsub.f32 %v540_v61, %v14121_v5  ;;  %v14151_v62 = vand.u32 4294901760, %v14127_v8 }
  0x44   : > { %17390 = vst [vmem:[#allocation78_spill] sm:$0xff] %v14124_v55  ;;  %v14132_v50 = vand.u32 4294901760, %v855_v49  ;;  %12111 = vmatprep.subr.bf16.mxu0 %v12110_v53  ;;  %v885_v49 = vsub.f32 %v14087_v19, %v14116_v35  ;;  %v14157_v61 = vand.u32 4294901760, %v875_v52 }
  0x45   : > { %11784 = vmatmul.mubr.f32.gmra.mrb[18].mxu0 %v14084_v59  ;;  %v546_v59 = vsel %vm451_vm1, %v413_v29, 0  ;;  %17393 = vst [vmem:[#allocation81_spill] sm:$0xff] %v14138_v36  ;;  %17394 = vst [vmem:[#allocation82_spill] sm:$0xff] %v14141_v37  ;;  %v14146_v29 = vand.u32 4294901760, %v865_v21 }
  0x46   : > { %11786 = vmatprep.mubr.f32.mxu0 %v14094_v0  ;;  %17392 = vst [vmem:[#allocation80_spill] sm:$0xff] %v14132_v50  ;;  %v14143_v56 = vand.u32 4294901760, %v546_v59  ;;  %17396 = vst [vmem:[#allocation84_spill] sm:$0xff] %v14151_v62  ;;  %v895_v0 = vsub.f32 %v14119_v13, %v14138_v36  ;;  %v14168_v35 = vand.u32 4294901760, %v885_v49 }
  0x47   : > { %17395 = vst [vmem:[#allocation83_spill] sm:$0xff] %v14146_v29  ;;  %17398 = vst [vmem:[#allocation86_spill] sm:$0xff] %v14157_v61 }
  0x48   : > { %v14165_v21 = vsub.f32 %v546_v59, %v14143_v56  ;;  %v14176_v52 = vand.u32 4294901760, %v895_v0 }
  0x49   : > { %11787 = vmatmul.mubr.f32.gmra.mrb[20].mxu0 %v14105_v46  ;;  %v14154_v46 = vsub.f32 %v543_v26, %v14129_v31  ;;  %v905_v26 = vsub.f32 %v14127_v8, %v14151_v62 }
  0x4a   : > { %11789 = vmatprep.mubr.f32.mxu0 %v14124_v55  ;;  %v14162_v55 = vand.u32 4294901760, %v14141_v37  ;;  %17400 = vst [vmem:[#allocation88_spill] sm:$0xff] %v14165_v21  ;;  %v14181_v59 = vand.u32 4294901760, %v14165_v21 }
  0x4b   : > { %17397 = vst [vmem:[#allocation85_spill] sm:$0xff] %v14154_v46  ;;  %v14184_v49 = vand.u32 4294901760, %v905_v26  ;;  %v17408_v26 = vand.u32 4294901760, %v13641_v10  ;;  %v17417_v10 = vld [vmem:[#allocation35_spill] sm:$0xff] }
  0x4c   : > { %17399 = vst [vmem:[#allocation87_spill] sm:$0xff] %v14162_v55  ;;  %v915_v36 = vsub.f32 %v14141_v37, %v14162_v55  ;;  %17402 = vst [vmem:[#allocation90_spill] sm:$0xff] %v14181_v59  ;;  %v935_v0 = vsub.f32 %v14165_v21, %v14181_v59 }
  0x4d   : > { %11790 = vmatmul.mubr.f32.gmra.mrb[22].mxu0 %v14132_v50  ;;  %v14173_v50 = vand.u32 4294901760, %v14154_v46 }
  0x4e   : > { %11792 = vmatprep.mubr.f32.mxu0 %v14146_v29  ;;  %v14189_v62 = vand.u32 4294901760, %v915_v36  ;;  %v14197_v55 = vand.u32 4294901760, %v935_v0  ;;  %v12114_v36 = vpack.c.bf16 %v13653_v15, %v13651_v14  ;;  %v17409_v0 = vand.u32 4294901760, %v13643_v11  ;;  %v17418_v11 = vld [vmem:[#allocation39_spill] sm:$0xff] }
  0x4f   : > { %17401 = vst [vmem:[#allocation89_spill] sm:$0xff] %v14173_v50  ;;  %v925_v29 = vsub.f32 %v14154_v46, %v14173_v50 }
  0x50   : > { %17404 = vst [vmem:[#allocation92_spill] sm:$0xff] %v14197_v55 }
  0x51   : > { %11793 = vmatmul.mubr.f32.gmra.mrb[24].mxu0 %v14157_v61  ;;  %v14194_v61 = vand.u32 4294901760, %v925_v29  ;;  %v17407_v29 = vld [vmem:[#allocation2_spill] sm:$0xff] }
  0x52   : > { %11795 = vmatprep.mubr.f32.mxu0 %v14168_v35 }
  0x53   : > { %17403 = vst [vmem:[#allocation91_spill] sm:$0xff] %v14194_v61 }
  0x55   : > { %11796 = vmatmul.mubr.f32.gmra.mrb[26].mxu0 %v14176_v52 }
  0x56   : > { %11798 = vmatprep.mubr.f32.mxu0 %v14184_v49 }
  0x59   : > { %11799 = vmatmul.mubr.f32.gmra.mrb[28].mxu0 %v14189_v62 }
  0x5a   : > { %11801 = vmatprep.mubr.f32.mxu0 %v14194_v61  ;;  %v17416_v61 = vld [vmem:[#allocation30_spill] sm:$0xff] }
  0x5d   : > { %11802 = vmatmul.mubr.f32.gmra.mrb[30].mxu0 %v14197_v55  ;;  %v17415_v55 = vld [vmem:[#allocation29_spill] sm:$0xff] }
  0x5e   : > { %11814 = vmatprep.mubr.f32.mxu0 %v13693_v32 }
  0x61   : > { %11815 = vmatmul.mubr.f32.vlgmr.msra.gmra.mrb[0].mxu0 %v13695_v33 }
  0x62   : > { %11817 = vmatprep.mubr.f32.mxu0 %v13697_v34  ;;  %12113 = vmatpush3.bf16.msra.mxu0 %v12110_v53  ;;  %v17405_v53 = vld [vmem:[#allocation6_spill] sm:$0xff] }
  0x63   : > { %12115 = vmatprep.subr.bf16.mxu0 %v12114_v36 }
  0x65   : > { %11818 = vmatmul.mubr.f32.gmra.mrb[2].mxu0 %v13703_v38 }
  0x66   : > { %11820 = vmatprep.mubr.f32.mxu0 %v13717_v45  ;;  %12117 = vmatpush3.bf16.msra.mxu0 %v12114_v36  ;;  %v12126_v36 = vpack.c.bf16 %v17409_v0, %v17408_v26  ;;  %v17419_v26 = vld [vmem:[#allocation42_spill] sm:$0xff]  ;;  %v17420_v0 = vld [vmem:[#allocation45_spill] sm:$0xff] }
  0x67   : > { %11870 = vmatprep.subr.mxu0 %v14014_v20 }
  0x69   : > { %11821 = vmatmul.mubr.f32.gmra.mrb[4].mxu0 %v13722_v47 }
  0x6a   : > { %11823 = vmatprep.mubr.f32.mxu0 %v13724_v48  ;;  %11871 = vmatpush3.msra.mxu0 %v14014_v20  ;;  %v17406_v20 = vld [vmem:[#allocation10_spill] sm:$0xff] }
  0x6b   : > { %12119 = vmatprep.subr.bf16.mxu0 %v13639_v9 }
  0x6d   : > { %11824 = vmatmul.mubr.f32.gmra.mrb[6].mxu0 %v13749_v57 }
  0x6e   : > { %11826 = vmatprep.mubr.f32.mxu0 %v13809_v40 }
  0x71   : > { %11827 = vmatmul.mubr.f32.gmra.mrb[8].mxu0 %v13811_v41 }
  0x72   : > { %11829 = vmatprep.mubr.f32.mxu0 %v13820_v2 }
  0x75   : > { %11830 = vmatmul.mubr.f32.gmra.mrb[10].mxu0 %v13822_v3 }
  0x76   : > { %11832 = vmatprep.mubr.f32.mxu0 %v13851_v17 }
  0x79   : > { %11833 = vmatmul.mubr.f32.gmra.mrb[12].mxu0 %v13869_v23 }
  0x7a   : > { %11835 = vmatprep.mubr.f32.mxu0 %v13876_v28 }
  0x7d   : > { %11836 = vmatmul.mubr.f32.gmra.mrb[14].mxu0 %v13898_v24 }
  0x7e   : > { %11838 = vmatprep.mubr.f32.mxu0 %v13919_v27 }
  0x81   : > { %11839 = vmatmul.mubr.f32.gmra.mrb[16].mxu0 %v13938_v54 }
  0x82   : > { %11841 = vmatprep.mubr.f32.mxu0 %v13942_v30 }
  0x85   : > { %11842 = vmatmul.mubr.f32.gmra.mrb[18].mxu0 %v13965_v63 }
  0x86   : > { %11844 = vmatprep.mubr.f32.mxu0 %v13967_v51 }
  0x89   : > { %11845 = vmatmul.mubr.f32.gmra.mrb[20].mxu0 %v13983_v39 }
  0x8a   : > { %11847 = vmatprep.mubr.f32.mxu0 %v14017_v58 }
  0x8d   : > { %11848 = vmatmul.mubr.f32.gmra.mrb[22].mxu0 %v14019_v6 }
  0x8e   : > { %11850 = vmatprep.mubr.f32.mxu0 %v14030_v7 }
  0x91   : > { %11851 = vmatmul.mubr.f32.gmra.mrb[24].mxu0 %v14047_v4 }
  0x92   : > { %11853 = vmatprep.mubr.f32.mxu0 %v14055_v1 }
  0x95   : > { %11854 = vmatmul.mubr.f32.gmra.mrb[26].mxu0 %v14089_v25 }
  0x96   : > { %11856 = vmatprep.mubr.f32.mxu0 %v14098_v18 }
  0x99   : > { %11857 = vmatmul.mubr.f32.gmra.mrb[28].mxu0 %v14121_v5 }
  0x9a   : > { %11859 = vmatprep.mubr.f32.mxu0 %v14129_v31 }
  0x9d   : > { %11860 = vmatmul.mubr.f32.gmra.mrb[30].mxu0 %v14143_v56 }
  0x9e   : > { %11872 = vmatprep.mubr.f32.mxu0 %v13709_v42  ;;  %v17412_v42 = vld [vmem:[#allocation17_spill] sm:$0xff] }
  0xa1   : > { %11873 = vmatmul.mubr.f32.vlgmr.msra.gmra.mrb[0].mxu0 %v13712_v43  ;;  %v17410_v43 = vld [vmem:[#allocation12_spill] sm:$0xff] }
  0xa2   : > { %11875 = vmatprep.mubr.f32.mxu0 %v13715_v44  ;;  %12121 = vmatpush3.bf16.msra.mxu0 %v13639_v9  ;;  %v17411_v44 = vld [vmem:[#allocation13_spill] sm:$0xff] }
  0xa3   : > { %12123 = vmatprep.subr.bf16.mxu0 %v13645_v12 }
  0xa5   : > { %11876 = vmatmul.mubr.f32.gmra.mrb[2].mxu0 %v17405_v53  ;;  %v17413_v53 = vld [vmem:[#allocation27_spill] sm:$0xff] }
  0xa6   : > { %11878 = vmatprep.mubr.f32.mxu0 %v17406_v20  ;;  %12125 = vmatpush3.bf16.msra.mxu0 %v13645_v12  ;;  %v17414_v20 = vld [vmem:[#allocation28_spill] sm:$0xff] }
  0xa7   : > { %11928 = vmatprep.subr.mxu0 %v17407_v29 }
  0xa9   : > { %11879 = vmatmul.mubr.f32.gmra.mrb[4].mxu0 %v17410_v43  ;;  %v17422_v43 = vld [vmem:[#allocation51_spill] sm:$0xff] }
  0xaa   : > { %11881 = vmatprep.mubr.f32.mxu0 %v17411_v44  ;;  %11929 = vmatpush3.msra.mxu0 %v17407_v29  ;;  %v17421_v44 = vld [vmem:[#allocation48_spill] sm:$0xff] }
  0xab   : > { %12127 = vmatprep.subr.bf16.mxu0 %v12126_v36 }
  0xad   : > { %11882 = vmatmul.mubr.f32.gmra.mrb[6].mxu0 %v17412_v42  ;;  %v17423_v42 = vld [vmem:[#allocation52_spill] sm:$0xff] }
  0xae   : > { %11884 = vmatprep.mubr.f32.mxu0 %v17413_v53  ;;  %v17424_v53 = vld [vmem:[#allocation56_spill] sm:$0xff] }
  0xb1   : > { %11885 = vmatmul.mubr.f32.gmra.mrb[8].mxu0 %v17414_v20  ;;  %v17425_v20 = vld [vmem:[#allocation58_spill] sm:$0xff] }
  0xb2   : > { %11887 = vmatprep.mubr.f32.mxu0 %v17415_v55  ;;  %v17426_v55 = vld [vmem:[#allocation60_spill] sm:$0xff] }
  0xb5   : > { %11888 = vmatmul.mubr.f32.gmra.mrb[10].mxu0 %v17416_v61  ;;  %v17431_v61 = vand.u32 4294901760, %v13653_v15  ;;  %v17440_v15 = vld [vmem:[#allocation31_spill] sm:$0xff] }
  0xb6   : > { %11890 = vmatprep.mubr.f32.mxu0 %v17417_v10  ;;  %v17427_v10 = vld [vmem:[#allocation64_spill] sm:$0xff] }
  0xb9   : > { %11891 = vmatmul.mubr.f32.gmra.mrb[12].mxu0 %v17418_v11  ;;  %v17428_v11 = vld [vmem:[#allocation65_spill] sm:$0xff] }
  0xba   : > { %11893 = vmatprep.mubr.f32.mxu0 %v17419_v26  ;;  %v17430_v26 = vand.u32 4294901760, %v13651_v14  ;;  %v17439_v14 = vld [vmem:[#allocation22_spill] sm:$0xff] }
  0xbd   : > { %11894 = vmatmul.mubr.f32.gmra.mrb[14].mxu0 %v17420_v0  ;;  %v17429_v0 = vld [vmem:[#allocation7_spill] sm:$0xff] }
  0xbe   : > { %11896 = vmatprep.mubr.f32.mxu0 %v17421_v44 }
  0xc1   : > { %11897 = vmatmul.mubr.f32.gmra.mrb[16].mxu0 %v17422_v43 }
  0xc2   : > { %11899 = vmatprep.mubr.f32.mxu0 %v17423_v42 }
  0xc5   : > { %11900 = vmatmul.mubr.f32.gmra.mrb[18].mxu0 %v17424_v53 }
  0xc6   : > { %11902 = vmatprep.mubr.f32.mxu0 %v17425_v20 }
  0xc9   : > { %11903 = vmatmul.mubr.f32.gmra.mrb[20].mxu0 %v17426_v55 }
  0xca   : > { %11905 = vmatprep.mubr.f32.mxu0 %v14033_v60 }
  0xcd   : > { %11906 = vmatmul.mubr.f32.gmra.mrb[22].mxu0 %v17427_v10 }
  0xce   : > { %11908 = vmatprep.mubr.f32.mxu0 %v17428_v11  ;;  %v12130_v11 = vpack.c.bf16 %v17431_v61, %v17430_v26  ;;  %v17441_v61 = vld [vmem:[#allocation32_spill] sm:$0xff]  ;;  %v17443_v26 = vld [vmem:[#allocation34_spill] sm:$0xff] }
  0xd1   : > { %11909 = vmatmul.mubr.f32.gmra.mrb[24].mxu0 %v14080_v22  ;;  %v17432_v22 = vld [vmem:[#allocation8_spill] sm:$0xff] }
  0xd2   : > { %11911 = vmatprep.mubr.f32.mxu0 %v14087_v19  ;;  %v17433_v19 = vld [vmem:[#allocation9_spill] sm:$0xff] }
  0xd5   : > { %11912 = vmatmul.mubr.f32.gmra.mrb[26].mxu0 %v14119_v13 }
  0xd6   : > { %11914 = vmatprep.mubr.f32.mxu0 %v14127_v8  ;;  %v17434_v8 = vld [vmem:[#allocation11_spill] sm:$0xff] }
  0xd9   : > { %11915 = vmatmul.mubr.f32.gmra.mrb[28].mxu0 %v14141_v37  ;;  %v17435_v37 = vld [vmem:[#allocation14_spill] sm:$0xff] }
  0xda   : > { %11917 = vmatprep.mubr.f32.mxu0 %v14154_v46  ;;  %v17436_v46 = vld [vmem:[#allocation67_spill] sm:$0xff] }
  0xdd   : > { %11918 = vmatmul.mubr.f32.gmra.mrb[30].mxu0 %v14165_v21  ;;  %v17437_v21 = vld [vmem:[#allocation15_spill] sm:$0xff] }
  0xde   : > { %11930 = vmatprep.mubr.f32.mxu0 %v17429_v0  ;;  %v17438_v0 = vld [vmem:[#allocation16_spill] sm:$0xff] }
  0xe1   : > { %11931 = vmatmul.mubr.f32.vlgmr.msra.gmra.mrb[0].mxu0 %v17432_v22 }
  0xe2   : > { %11933 = vmatprep.mubr.f32.mxu0 %v17433_v19  ;;  %12129 = vmatpush3.bf16.msra.mxu0 %v12126_v36  ;;  %v17442_v36 = vld [vmem:[#allocation33_spill] sm:$0xff]  ;;  %v17459_v19 = vld [vmem:[#allocation84_spill] sm:$0xff] }
  0xe3   : > { %12131 = vmatprep.subr.bf16.mxu0 %v12130_v11 }
  0xe5   : > { %11934 = vmatmul.mubr.f32.gmra.mrb[2].mxu0 %v17434_v8  ;;  %v17449_v8 = vld [vmem:[#allocation55_spill] sm:$0xff] }
  0xe6   : > { %11936 = vmatprep.mubr.f32.mxu0 %v17435_v37  ;;  %12133 = vmatpush3.bf16.msra.mxu0 %v12130_v11  ;;  %v17444_v11 = vld [vmem:[#allocation38_spill] sm:$0xff]  ;;  %v17445_v37 = vld [vmem:[#allocation43_spill] sm:$0xff] }
  0xe7   : > { %11986 = vmatprep.subr.mxu0 %v17436_v46 }
  0xe9   : > { %11937 = vmatmul.mubr.f32.gmra.mrb[4].mxu0 %v17437_v21  ;;  %v17446_v21 = vld [vmem:[#allocation44_spill] sm:$0xff] }
  0xea   : > { %11939 = vmatprep.mubr.f32.mxu0 %v17438_v0  ;;  %11987 = vmatpush3.msra.mxu0 %v17436_v46  ;;  %v17447_v0 = vld [vmem:[#allocation47_spill] sm:$0xff]  ;;  %v17448_v46 = vld [vmem:[#allocation50_spill] sm:$0xff] }
  0xeb   : > { %12135 = vmatprep.subr.bf16.mxu0 %v13639_v9 }
  0xed   : > { %11940 = vmatmul.mubr.f32.gmra.mrb[6].mxu0 %v17439_v14  ;;  %v17450_v14 = vld [vmem:[#allocation57_spill] sm:$0xff] }
  0xee   : > { %11942 = vmatprep.mubr.f32.mxu0 %v17440_v15  ;;  %v17451_v15 = vld [vmem:[#allocation59_spill] sm:$0xff] }
  0xf1   : > { %11943 = vmatmul.mubr.f32.gmra.mrb[8].mxu0 %v17441_v61  ;;  %v17452_v61 = vld [vmem:[#allocation62_spill] sm:$0xff] }
  0xf2   : > { %11945 = vmatprep.mubr.f32.mxu0 %v17442_v36  ;;  %v17453_v36 = vld [vmem:[#allocation63_spill] sm:$0xff] }
  0xf5   : > { %11946 = vmatmul.mubr.f32.gmra.mrb[10].mxu0 %v17443_v26  ;;  %v17454_v26 = vld [vmem:[#allocation69_spill] sm:$0xff] }
  0xf6   : > { %11948 = vmatprep.mubr.f32.mxu0 %v17444_v11  ;;  %v17455_v11 = vld [vmem:[#allocation70_spill] sm:$0xff] }
  0xf9   : > { %11949 = vmatmul.mubr.f32.gmra.mrb[12].mxu0 %v17445_v37  ;;  %v17456_v37 = vld [vmem:[#allocation71_spill] sm:$0xff] }
  0xfa   : > { %11951 = vmatprep.mubr.f32.mxu0 %v17446_v21  ;;  %v17458_v21 = vld [vmem:[#allocation81_spill] sm:$0xff] }
  0xfd   : > { %11952 = vmatmul.mubr.f32.gmra.mrb[14].mxu0 %v17447_v0  ;;  %v17457_v0 = vld [vmem:[#allocation77_spill] sm:$0xff] }
  0xfe   : > { %11954 = vmatprep.mubr.f32.mxu0 %v17448_v46 }
 0x101   : > { %11955 = vmatmul.mubr.f32.gmra.mrb[16].mxu0 %v17449_v8 }
 0x102   : > { %11957 = vmatprep.mubr.f32.mxu0 %v17450_v14  ;;  %v17460_v14 = vld [vmem:[#allocation87_spill] sm:$0xff] }
 0x105   : > { %11958 = vmatmul.mubr.f32.gmra.mrb[18].mxu0 %v17451_v15 }
 0x106   : > { %11960 = vmatprep.mubr.f32.mxu0 %v17452_v61 }
 0x109   : > { %11961 = vmatmul.mubr.f32.gmra.mrb[20].mxu0 %v17453_v36 }
 0x10a   : > { %11963 = vmatprep.mubr.f32.mxu0 %v17454_v26 }
 0x10d   : > { %11964 = vmatmul.mubr.f32.gmra.mrb[22].mxu0 %v17455_v11 }
 0x10e   : > { %11966 = vmatprep.mubr.f32.mxu0 %v17456_v37 }
 0x111   : > { %11967 = vmatmul.mubr.f32.gmra.mrb[24].mxu0 %v14112_v16 }
 0x112   : > { %11969 = vmatprep.mubr.f32.mxu0 %v17457_v0 }
 0x115   : > { %11970 = vmatmul.mubr.f32.gmra.mrb[26].mxu0 %v17458_v21 }
 0x116   : > { %11972 = vmatprep.mubr.f32.mxu0 %v17459_v19 }
 0x119   : > { %11973 = vmatmul.mubr.f32.gmra.mrb[28].mxu0 %v17460_v14 }
 0x11a   : > { %11975 = vmatprep.mubr.f32.mxu0 %v14173_v50 }
 0x11d   : > { %11976 = vmatmul.mubr.f32.gmra.mrb[30].mxu0 %v14181_v59  ;;  %v14329_v59 = vpack.c.bf16 %v13938_v54, %v13919_v27 }
 0x11e   : > { %11988 = vmatprep.mubr.f32.mxu0 %v13693_v32 }
 0x11f   : > { %17461 = vst [vmem:[#allocation2_spill] sm:$0xff] %v14329_v59 }
 0x121   : > { %11989 = vmatmul.mubr.f32.vlgmr.msra.gmra.mrb[0].mxu0 %v13695_v33 }
 0x122   : > { %11991 = vmatprep.mubr.f32.mxu0 %v13697_v34  ;;  %12137 = vmatpush3.bf16.msra.mxu0 %v13639_v9  ;;  %v14363_v9 = vpack.c.bf16 %v13695_v33, %v13693_v32 }
 0x123   : > { %12139 = vmatprep.subr.bf16.mxu0 %v13645_v12 }
 0x124   : > { %17462 = vst [vmem:[#allocation48_spill] sm:$0xff] %v14363_v9 }
 0x125   : > { %11992 = vmatmul.mubr.f32.gmra.mrb[2].mxu0 %v13703_v38 }
 0x126   : > { %11994 = vmatprep.mubr.f32.mxu0 %v13717_v45  ;;  %12141 = vmatpush3.bf16.msra.mxu0 %v13645_v12  ;;  %v14367_v12 = vpack.c.bf16 %v13965_v63, %v13942_v30 }
 0x127   : > { %12044 = vmatprep.subr.mxu0 %v17407_v29 }
 0x128   : > { %17463 = vst [vmem:[#allocation51_spill] sm:$0xff] %v14367_v12 }
 0x129   : > { %11995 = vmatmul.mubr.f32.gmra.mrb[4].mxu0 %v13722_v47 }
 0x12a   : > { %11997 = vmatprep.mubr.f32.mxu0 %v13724_v48  ;;  %12045 = vmatpush3.msra.mxu0 %v17407_v29  ;;  %v14381_v29 = vpack.c.bf16 %v13983_v39, %v13967_v51 }
 0x12b   : > { %12335 = vmatprep.subr.bf16.mxu0 %v14329_v59 }
 0x12c   : > { %17465 = vst [vmem:[#allocation56_spill] sm:$0xff] %v14381_v29 }
 0x12d   : > { %11998 = vmatmul.mubr.f32.gmra.mrb[6].mxu0 %v13749_v57 }
 0x12e   : > { %12000 = vmatprep.mubr.f32.mxu0 %v13809_v40 }
 0x131   : > { %12001 = vmatmul.mubr.f32.gmra.mrb[8].mxu0 %v13811_v41 }
 0x132   : > { %12003 = vmatprep.mubr.f32.mxu0 %v13820_v2 }
 0x135   : > { %12004 = vmatmul.mubr.f32.gmra.mrb[10].mxu0 %v13822_v3 }
 0x136   : > { %12006 = vmatprep.mubr.f32.mxu0 %v13851_v17 }
 0x139   : > { %12007 = vmatmul.mubr.f32.gmra.mrb[12].mxu0 %v13869_v23 }
 0x13a   : > { %12009 = vmatprep.mubr.f32.mxu0 %v13876_v28 }
 0x13d   : > { %12010 = vmatmul.mubr.f32.gmra.mrb[14].mxu0 %v13898_v24 }
 0x13e   : > { %12012 = vmatprep.mubr.f32.mxu0 %v13919_v27 }
 0x141   : > { %12013 = vmatmul.mubr.f32.gmra.mrb[16].mxu0 %v13938_v54 }
 0x142   : > { %12015 = vmatprep.mubr.f32.mxu0 %v13942_v30 }
 0x145   : > { %12016 = vmatmul.mubr.f32.gmra.mrb[18].mxu0 %v13965_v63 }
 0x146   : > { %12018 = vmatprep.mubr.f32.mxu0 %v13967_v51 }
 0x149   : > { %12019 = vmatmul.mubr.f32.gmra.mrb[20].mxu0 %v13983_v39 }
 0x14a   : > { %12021 = vmatprep.mubr.f32.mxu0 %v14017_v58 }
 0x14d   : > { %12022 = vmatmul.mubr.f32.gmra.mrb[22].mxu0 %v14019_v6 }
 0x14e   : > { %12024 = vmatprep.mubr.f32.mxu0 %v14030_v7 }
 0x151   : > { %12025 = vmatmul.mubr.f32.gmra.mrb[24].mxu0 %v14047_v4 }
 0x152   : > { %12027 = vmatprep.mubr.f32.mxu0 %v14055_v1 }
 0x155   : > { %12028 = vmatmul.mubr.f32.gmra.mrb[26].mxu0 %v14089_v25 }
 0x156   : > { %12030 = vmatprep.mubr.f32.mxu0 %v14098_v18 }
 0x159   : > { %12031 = vmatmul.mubr.f32.gmra.mrb[28].mxu0 %v14121_v5 }
 0x15a   : > { %12033 = vmatprep.mubr.f32.mxu0 %v14129_v31 }
 0x15d   : > { %12034 = vmatmul.mubr.f32.gmra.mrb[30].mxu0 %v14143_v56 }
 0x15e   : > { %12046 = vmatprep.mubr.f32.mxu0 %v13693_v32  ;;  %v14377_v32 = vpack.c.bf16 %v13703_v38, %v13697_v34 }
 0x160   : > { %17464 = vst [vmem:[#allocation52_spill] sm:$0xff] %v14377_v32 }
 0x161   : > { %12047 = vmatmul.mubr.f32.vlgmr.msra.gmra.mrb[0].mxu0 %v13695_v33  ;;  %v14391_v33 = vpack.c.bf16 %v13722_v47, %v13717_v45 }
 0x162   : > { %12049 = vmatprep.mubr.f32.mxu0 %v13697_v34  ;;  %12337 = vmatpush3.bf16.xpose.msra.mxu0 %v14363_v9  ;;  %v14395_v34 = vpack.c.bf16 %v14019_v6, %v14017_v58 }
 0x163   : > { %12339 = vmatprep.subr.bf16.mxu0 %v14367_v12  ;;  %17466 = vst [vmem:[#allocation58_spill] sm:$0xff] %v14391_v33 }
 0x164   : > { %17467 = vst [vmem:[#allocation60_spill] sm:$0xff] %v14395_v34 }
 0x165   : > { %12050 = vmatmul.mubr.f32.gmra.mrb[2].mxu0 %v13703_v38  ;;  %v14405_v38 = vpack.c.bf16 %v13749_v57, %v13724_v48 }
 0x166   : > { %12052 = vmatprep.mubr.f32.mxu0 %v13717_v45  ;;  %v14409_v45 = vpack.c.bf16 %v14047_v4, %v14030_v7 }
 0x167   : > { %17468 = vst [vmem:[#allocation64_spill] sm:$0xff] %v14405_v38 }
 0x168   : > { %17469 = vst [vmem:[#allocation8_spill] sm:$0xff] %v14409_v45 }
 0x169   : > { %12053 = vmatmul.mubr.f32.gmra.mrb[4].mxu0 %v13722_v47  ;;  %v14419_v47 = vpack.c.bf16 %v13811_v41, %v13809_v40 }
 0x16a   : > { %12055 = vmatprep.mubr.f32.mxu0 %v13724_v48  ;;  %12341 = vmatpush3.bf16.xpose.msra.mxu0 %v14377_v32  ;;  %v14423_v48 = vpack.c.bf16 %v14089_v25, %v14055_v1 }
 0x16b   : > { %12343 = vmatprep.subr.bf16.mxu0 %v14381_v29  ;;  %17470 = vst [vmem:[#allocation67_spill] sm:$0xff] %v14419_v47 }
 0x16c   : > { %17471 = vst [vmem:[#allocation50_spill] sm:$0xff] %v14423_v48 }
 0x16d   : > { %12056 = vmatmul.mubr.f32.gmra.mrb[6].mxu0 %v13749_v57  ;;  %v3371_v57 = vld [vmem:[%s16934_s4] sm:$0x7] }
 0x16e   : > { %12058 = vmatprep.mubr.f32.mxu0 %v13809_v40  ;;  %v14436_v40 = vpack.c.bf16 %v13822_v3, %v13820_v2 }
 0x170   : > { %17472 = vst [vmem:[#allocation55_spill] sm:$0xff] %v14436_v40 }
 0x171   : > { %12059 = vmatmul.mubr.f32.gmra.mrb[8].mxu0 %v13811_v41  ;;  %v3373_v41 = vsel %vm451_vm1, %v3371_v57, 0  ;;  %v17487_v57 = vld [vmem:[#allocation21_spill] sm:$0xff] }
 0x172   : > { %12061 = vmatprep.mubr.f32.mxu0 %v13820_v2  ;;  %12345 = vmatpush3.bf16.xpose.msra.mxu0 %v14391_v33  ;;  %v14460_v2 = vpack.c.bf16 %v14143_v56, %v14129_v31 }
 0x173   : > { %12347 = vmatprep.subr.bf16.mxu0 %v14395_v34 }
 0x174   : > { %17476 = vst [vmem:[#allocation69_spill] sm:$0xff] %v14460_v2 }
 0x175   : > { %12062 = vmatmul.mubr.f32.gmra.mrb[10].mxu0 %v13822_v3 }
 0x176   : > { %12064 = vmatprep.mubr.f32.mxu0 %v13851_v17 }
 0x179   : > { %12065 = vmatmul.mubr.f32.gmra.mrb[12].mxu0 %v13869_v23 }
 0x17a   : > { %12067 = vmatprep.mubr.f32.mxu0 %v13876_v28  ;;  %12349 = vmatpush3.bf16.xpose.msra.mxu0 %v14405_v38 }
 0x17b   : > { %12351 = vmatprep.subr.bf16.mxu0 %v14409_v45 }
 0x17d   : > { %12068 = vmatmul.mubr.f32.gmra.mrb[14].mxu0 %v13898_v24 }
 0x17e   : > { %12070 = vmatprep.mubr.f32.mxu0 %v13919_v27  ;;  %v17483_v27 = vld [vmem:[#allocation18_spill] sm:$0xff] }
 0x181   : > { %12071 = vmatmul.mubr.f32.gmra.mrb[16].mxu0 %v13938_v54  ;;  %v14440_v54 = vpack.c.bf16 %v14121_v5, %v14098_v18 }
 0x182   : > { %12073 = vmatprep.mubr.f32.mxu0 %v13942_v30  ;;  %12353 = vmatpush3.bf16.xpose.msra.mxu0 %v14419_v47  ;;  %v14446_v30 = vand.u32 4294901760, %v3373_v41 }
 0x183   : > { %12355 = vmatprep.subr.bf16.mxu0 %v14423_v48  ;;  %17473 = vst [vmem:[#allocation59_spill] sm:$0xff] %v14440_v54 }
 0x184   : > { %17474 = vst [vmem:[#allocation62_spill] sm:$0xff] %v14446_v30 }
 0x185   : > { %12074 = vmatmul.mubr.f32.gmra.mrb[18].mxu0 %v13965_v63  ;;  %v14456_v63 = vsub.f32 %v3373_v41, %v14446_v30  ;;  %v17488_v41 = vld [vmem:[#allocation20_spill] sm:$0xff] }
 0x186   : > { %12076 = vmatprep.mubr.f32.mxu0 %v13967_v51  ;;  %v14453_v51 = vpack.c.bf16 %v13869_v23, %v13851_v17  ;;  %v14473_v17 = vpack.c.bf16 %v13898_v24, %v13876_v28  ;;  %v17481_v28 = vld [vmem:[#allocation73_spill] sm:$0xff]  ;;  %v17482_v24 = vld [vmem:[#allocation19_spill] sm:$0xff] }
 0x187   : > { %v14466_v3 = vand.u32 4294901760, %v14456_v63 }
 0x188   : > { %17475 = vst [vmem:[#allocation63_spill] sm:$0xff] %v14453_v51  ;;  %17477 = vst [vmem:[#allocation70_spill] sm:$0xff] %v14473_v17 }
 0x189   : > { %12077 = vmatmul.mubr.f32.gmra.mrb[20].mxu0 %v13983_v39  ;;  %v3475_v23 = vsub.f32 %v14456_v63, %v14466_v3 }
 0x18a   : > { %12079 = vmatprep.mubr.f32.mxu0 %v14017_v58  ;;  %12357 = vmatpush3.bf16.xpose.msra.mxu0 %v14436_v40  ;;  %v17484_v58 = vpack.c.bf16 %v17482_v24, %v17483_v27  ;;  %v17496_v24 = vld [vmem:[#allocation86_spill] sm:$0xff] }
 0x18b   : > { %12359 = vmatprep.subr.bf16.mxu0 %v14440_v54  ;;  %v3476_v39 = vand.u32 4294901760, %v3475_v23  ;;  %v17489_v23 = vpack.c.bf16 %v17487_v57, %v17488_v41  ;;  %v12390_v41 = vpack.c.bf16 %v14189_v62, %v14184_v49  ;;  %v17514_v62 = vld [vmem:[#allocation3_spill] sm:$0xff]  ;;  %v17515_v49 = vld [vmem:[#allocation4_spill] sm:$0xff] }
 0x18d   : > { %12080 = vmatmul.mubr.f32.gmra.mrb[22].mxu0 %v14019_v6  ;;  %v17485_v6 = vld [vmem:[#allocation75_spill] sm:$0xff] }
 0x18e   : > { %12082 = vmatprep.mubr.f32.mxu0 %v14030_v7 }
 0x191   : > { %12083 = vmatmul.mubr.f32.gmra.mrb[24].mxu0 %v14047_v4  ;;  %v17478_v4 = vld [vmem:[#allocation61_spill] sm:$0xff] }
 0x192   : > { %12085 = vmatprep.mubr.f32.mxu0 %v14055_v1  ;;  %12361 = vmatpush3.bf16.xpose.msra.mxu0 %v14453_v51  ;;  %v17479_v1 = vld [vmem:[#allocation66_spill] sm:$0xff] }
 0x193   : > { %12363 = vmatprep.subr.bf16.mxu0 %v14460_v2  ;;  %v12366_v7 = vpack.c.bf16 %v17479_v1, %v17478_v4  ;;  %v17491_v4 = vld [vmem:[#allocation80_spill] sm:$0xff] }
 0x195   : > { %12086 = vmatmul.mubr.f32.gmra.mrb[26].mxu0 %v14089_v25 }
 0x196   : > { %12088 = vmatprep.mubr.f32.mxu0 %v14098_v18  ;;  %v17480_v18 = vld [vmem:[#allocation68_spill] sm:$0xff] }
 0x197   : > { %v12370_v25 = vpack.c.bf16 %v17481_v28, %v17480_v18  ;;  %v17495_v28 = vld [vmem:[#allocation83_spill] sm:$0xff] }
 0x198   : > { %v12382_v27 = vpack.c.bf16 %v17496_v24, %v17495_v28  ;;  %v17512_v24 = vld [vmem:[#allocation53_spill] sm:$0xff] }
 0x199   : > { %12089 = vmatmul.mubr.f32.gmra.mrb[28].mxu0 %v14121_v5 }
 0x19a   : > { %12091 = vmatprep.mubr.f32.mxu0 %v14129_v31  ;;  %12365 = vmatpush3.bf16.xpose.msra.mxu0 %v14473_v17  ;;  %v17486_v31 = vld [vmem:[#allocation76_spill] sm:$0xff] }
 0x19b   : > { %12367 = vmatprep.subr.bf16.mxu0 %v12366_v7  ;;  %v12374_v5 = vpack.c.bf16 %v17486_v31, %v17485_v6  ;;  %v17492_v7 = vld [vmem:[#allocation24_spill] sm:$0xff]  ;;  %v12386_v6 = vpack.c.bf16 %v14176_v52, %v14168_v35  ;;  %v17500_v31 = vld [vmem:[#allocation37_spill] sm:$0xff]  ;;  %v12398_v35 = vpack.c.bf16 %v17422_v43, %v17421_v44  ;;  %v17511_v52 = vld [vmem:[#allocation54_spill] sm:$0xff]  ;;  %v12406_v44 = vpack.c.bf16 %v17426_v55, %v17425_v20 }
 0x19c   : > { %v17525_v55 = vld [vmem:[#allocation28_spill] sm:$0xff] }
 0x19d   : > { %12092 = vmatmul.mubr.f32.gmra.mrb[30].mxu0 %v14143_v56  ;;  %v17490_v56 = vld [vmem:[#allocation78_spill] sm:$0xff] }
 0x19e   : > { %11094 = vmatprep.mubr.f32.mxu0 %v3476_v39  ;;  %v12378_v1 = vpack.c.bf16 %v17491_v4, %v17490_v56  ;;  %v17504_v56 = vld [vmem:[#allocation40_spill] sm:$0xff] }
 0x1a1   : > { %11095 = vmatmul.mubr.f32.vlgmr.msra.gmra.mrb[32].mxu0 %v3476_v39  ;;  %v17493_v39 = vld [vmem:[#allocation23_spill] sm:$0xff] }
 0x1a2   : > { %12369 = vmatpush3.bf16.xpose.msra.mxu0 %v17484_v58  ;;  %11128 = vmatprep.mubr.f32.mxu0 %v14446_v30  ;;  %v17494_v18 = vpack.c.bf16 %v17492_v7, %v17493_v39  ;;  %v17498_v58 = vld [vmem:[#allocation25_spill] sm:$0xff]  ;;  %v17507_v7 = vld [vmem:[#allocation92_spill] sm:$0xff] }
 0x1a3   : > { %12371 = vmatprep.subr.bf16.mxu0 %v12370_v25  ;;  %v17497_v25 = vld [vmem:[#allocation26_spill] sm:$0xff]  ;;  %v17508_v39 = vld [vmem:[#allocation49_spill] sm:$0xff] }
 0x1a4   : > { %v17499_v50 = vpack.c.bf16 %v17497_v25, %v17498_v58  ;;  %v12400_v25 = vpack.c.bf16 %v17515_v49, %v17514_v62  ;;  %v12402_v58 = vpack.c.bf16 %v17424_v53, %v17423_v42  ;;  %v12410_v42 = vpack.c.bf16 %v17427_v10, %v14033_v60  ;;  %v17520_v53 = vld [vmem:[#allocation13_spill] sm:$0xff]  ;;  %v17528_v60 = vld [vmem:[#allocation30_spill] sm:$0xff]  ;;  %v17532_v62 = vld [vmem:[#allocation39_spill] sm:$0xff] }
 0x1aa   : > { %12373 = vmatpush3.bf16.xpose.msra.mxu0 %v17489_v23  ;;  %v17503_v23 = vld [vmem:[#allocation41_spill] sm:$0xff] }
 0x1ab   : > { %12375 = vmatprep.subr.bf16.mxu0 %v12374_v5  ;;  %v17501_v5 = vld [vmem:[#allocation36_spill] sm:$0xff]  ;;  %v17505_v4 = vpack.c.bf16 %v17503_v23, %v17504_v56  ;;  %v17521_v23 = vld [vmem:[#allocation17_spill] sm:$0xff] }
 0x1ac   : > { %v17502_v57 = vpack.c.bf16 %v17500_v31, %v17501_v5  ;;  %v17517_v31 = vld [vmem:[#allocation6_spill] sm:$0xff]  ;;  %v12412_v56 = vpack.c.bf16 %v17521_v23, %v17520_v53 }
 0x1ad   : > { %v17518_v5 = vld [vmem:[#allocation10_spill] sm:$0xff] }
 0x1b2   : > { %12377 = vmatpush3.bf16.xpose.msra.mxu0 %v17494_v18  ;;  %v17509_v18 = vld [vmem:[#allocation46_spill] sm:$0xff] }
 0x1b3   : > { %12379 = vmatprep.subr.bf16.mxu0 %v12378_v1  ;;  %v17506_v1 = vld [vmem:[#allocation91_spill] sm:$0xff]  ;;  %v17510_v28 = vpack.c.bf16 %v17508_v39, %v17509_v18  ;;  %v17526_v39 = vld [vmem:[#allocation74_spill] sm:$0xff] }
 0x1b4   : > { %v12418_v18 = vpack.c.bf16 %v14119_v13, %v17526_v39  ;;  %v2415_v13 = vld [vmem:[%s16933_s3] sm:$0x1] }
 0x1ba   : > { %12381 = vmatpush3.bf16.xpose.msra.mxu0 %v17499_v50  ;;  %v12394_v50 = vpack.c.bf16 %v17507_v7, %v17506_v1  ;;  %v17523_v1 = vld [vmem:[#allocation72_spill] sm:$0xff] }
 0x1bb   : > { %12383 = vmatprep.subr.bf16.mxu0 %v12382_v27  ;;  %v17513_v27 = vpack.c.bf16 %v17511_v52, %v17512_v24  ;;  %v17530_v52 = vld [vmem:[#allocation82_spill] sm:$0xff] }
 0x1c2   : > { %12385 = vmatpush3.bf16.xpose.msra.mxu0 %v17502_v57  ;;  %v17519_v57 = vld [vmem:[#allocation12_spill] sm:$0xff] }
 0x1c3   : > { %12387 = vmatprep.subr.bf16.mxu0 %v12386_v6  ;;  %v17516_v6 = vld [vmem:[#allocation5_spill] sm:$0xff] }
 0x1c4   : > { %v12404_v43 = vpack.c.bf16 %v17517_v31, %v17516_v6  ;;  %v2418_v31 = vsel %vm2416_vm2, %v2415_v13, 0 }
 0x1ca   : > { %12389 = vmatpush3.bf16.xpose.msra.mxu0 %v17505_v4  ;;  %v17522_v4 = vld [vmem:[#allocation65_spill] sm:$0xff] }
 0x1cb   : > { %12391 = vmatprep.subr.bf16.mxu0 %v12390_v41  ;;  %v12408_v41 = vpack.c.bf16 %v17519_v57, %v17518_v5  ;;  %v12414_v7 = vpack.c.bf16 %v17523_v1, %v17522_v4  ;;  %v17537_v5 = vld [vmem:[#allocation42_spill] sm:$0xff]  ;;  %v17538_v57 = vld [vmem:[#allocation45_spill] sm:$0xff] }
 0x1d2   : > { %12393 = vmatpush3.bf16.xpose.msra.mxu0 %v17510_v28  ;;  %v17527_v28 = vld [vmem:[#allocation29_spill] sm:$0xff] }
 0x1d3   : > { %12395 = vmatprep.subr.bf16.mxu0 %v12394_v50  ;;  %v17524_v50 = vld [vmem:[#allocation27_spill] sm:$0xff]  ;;  %v12420_v10 = vpack.c.bf16 %v17528_v60, %v17527_v28 }
 0x1d4   : > { %v12416_v20 = vpack.c.bf16 %v17525_v55, %v17524_v50 }
 0x1da   : > { %12397 = vmatpush3.bf16.xpose.msra.mxu0 %v17513_v27  ;;  %v17531_v27 = vld [vmem:[#allocation35_spill] sm:$0xff] }
 0x1db   : > { %12399 = vmatprep.subr.bf16.mxu0 %v12398_v35  ;;  %v17529_v35 = vld [vmem:[#allocation79_spill] sm:$0xff]  ;;  %v12424_v49 = vpack.c.bf16 %v17532_v62, %v17531_v27 }
 0x1dc   : > { %v12422_v24 = vpack.c.bf16 %v17530_v52, %v17529_v35 }
 0x1e1   : > { %11129 = vmatmul.mubr.f32.vlgmr.msra.gmra.mrb[32].mxu0 %v14446_v30 }
 0x1e2   : > { %12401 = vmatpush3.bf16.xpose.msra.mxu0 %v12400_v25  ;;  %11162 = vmatprep.mubr.f32.mxu0 %v14456_v63  ;;  %v17533_v25 = vld [vmem:[#allocation85_spill] sm:$0xff] }
 0x1e3   : > { %12403 = vmatprep.subr.bf16.mxu0 %v12402_v58  ;;  %v17534_v58 = vld [vmem:[#allocation88_spill] sm:$0xff] }
 0x1e4   : > { %v12426_v6 = vpack.c.bf16 %v17534_v58, %v17533_v25 }
 0x1ea   : > { %12405 = vmatpush3.bf16.xpose.msra.mxu0 %v12404_v43  ;;  %v14558_v43 = vand.u32 4294901760, %v2418_v31 }
 0x1eb   : > { %12407 = vmatprep.subr.bf16.mxu0 %v12406_v44 }
 0x1ec   : > { %17535 = vst [vmem:[#allocation71_spill] sm:$0xff] %v14558_v43  ;;  %v14561_v44 = vsub.f32 %v2418_v31, %v14558_v43 }
 0x1ee   : > { %17536 = vst [vmem:[#allocation61_spill] sm:$0xff] %v14561_v44 }
 0x1f2   : > { %12409 = vmatpush3.bf16.xpose.msra.mxu0 %v12408_v41  ;;  %v12428_v41 = vpack.c.bf16 %v17538_v57, %v17537_v5 }
 0x1f3   : > { %12411 = vmatprep.subr.bf16.mxu0 %v12410_v42  ;;  %v14566_v42 = vand.u32 4294901760, %v14561_v44 }
 0x1f5   : > { %17539 = vst [vmem:[#allocation66_spill] sm:$0xff] %v14566_v42  ;;  %v2616_v53 = vsub.f32 %v14561_v44, %v14566_v42 }
 0x1f7   : > { %v14571_v23 = vand.u32 4294901760, %v2616_v53 }
 0x1f9   : > { %17540 = vst [vmem:[#allocation68_spill] sm:$0xff] %v14571_v23  ;;  %10890 = vmatprep.mubr.f32.mxu1 %v14571_v23 }
 0x1fa   : > { %12413 = vmatpush3.bf16.xpose.msra.mxu0 %v12412_v56 }
 0x1fb   : > { %12415 = vmatprep.subr.bf16.mxu0 %v12414_v7 }
 0x202   : > { %12417 = vmatpush3.bf16.xpose.msra.mxu0 %v12416_v20 }
 0x203   : > { %12419 = vmatprep.subr.bf16.mxu0 %v12418_v18 }
 0x20a   : > { %12421 = vmatpush3.bf16.xpose.msra.mxu0 %v12420_v10 }
 0x20b   : > { %12423 = vmatprep.subr.bf16.mxu0 %v12422_v24 }
 0x212   : > { %12425 = vmatpush3.bf16.xpose.msra.mxu0 %v12424_v49 }
 0x213   : > { %12427 = vmatprep.subr.bf16.mxu0 %v12426_v6 }
 0x21a   : > { %12429 = vmatpush3.bf16.xpose.msra.mxu0 %v12428_v41 }
 0x21b   : > { %12431 = vmatprep.subr.bf16.mxu0 %v14329_v59 }
 0x221   : > { %11163 = vmatmul.mubr.f32.vlgmr.msra.gmra.mrb[32].mxu0 %v14456_v63 }
 0x222   : > { %12433 = vmatpush3.bf16.xpose.msra.mxu0 %v14363_v9  ;;  %11196 = vmatprep.mubr.f32.mxu0 %v14466_v3 }
 0x223   : > { %12435 = vmatprep.subr.bf16.mxu0 %v14367_v12 }
 0x22a   : > { %12437 = vmatpush3.bf16.xpose.msra.mxu0 %v14377_v32 }
 0x22b   : > { %12439 = vmatprep.subr.bf16.mxu0 %v14381_v29 }
 0x232   : > { %12441 = vmatpush3.bf16.xpose.msra.mxu0 %v14391_v33 }
 0x233   : > { %12443 = vmatprep.subr.bf16.mxu0 %v14395_v34 }
 0x234   : > { %v12048_v56 = vpop.f32.mrb[0].mxu0 }
 0x235   : > { %v2384_v4 = vmax.f32 %v12048_v56, 0.0  ;;  %v2193_v1 = vpop.f32.mrb[1].mxu0 }
 0x236   : > { %v2383_v7 = vmax.f32 %v2193_v1, 0.0 }
 0x237   : > { %v2424_v63 = vsel %vm2416_vm2, %v2384_v4, 0 }
 0x238   : > { %v2520_v50 = vand.u32 4294901760, %v2424_v63  ;;  %v2421_v55 = vsel %vm2416_vm2, %v2383_v7, 0  ;;  %v12051_v20 = vpop.f32.mrb[2].mxu0 }
 0x239   : > { %v2517_v39 = vand.u32 4294901760, %v2421_v55  ;;  %v2386_v18 = vmax.f32 %v12051_v20, 0.0  ;;  %v2205_v28 = vpop.f32.mrb[3].mxu0 }
 0x23a   : > { %v14584_v60 = vsub.f32 %v2424_v63, %v2520_v50  ;;  %v2385_v10 = vmax.f32 %v2205_v28, 0.0  ;;  %12445 = vmatpush3.bf16.xpose.msra.mxu0 %v14405_v38 }
 0x23b   : > { %v14587_v35 = vsub.f32 %v2421_v55, %v2517_v39  ;;  %v2430_v52 = vsel %vm2416_vm2, %v2386_v18, 0  ;;  %v14590_v24 = vpack.c.bf16 %v2520_v50, %v2517_v39  ;;  %12447 = vmatprep.subr.bf16.mxu0 %v14409_v45 }
 0x23c   : > { %17541 = vst [vmem:[#allocation73_spill] sm:$0xff] %v14584_v60  ;;  %v17086_v27 = vand.u32 4294901760, %v14584_v60  ;;  %v2526_v62 = vand.u32 4294901760, %v2430_v52  ;;  %v2427_v49 = vsel %vm2416_vm2, %v2385_v10, 0  ;;  %v12054_v25 = vpop.f32.mrb[4].mxu0 }
 0x23d   : > { %17542 = vst [vmem:[#allocation19_spill] sm:$0xff] %v14587_v35  ;;  %17543 = vst [vmem:[#allocation18_spill] sm:$0xff] %v14590_v24  ;;  %v17087_v58 = vand.u32 4294901760, %v14587_v35  ;;  %v2523_v6 = vand.u32 4294901760, %v2427_v49  ;;  %v2388_v13 = vmax.f32 %v12054_v25, 0.0  ;;  %v2217_v31 = vpop.f32.mrb[5].mxu0 }
 0x23e   : > { %v2635_v57 = vsub.f32 %v14584_v60, %v17086_v27  ;;  %v14601_v41 = vsub.f32 %v2430_v52, %v2526_v62  ;;  %v2387_v53 = vmax.f32 %v2217_v31, 0.0 }
 0x23f   : > { %v2628_v56 = vsub.f32 %v14587_v35, %v17087_v58  ;;  %v14606_v4 = vsub.f32 %v2427_v49, %v2523_v6  ;;  %v2436_v1 = vsel %vm2416_vm2, %v2388_v13, 0  ;;  %v14609_v7 = vpack.c.bf16 %v2526_v62, %v2523_v6 }
 0x240   : > { %v2636_v63 = vand.u32 4294901760, %v2635_v57  ;;  %v17088_v50 = vand.u32 4294901760, %v14601_v41  ;;  %v2532_v55 = vand.u32 4294901760, %v2436_v1  ;;  %v2433_v20 = vsel %vm2416_vm2, %v2387_v53, 0  ;;  %v12057_v39 = vpop.f32.mrb[6].mxu0 }
 0x241   : > { %17544 = vst [vmem:[#allocation75_spill] sm:$0xff] %v14609_v7  ;;  %v2629_v18 = vand.u32 4294901760, %v2628_v56  ;;  %v17089_v28 = vand.u32 4294901760, %v14606_v4  ;;  %v2529_v10 = vand.u32 4294901760, %v2433_v20  ;;  %v2390_v52 = vmax.f32 %v12057_v39, 0.0  ;;  %v2229_v25 = vpop.f32.mrb[7].mxu0 }
 0x242   : > { %v2649_v49 = vsub.f32 %v14601_v41, %v17088_v50  ;;  %v14617_v13 = vsub.f32 %v2436_v1, %v2532_v55  ;;  %v2389_v62 = vmax.f32 %v2229_v25, 0.0  ;;  %12449 = vmatpush3.bf16.xpose.msra.mxu0 %v14419_v47 }
 0x243   : > { %v2642_v31 = vsub.f32 %v14606_v4, %v17089_v28  ;;  %v14625_v57 = vsub.f32 %v2433_v20, %v2529_v10  ;;  %v2442_v53 = vsel %vm2416_vm2, %v2390_v52, 0  ;;  %v14628_v56 = vpack.c.bf16 %v2532_v55, %v2529_v10  ;;  %12451 = vmatprep.subr.bf16.mxu0 %v14423_v48 }
 0x244   : > { %v2650_v1 = vand.u32 4294901760, %v2649_v49  ;;  %v17098_v39 = vand.u32 4294901760, %v14617_v13  ;;  %v2538_v25 = vand.u32 4294901760, %v2442_v53  ;;  %v2439_v27 = vsel %vm2416_vm2, %v2389_v62, 0  ;;  %v12060_v58 = vpop.f32.mrb[8].mxu0 }
 0x245   : > { %17545 = vst [vmem:[#allocation76_spill] sm:$0xff] %v14628_v56  ;;  %v2643_v6 = vand.u32 4294901760, %v2642_v31  ;;  %v17102_v5 = vand.u32 4294901760, %v14625_v57  ;;  %v2535_v50 = vand.u32 4294901760, %v2439_v27  ;;  %v2392_v28 = vmax.f32 %v12060_v58, 0.0  ;;  %v2241_v20 = vpop.f32.mrb[9].mxu0 }
 0x246   : > { %v2663_v55 = vsub.f32 %v14617_v13, %v17098_v39  ;;  %v14637_v10 = vsub.f32 %v2442_v53, %v2538_v25  ;;  %v2391_v52 = vmax.f32 %v2241_v20, 0.0  ;;  %v14639_v49 = vpack.c.bf16 %v2636_v63, %v2629_v18 }
 0x247   : > { %v2656_v62 = vsub.f32 %v14625_v57, %v17102_v5  ;;  %v14644_v42 = vsub.f32 %v2439_v27, %v2535_v50  ;;  %v2448_v31 = vsel %vm2416_vm2, %v2392_v28, 0  ;;  %v14647_v44 = vpack.c.bf16 %v2538_v25, %v2535_v50 }
 0x248   : > { %17546 = vst [vmem:[#allocation21_spill] sm:$0xff] %v14639_v49  ;;  %v2664_v58 = vand.u32 4294901760, %v2663_v55  ;;  %v17101_v35 = vand.u32 4294901760, %v14637_v10  ;;  %v2544_v60 = vand.u32 4294901760, %v2448_v31  ;;  %v2445_v53 = vsel %vm2416_vm2, %v2391_v52, 0  ;;  %v12063_v39 = vpop.f32.mrb[10].mxu0 }
 0x249   : > { %17547 = vst [vmem:[#allocation20_spill] sm:$0xff] %v14647_v44  ;;  %v2657_v20 = vand.u32 4294901760, %v2656_v62  ;;  %v17105_v63 = vand.u32 4294901760, %v14644_v42  ;;  %v2541_v18 = vand.u32 4294901760, %v2445_v53  ;;  %v2394_v48 = vmax.f32 %v12063_v39, 0.0  ;;  %v2253_v47 = vpop.f32.mrb[11].mxu0 }
 0x24a   : > { %v2677_v27 = vsub.f32 %v14637_v10, %v17101_v35  ;;  %v14655_v28 = vsub.f32 %v2448_v31, %v2544_v60  ;;  %v2393_v50 = vmax.f32 %v2253_v47, 0.0  ;;  %v14657_v25 = vpack.c.bf16 %v2650_v1, %v2643_v6  ;;  %12453 = vmatpush3.bf16.xpose.msra.mxu0 %v14436_v40 }
 0x24b   : > { %v2670_v55 = vsub.f32 %v14644_v42, %v17105_v63  ;;  %v14663_v52 = vsub.f32 %v2445_v53, %v2541_v18  ;;  %v2454_v39 = vsel %vm2416_vm2, %v2394_v48, 0  ;;  %v14666_v62 = vpack.c.bf16 %v2544_v60, %v2541_v18  ;;  %12455 = vmatprep.subr.bf16.mxu0 %v14440_v54 }
 0x24c   : > { %17548 = vst [vmem:[#allocation78_spill] sm:$0xff] %v14657_v25  ;;  %v2678_v35 = vand.u32 4294901760, %v2677_v27  ;;  %v17110_v31 = vand.u32 4294901760, %v14655_v28  ;;  %v2550_v47 = vand.u32 4294901760, %v2454_v39  ;;  %v2451_v6 = vsel %vm2416_vm2, %v2393_v50, 0  ;;  %v12066_v1 = vpop.f32.mrb[12].mxu0 }
 0x24d   : > { %v2671_v5 = vand.u32 4294901760, %v2670_v55  ;;  %v17114_v40 = vand.u32 4294901760, %v14663_v52  ;;  %v2547_v45 = vand.u32 4294901760, %v2451_v6  ;;  %v2396_v63 = vmax.f32 %v12066_v1, 0.0  ;;  %v2265_v53 = vpop.f32.mrb[13].mxu0 }
 0x24e   : > { %v2691_v48 = vsub.f32 %v14655_v28, %v17110_v31  ;;  %v14675_v60 = vsub.f32 %v2454_v39, %v2550_v47  ;;  %v2395_v18 = vmax.f32 %v2265_v53, 0.0  ;;  %v14677_v27 = vpack.c.bf16 %v2664_v58, %v2657_v20 }
 0x24f   : > { %v2684_v50 = vsub.f32 %v14663_v52, %v17114_v40  ;;  %v14682_v54 = vsub.f32 %v2451_v6, %v2547_v45  ;;  %v2460_v55 = vsel %vm2416_vm2, %v2396_v63, 0  ;;  %v14685_v38 = vpack.c.bf16 %v2550_v47, %v2547_v45 }
 0x250   : > { %17549 = vst [vmem:[#allocation80_spill] sm:$0xff] %v14677_v27  ;;  %v2692_v1 = vand.u32 4294901760, %v2691_v48  ;;  %v17113_v34 = vand.u32 4294901760, %v14675_v60  ;;  %v2556_v33 = vand.u32 4294901760, %v2460_v55  ;;  %v2457_v39 = vsel %vm2416_vm2, %v2395_v18, 0  ;;  %v12069_v31 = vpop.f32.mrb[14].mxu0 }
 0x251   : > { %v2685_v53 = vand.u32 4294901760, %v2684_v50  ;;  %v17117_v58 = vand.u32 4294901760, %v14682_v54  ;;  %v2553_v20 = vand.u32 4294901760, %v2457_v39  ;;  %v2398_v29 = vmax.f32 %v12069_v31, 0.0  ;;  %v2277_v32 = vpop.f32.mrb[15].mxu0 }
 0x252   : > { %v2705_v6 = vsub.f32 %v14675_v60, %v17113_v34  ;;  %v14693_v63 = vsub.f32 %v2460_v55, %v2556_v33  ;;  %v2397_v45 = vmax.f32 %v2277_v32, 0.0  ;;  %v14695_v47 = vpack.c.bf16 %v2678_v35, %v2671_v5  ;;  %12457 = vmatpush3.bf16.xpose.msra.mxu0 %v14453_v51 }
 0x253   : > { %v2698_v48 = vsub.f32 %v14682_v54, %v17117_v58  ;;  %v14701_v18 = vsub.f32 %v2457_v39, %v2553_v20  ;;  %v2466_v31 = vsel %vm2416_vm2, %v2398_v29, 0  ;;  %v14704_v50 = vpack.c.bf16 %v2556_v33, %v2553_v20  ;;  %12459 = vmatprep.subr.bf16.mxu0 %v14460_v2 }
 0x254   : > { %17550 = vst [vmem:[#allocation24_spill] sm:$0xff] %v14695_v47  ;;  %v2706_v34 = vand.u32 4294901760, %v2705_v6  ;;  %v17121_v55 = vand.u32 4294901760, %v14693_v63  ;;  %v2562_v32 = vand.u32 4294901760, %v2466_v31  ;;  %v2463_v35 = vsel %vm2416_vm2, %v2397_v45, 0  ;;  %v12072_v5 = vpop.f32.mrb[16].mxu0 }
 0x255   : > { %v2699_v40 = vand.u32 4294901760, %v2698_v48  ;;  %v17123_v51 = vand.u32 4294901760, %v14701_v18  ;;  %v2559_v12 = vand.u32 4294901760, %v2463_v35  ;;  %v2400_v58 = vmax.f32 %v12072_v5, 0.0  ;;  %v2289_v39 = vpop.f32.mrb[17].mxu0 }
 0x256   : > { %v2719_v29 = vsub.f32 %v14693_v63, %v17121_v55  ;;  %v14713_v33 = vsub.f32 %v2466_v31, %v2562_v32  ;;  %v2399_v20 = vmax.f32 %v2289_v39, 0.0  ;;  %v14715_v6 = vpack.c.bf16 %v2692_v1, %v2685_v53 }
 0x257   : > { %v2712_v45 = vsub.f32 %v14701_v18, %v17123_v51  ;;  %v14720_v2 = vsub.f32 %v2463_v35, %v2559_v12  ;;  %v2472_v48 = vsel %vm2416_vm2, %v2400_v58, 0  ;;  %v14723_v9 = vpack.c.bf16 %v2562_v32, %v2559_v12 }
 0x258   : > { %17551 = vst [vmem:[#allocation23_spill] sm:$0xff] %v14715_v6  ;;  %v2720_v5 = vand.u32 4294901760, %v2719_v29  ;;  %v17122_v47 = vand.u32 4294901760, %v14713_v33  ;;  %v2568_v59 = vand.u32 4294901760, %v2472_v48  ;;  %v2469_v31 = vsel %vm2416_vm2, %v2399_v20, 0  ;;  %v12075_v55 = vpop.f32.mrb[18].mxu0 }
 0x259   : > { %17552 = vst [vmem:[#allocation83_spill] sm:$0xff] %v14723_v9  ;;  %v2713_v39 = vand.u32 4294901760, %v2712_v45  ;;  %v17125_v1 = vand.u32 4294901760, %v14720_v2  ;;  %v2565_v53 = vand.u32 4294901760, %v2469_v31  ;;  %v2402_v6 = vmax.f32 %v12075_v55, 0.0  ;;  %v2301_v27 = vpop.f32.mrb[19].mxu0 }
 0x25a   : > { %v14731_v35 = vsub.f32 %v14713_v33, %v17122_v47  ;;  %v14733_v12 = vsub.f32 %v2472_v48, %v2568_v59  ;;  %v2401_v58 = vmax.f32 %v2301_v27, 0.0  ;;  %v14735_v32 = vpack.c.bf16 %v2706_v34, %v2699_v40  ;;  %12461 = vmatpush3.bf16.xpose.msra.mxu0 %v14473_v17 }
 0x25b   : > { %v14741_v29 = vsub.f32 %v14720_v2, %v17125_v1  ;;  %v14743_v20 = vsub.f32 %v2469_v31, %v2565_v53  ;;  %v2478_v55 = vsel %vm2416_vm2, %v2402_v6, 0  ;;  %v14746_v45 = vpack.c.bf16 %v2568_v59, %v2565_v53 }
 0x25c   : > { %17553 = vst [vmem:[#allocation86_spill] sm:$0xff] %v14735_v32  ;;  %v17132_v48 = vand.u32 4294901760, %v14733_v12  ;;  %v2574_v27 = vand.u32 4294901760, %v2478_v55  ;;  %v2475_v34 = vsel %vm2416_vm2, %v2401_v58, 0  ;;  %v12078_v40 = vpop.f32.mrb[20].mxu0  ;;  %v14760_v58 = vpack.c.bf16 %v2720_v5, %v2713_v39 }
 0x25d   : > { %17554 = vst [vmem:[#allocation26_spill] sm:$0xff] %v14746_v45  ;;  %v2571_v1 = vand.u32 4294901760, %v2475_v34  ;;  %v2404_v32 = vmax.f32 %v12078_v40, 0.0  ;;  %v2313_v31 = vpop.f32.mrb[21].mxu0  ;;  %12143 = vmatprep.subr.bf16.mxu1 %v14746_v45  ;;  %v17557_v40 = vand.u32 4294901760, %v14743_v20 }
 0x25e   : > { %v14754_v6 = vsub.f32 %v2478_v55, %v2574_v27  ;;  %v2403_v59 = vmax.f32 %v2313_v31, 0.0  ;;  %12145 = vmatpush3.bf16.xpose.msra.mxu1 %v14590_v24  ;;  %v2747_v53 = vsub.f32 %v14733_v12, %v17132_v48  ;;  %17555 = vst [vmem:[#allocation25_spill] sm:$0xff] %v14760_v58 }
 0x25f   : > { %v14762_v47 = vsub.f32 %v2475_v34, %v2571_v1  ;;  %v2484_v51 = vsel %vm2416_vm2, %v2404_v32, 0  ;;  %v14765_v17 = vpack.c.bf16 %v2574_v27, %v2571_v1  ;;  %v2740_v55 = vsub.f32 %v14743_v20, %v17557_v40 }
 0x260   : > { %v17135_v31 = vand.u32 4294901760, %v14754_v6  ;;  %v2580_v45 = vand.u32 4294901760, %v2484_v51  ;;  %v2481_v24 = vsel %vm2416_vm2, %v2403_v59, 0  ;;  %v12081_v25 = vpop.f32.mrb[22].mxu0  ;;  %v2748_v43 = vand.u32 4294901760, %v2747_v53 }
 0x261   : > { %17556 = vst [vmem:[#allocation37_spill] sm:$0xff] %v14765_v17  ;;  %v2577_v39 = vand.u32 4294901760, %v2481_v24  ;;  %v2406_v34 = vmax.f32 %v12081_v25, 0.0  ;;  %v2325_v48 = vpop.f32.mrb[23].mxu0  ;;  %12147 = vmatprep.subr.bf16.mxu1 %v14765_v17  ;;  %v2741_v1 = vand.u32 4294901760, %v2740_v55  ;;  %11197 = vmatmul.mubr.f32.vlgmr.msra.gmra.mrb[32].mxu0 %v14466_v3  ;;  %v12462_v59 = vpack.c.bf16 %v17449_v8, %v17448_v46 }
 0x262   : > { %v14775_v32 = vsub.f32 %v2484_v51, %v2580_v45  ;;  %v2405_v27 = vmax.f32 %v2325_v48, 0.0  ;;  %v2761_v40 = vsub.f32 %v14754_v6, %v17135_v31  ;;  %11230 = vmatprep.mubr.f32.mxu0 %v14446_v30  ;;  %v17560_v31 = vand.u32 4294901760, %v14762_v47 }
 0x263   : > { %v14783_v53 = vsub.f32 %v2481_v24, %v2577_v39  ;;  %v2490_v25 = vsel %vm2416_vm2, %v2406_v34, 0  ;;  %v14786_v5 = vpack.c.bf16 %v2580_v45, %v2577_v39  ;;  %v14788_v55 = vpack.c.bf16 %v2748_v43, %v2741_v1  ;;  %12463 = vmatprep.subr.bf16.mxu0 %v12462_v59 }
 0x264   : > { %v17140_v51 = vand.u32 4294901760, %v14775_v32  ;;  %v2586_v3 = vand.u32 4294901760, %v2490_v25  ;;  %v2487_v48 = vsel %vm2416_vm2, %v2405_v27, 0  ;;  %v12084_v17 = vpop.f32.mrb[24].mxu0  ;;  %v2754_v8 = vsub.f32 %v14762_v47, %v17560_v31 }
 0x265   : > { %17558 = vst [vmem:[#allocation36_spill] sm:$0xff] %v14786_v5  ;;  %17559 = vst [vmem:[#allocation41_spill] sm:$0xff] %v14788_v55  ;;  %v17143_v46 = vand.u32 4294901760, %v14783_v53  ;;  %v2583_v24 = vand.u32 4294901760, %v2487_v48  ;;  %v2408_v58 = vmax.f32 %v12084_v17, 0.0  ;;  %v2337_v34 = vpop.f32.mrb[25].mxu0 }
 0x266   : > { %v2762_v45 = vand.u32 4294901760, %v2761_v40  ;;  %v14796_v39 = vsub.f32 %v2490_v25, %v2586_v3  ;;  %v2407_v43 = vmax.f32 %v2337_v34, 0.0  ;;  %12149 = vmatpush3.bf16.xpose.msra.mxu1 %v14609_v7  ;;  %v2755_v1 = vand.u32 4294901760, %v2754_v8 }
 0x267   : > { %v2775_v27 = vsub.f32 %v14775_v32, %v17140_v51  ;;  %v14802_v30 = vsub.f32 %v2487_v48, %v2583_v24  ;;  %v2496_v31 = vsel %vm2416_vm2, %v2408_v58, 0  ;;  %12151 = vmatprep.subr.bf16.mxu1 %v14786_v5  ;;  %v14806_v59 = vpack.c.bf16 %v2586_v3, %v2583_v24 }
 0x268   : > { %v2768_v17 = vsub.f32 %v14783_v53, %v17143_v46  ;;  %v17144_v40 = vand.u32 4294901760, %v14796_v39  ;;  %v2592_v25 = vand.u32 4294901760, %v2496_v31  ;;  %v2493_v8 = vsel %vm2416_vm2, %v2407_v43, 0  ;;  %v12087_v34 = vpop.f32.mrb[26].mxu0 }
 0x269   : > { %17561 = vst [vmem:[#allocation40_spill] sm:$0xff] %v14806_v59  ;;  %v14813_v7 = vpack.c.bf16 %v2762_v45, %v2755_v1  ;;  %v17146_v48 = vand.u32 4294901760, %v14802_v30  ;;  %v2589_v51 = vand.u32 4294901760, %v2493_v8  ;;  %v2410_v58 = vmax.f32 %v12087_v34, 0.0  ;;  %v2349_v49 = vpop.f32.mrb[27].mxu0 }
 0x26a   : > { %v2769_v5 = vand.u32 4294901760, %v2768_v17  ;;  %v14816_v3 = vsub.f32 %v2496_v31, %v2592_v25  ;;  %v2409_v24 = vmax.f32 %v2349_v49, 0.0  ;;  %v2776_v14 = vand.u32 4294901760, %v2775_v27 }
 0x26b   : > { %17562 = vst [vmem:[#allocation91_spill] sm:$0xff] %v14813_v7  ;;  %v2789_v46 = vsub.f32 %v14796_v39, %v17144_v40  ;;  %v14821_v19 = vsub.f32 %v2493_v8, %v2589_v51  ;;  %v2502_v43 = vsel %vm2416_vm2, %v2410_v58, 0  ;;  %v14824_v45 = vpack.c.bf16 %v2592_v25, %v2589_v51 }
 0x26c   : > { %v2782_v1 = vsub.f32 %v14802_v30, %v17146_v48  ;;  %v17149_v17 = vand.u32 4294901760, %v14816_v3  ;;  %v2598_v31 = vand.u32 4294901760, %v2502_v43  ;;  %v2499_v49 = vsel %vm2416_vm2, %v2409_v24, 0  ;;  %v12090_v27 = vpop.f32.mrb[28].mxu0 }
 0x26d   : > { %v14831_v34 = vpack.c.bf16 %v2776_v14, %v2769_v5  ;;  %v17153_v40 = vand.u32 4294901760, %v14821_v19  ;;  %v2595_v8 = vand.u32 4294901760, %v2499_v49  ;;  %v2412_v7 = vmax.f32 %v12090_v27, 0.0  ;;  %v2361_v23 = vpop.f32.mrb[29].mxu0 }
 0x26e   : > { %v2783_v58 = vand.u32 4294901760, %v2782_v1  ;;  %v14834_v51 = vsub.f32 %v2502_v43, %v2598_v31  ;;  %v2411_v25 = vmax.f32 %v2361_v23, 0.0  ;;  %12153 = vmatpush3.bf16.xpose.msra.mxu1 %v14628_v56  ;;  %v2790_v48 = vand.u32 4294901760, %v2789_v46 }
 0x26f   : > { %17563 = vst [vmem:[#allocation92_spill] sm:$0xff] %v14831_v34  ;;  %v2803_v55 = vsub.f32 %v14816_v3, %v17149_v17  ;;  %v14840_v24 = vsub.f32 %v2499_v49, %v2595_v8  ;;  %v2508_v14 = vsel %vm2416_vm2, %v2412_v7, 0  ;;  %12155 = vmatprep.subr.bf16.mxu1 %v14806_v59  ;;  %v14844_v5 = vpack.c.bf16 %v2598_v31, %v2595_v8 }
 0x270   : > { %v2796_v43 = vsub.f32 %v14821_v19, %v17153_v40  ;;  %v17154_v23 = vand.u32 4294901760, %v14834_v51  ;;  %v2604_v1 = vand.u32 4294901760, %v2508_v14  ;;  %v2505_v46 = vsel %vm2416_vm2, %v2411_v25, 0  ;;  %v12093_v27 = vpop.f32.mrb[30].mxu0 }
 0x271   : > { %v14851_v56 = vpack.c.bf16 %v2790_v48, %v2783_v58  ;;  %v17155_v49 = vand.u32 4294901760, %v14840_v24  ;;  %v2601_v17 = vand.u32 4294901760, %v2505_v46  ;;  %v2414_v7 = vmax.f32 %v12093_v27, 0.0  ;;  %v2373_v34 = vpop.f32.mrb[31].mxu0 }
 0x272   : > { %v2797_v59 = vand.u32 4294901760, %v2796_v43  ;;  %v14854_v31 = vsub.f32 %v2508_v14, %v2604_v1  ;;  %v2413_v8 = vmax.f32 %v2373_v34, 0.0  ;;  %v2804_v9 = vand.u32 4294901760, %v2803_v55 }
 0x273   : > { %17564 = vst [vmem:[#allocation49_spill] sm:$0xff] %v14851_v56  ;;  %v2817_v40 = vsub.f32 %v14834_v51, %v17154_v23  ;;  %v14859_v21 = vsub.f32 %v2505_v46, %v2601_v17  ;;  %v2514_v25 = vsel %vm2416_vm2, %v2414_v7, 0  ;;  %v14862_v48 = vpack.c.bf16 %v2604_v1, %v2601_v17 }
 0x274   : > { %v2810_v58 = vsub.f32 %v14840_v24, %v17155_v49  ;;  %v2830_v43 = vand.u32 4294901760, %v14854_v31  ;;  %v2610_v14 = vand.u32 4294901760, %v2514_v25  ;;  %v2511_v34 = vsel %vm2416_vm2, %v2413_v8, 0  ;;  %v17567_v8 = vld [vmem:[#allocation7_spill] sm:$0xff] }
 0x275   : > { %v14869_v55 = vpack.c.bf16 %v2804_v9, %v2797_v59  ;;  %v2823_v27 = vand.u32 4294901760, %v14859_v21  ;;  %v2607_v23 = vand.u32 4294901760, %v2511_v34  ;;  %v2818_v56 = vand.u32 4294901760, %v2817_v40 }
 0x276   : > { %v2811_v46 = vand.u32 4294901760, %v2810_v58  ;;  %v14872_v0 = vsub.f32 %v2514_v25, %v2610_v14  ;;  %12157 = vmatpush3.bf16.xpose.msra.mxu1 %v14647_v44  ;;  %v2831_v17 = vsub.f32 %v14854_v31, %v2830_v43  ;;  %v17565_v1 = vand.u32 4294901760, %v14741_v29 }
 0x277   : > { %v17566_v7 = vand.u32 4294901760, %v14731_v35  ;;  %v12464_v9 = vpack.c.bf16 %v17432_v22, %v17567_v8  ;;  %v14884_v59 = vsub.f32 %v2511_v34, %v2607_v23  ;;  %12159 = vmatprep.subr.bf16.mxu1 %v14824_v45  ;;  %v14887_v40 = vpack.c.bf16 %v2610_v14, %v2607_v23 }
 0x278   : > { %v14889_v25 = vpack.c.bf16 %v2818_v56, %v2811_v46  ;;  %v2824_v58 = vsub.f32 %v14859_v21, %v2823_v27  ;;  %v2844_v44 = vand.u32 4294901760, %v14872_v0  ;;  %v2832_v29 = vand.u32 4294901760, %v2831_v17 }
 0x279   : > { %v14880_v49 = vpack.c.bf16 %v17566_v7, %v17565_v1  ;;  %12465 = vmatpush3.bf16.xpose.msra.mxu0 %v12464_v9  ;;  %v17568_v1 = vld [vmem:[#allocation57_spill] sm:$0xff]  ;;  %v2837_v34 = vand.u32 4294901760, %v14884_v59  ;;  %v17581_v23 = vand.u32 4294901760, %v14775_v32 }
 0x27a   : > { %v12466_v22 = vpack.c.bf16 %v17451_v15, %v17568_v1  ;;  %v2825_v7 = vand.u32 4294901760, %v2824_v58  ;;  %v2845_v56 = vsub.f32 %v14872_v0, %v2844_v44  ;;  %v17569_v9 = vld [vmem:[#allocation9_spill] sm:$0xff]  ;;  %v17570_v1 = vld [vmem:[#allocation11_spill] sm:$0xff] }
 0x27b   : > { %v2838_v17 = vsub.f32 %v14884_v59, %v2837_v34  ;;  %v12468_v58 = vpack.c.bf16 %v17570_v1, %v17569_v9  ;;  %v17577_v1 = vand.u32 4294901760, %v14606_v4  ;;  %v17580_v9 = vand.u32 4294901760, %v14783_v53 }
 0x27c   : > { %12467 = vmatprep.subr.bf16.mxu0 %v12466_v22  ;;  %v14903_v46 = vpack.c.bf16 %v2832_v29, %v2825_v7  ;;  %v2846_v15 = vand.u32 4294901760, %v2845_v56  ;;  %v12470_v22 = vpack.c.bf16 %v17453_v36, %v17452_v61  ;;  %v17571_v7 = vand.u32 4294901760, %v14743_v20 }
 0x27d   : > { %v2839_v35 = vand.u32 4294901760, %v2838_v17  ;;  %v17574_v61 = vand.u32 4294901760, %v14762_v47  ;;  %v17578_v56 = vand.u32 4294901760, %v14601_v41  ;;  %v14958_v8 = vpack.c.bf16 %v17581_v23, %v17580_v9 }
 0x27e   : > { %12161 = vmatpush3.bf16.xpose.msra.mxu1 %v14666_v62  ;;  %v17592_v23 = vand.u32 4294901760, %v14821_v19  ;;  %v17593_v9 = vand.u32 4294901760, %v14816_v3 }
 0x27f   : > { %12163 = vmatprep.subr.bf16.mxu1 %v14844_v5  ;;  %v14924_v17 = vpack.c.bf16 %v2846_v15, %v2839_v35  ;;  %v17572_v35 = vand.u32 4294901760, %v14733_v12  ;;  %v14952_v29 = vpack.c.bf16 %v17578_v56, %v17577_v1  ;;  %17582 = vst [vmem:[#allocation3_spill] sm:$0xff] %v14958_v8  ;;  %v17589_v56 = vand.u32 4294901760, %v14644_v42 }
 0x280   : > { %v17590_v1 = vand.u32 4294901760, %v14637_v10  ;;  %v14982_v8 = vpack.c.bf16 %v17593_v9, %v17592_v23  ;;  %v15002_v23 = vpack.c.bf16 %v2830_v43, %v2823_v27  ;;  %v17603_v9 = vld [vmem:[#allocation14_spill] sm:$0xff]  ;;  %v12474_v43 = vpack.c.bf16 %v17455_v11, %v17454_v26  ;;  %v17609_v27 = vld [vmem:[#allocation16_spill] sm:$0xff] }
 0x281   : > { %12469 = vmatpush3.bf16.xpose.msra.mxu0 %v12468_v58  ;;  %v14940_v15 = vpack.c.bf16 %v17572_v35, %v17571_v7  ;;  %v17575_v58 = vand.u32 4294901760, %v14754_v6  ;;  %17579 = vst [vmem:[#allocation53_spill] sm:$0xff] %v14952_v29  ;;  %v17584_v7 = vand.u32 4294901760, %v14617_v13  ;;  %v17612_v26 = vld [vmem:[#allocation32_spill] sm:$0xff] }
 0x282   : > { %12471 = vmatprep.subr.bf16.mxu0 %v12470_v22  ;;  %v17583_v22 = vand.u32 4294901760, %v14625_v57  ;;  %v14976_v29 = vpack.c.bf16 %v17590_v1, %v17589_v56  ;;  %17594 = vst [vmem:[#allocation10_spill] sm:$0xff] %v14982_v8  ;;  %v17601_v56 = vand.u32 4294901760, %v14682_v54  ;;  %v17602_v1 = vand.u32 4294901760, %v14675_v60  ;;  %v17604_v8 = vld [vmem:[#allocation15_spill] sm:$0xff] }
 0x283   : > { %17573 = vst [vmem:[#allocation46_spill] sm:$0xff] %v14940_v15  ;;  %v14946_v36 = vpack.c.bf16 %v17575_v58, %v17574_v61  ;;  %v17586_v61 = vand.u32 4294901760, %v14802_v30  ;;  %v17587_v58 = vand.u32 4294901760, %v14796_v39  ;;  %v15012_v15 = vpack.c.bf16 %v2844_v44, %v2837_v34  ;;  %v17611_v34 = vld [vmem:[#allocation31_spill] sm:$0xff] }
 0x284   : > { %v14964_v35 = vpack.c.bf16 %v17584_v7, %v17583_v22  ;;  %17591 = vst [vmem:[#allocation6_spill] sm:$0xff] %v14976_v29  ;;  %v17595_v22 = vand.u32 4294901760, %v14663_v52  ;;  %v17596_v7 = vand.u32 4294901760, %v14655_v28  ;;  %v15000_v29 = vpack.c.bf16 %v17602_v1, %v17601_v56  ;;  %v17613_v1 = vld [vmem:[#allocation77_spill] sm:$0xff] }
 0x285   : > { %17576 = vst [vmem:[#allocation54_spill] sm:$0xff] %v14946_v36  ;;  %v14970_v14 = vpack.c.bf16 %v17587_v58, %v17586_v61  ;;  %v17598_v61 = vand.u32 4294901760, %v14840_v24  ;;  %v17599_v58 = vand.u32 4294901760, %v14834_v51  ;;  %v12472_v36 = vpack.c.bf16 %v17604_v8, %v17603_v9  ;;  %v17610_v8 = vld [vmem:[#allocation22_spill] sm:$0xff]  ;;  %v17614_v9 = vld [vmem:[#allocation81_spill] sm:$0xff] }
 0x286   : > { %17585 = vst [vmem:[#allocation4_spill] sm:$0xff] %v14964_v35  ;;  %v14988_v35 = vpack.c.bf16 %v17596_v7, %v17595_v22  ;;  %v17605_v22 = vand.u32 4294901760, %v14701_v18  ;;  %v17606_v7 = vand.u32 4294901760, %v14693_v63  ;;  %12165 = vmatpush3.bf16.xpose.msra.mxu1 %v14685_v38  ;;  %v12476_v56 = vpack.c.bf16 %v17610_v8, %v17609_v27  ;;  %v17621_v27 = vld [vmem:[#allocation87_spill] sm:$0xff] }
 0x287   : > { %17588 = vst [vmem:[#allocation5_spill] sm:$0xff] %v14970_v14  ;;  %v14994_v14 = vpack.c.bf16 %v17599_v58, %v17598_v61  ;;  %v17607_v61 = vand.u32 4294901760, %v14720_v2  ;;  %v17608_v58 = vand.u32 4294901760, %v14713_v33  ;;  %12167 = vmatprep.subr.bf16.mxu1 %v14862_v48  ;;  %v12478_v44 = vpack.c.bf16 %v14112_v16, %v17456_v37  ;;  %v17618_v16 = vld [vmem:[#allocation34_spill] sm:$0xff] }
 0x288   : > { %17597 = vst [vmem:[#allocation12_spill] sm:$0xff] %v14988_v35  ;;  %v15010_v35 = vpack.c.bf16 %v17606_v7, %v17605_v22  ;;  %v12480_v11 = vpack.c.bf16 %v17612_v26, %v17611_v34  ;;  %v12482_v22 = vpack.c.bf16 %v17614_v9, %v17613_v1  ;;  %v17616_v7 = vld [vmem:[#allocation41_spill] sm:$0xff]  ;;  %v17624_v34 = vld [vmem:[#allocation91_spill] sm:$0xff]  ;;  %v17625_v26 = vld [vmem:[#allocation38_spill] sm:$0xff] }
 0x289   : > { %17600 = vst [vmem:[#allocation13_spill] sm:$0xff] %v14994_v14  ;;  %v15018_v14 = vpack.c.bf16 %v17608_v58, %v17607_v61  ;;  %12473 = vmatpush3.bf16.xpose.msra.mxu0 %v12472_v36  ;;  %v17615_v36 = vld [vmem:[#allocation83_spill] sm:$0xff]  ;;  %v17617_v61 = vld [vmem:[#allocation33_spill] sm:$0xff]  ;;  %v17619_v58 = vld [vmem:[#allocation68_spill] sm:$0xff] }
 0x28a   : > { %12475 = vmatprep.subr.bf16.mxu0 %v12474_v43  ;;  %v12484_v37 = vpack.c.bf16 %v17618_v16, %v17617_v61  ;;  %v17620_v43 = vld [vmem:[#allocation84_spill] sm:$0xff]  ;;  %v17626_v1 = vld [vmem:[#allocation43_spill] sm:$0xff]  ;;  %v17627_v9 = vld [vmem:[#allocation89_spill] sm:$0xff] }
 0x28b   : > { %v12486_v8 = vpack.c.bf16 %v17621_v27, %v17620_v43  ;;  %v17629_v61 = vld [vmem:[#allocation78_spill] sm:$0xff]  ;;  %v17630_v16 = vld [vmem:[#allocation92_spill] sm:$0xff]  ;;  %v17632_v43 = vld [vmem:[#allocation47_spill] sm:$0xff] }
 0x28e   : > { %12169 = vmatpush3.bf16.xpose.msra.mxu1 %v14704_v50 }
 0x28f   : > { %12171 = vmatprep.subr.bf16.mxu1 %v14887_v40 }
 0x291   : > { %12477 = vmatpush3.bf16.xpose.msra.mxu0 %v12476_v56  ;;  %v17622_v56 = vld [vmem:[#allocation21_spill] sm:$0xff] }
 0x292   : > { %12479 = vmatprep.subr.bf16.mxu0 %v12478_v44  ;;  %v17623_v44 = vld [vmem:[#allocation71_spill] sm:$0xff] }
 0x296   : > { %12173 = vmatpush3.bf16.xpose.msra.mxu1 %v17615_v36 }
 0x297   : > { %12175 = vmatprep.subr.bf16.mxu1 %v17616_v7 }
 0x299   : > { %12481 = vmatpush3.bf16.xpose.msra.mxu0 %v12480_v11  ;;  %v12488_v11 = vpack.c.bf16 %v17626_v1, %v17625_v26  ;;  %v17637_v26 = vld [vmem:[#allocation62_spill] sm:$0xff]  ;;  %v17638_v1 = vld [vmem:[#allocation48_spill] sm:$0xff] }
 0x29a   : > { %12483 = vmatprep.subr.bf16.mxu0 %v12482_v22  ;;  %v17628_v22 = vld [vmem:[#allocation90_spill] sm:$0xff] }
 0x29b   : > { %v12490_v7 = vpack.c.bf16 %v17628_v22, %v17627_v9  ;;  %v17640_v9 = vld [vmem:[#allocation23_spill] sm:$0xff]  ;;  %v17641_v22 = vld [vmem:[#allocation52_spill] sm:$0xff] }
 0x29d   : > { %10891 = vmatmul.mubr.f32.vlgmr.msra.gmra.mrb[0].mxu1 %v17619_v58  ;;  %v17631_v58 = vld [vmem:[#allocation44_spill] sm:$0xff] }
 0x29e   : > { %12177 = vmatpush3.bf16.xpose.msra.mxu1 %v17622_v56  ;;  %10924 = vmatprep.mubr.f32.mxu1 %v17623_v44  ;;  %v12492_v27 = vpack.c.bf16 %v17632_v43, %v17631_v58  ;;  %v17633_v56 = vld [vmem:[#allocation80_spill] sm:$0xff]  ;;  %v17646_v58 = vld [vmem:[#allocation25_spill] sm:$0xff] }
 0x29f   : > { %12179 = vmatprep.subr.bf16.mxu1 %v17624_v34  ;;  %v17634_v34 = vld [vmem:[#allocation49_spill] sm:$0xff]  ;;  %v17647_v43 = vld [vmem:[#allocation64_spill] sm:$0xff] }
 0x2a1   : > { %12485 = vmatpush3.bf16.xpose.msra.mxu0 %v12484_v37  ;;  %v17635_v37 = vld [vmem:[#allocation2_spill] sm:$0xff] }
 0x2a2   : > { %12487 = vmatprep.subr.bf16.mxu0 %v12486_v8  ;;  %v17636_v8 = vld [vmem:[#allocation24_spill] sm:$0xff] }
 0x2a6   : > { %12181 = vmatpush3.bf16.xpose.msra.mxu1 %v17629_v61  ;;  %v17643_v61 = vld [vmem:[#allocation86_spill] sm:$0xff] }
 0x2a7   : > { %12183 = vmatprep.subr.bf16.mxu1 %v17630_v16  ;;  %v17645_v16 = vld [vmem:[#allocation60_spill] sm:$0xff] }
 0x2a9   : > { %12489 = vmatpush3.bf16.xpose.msra.mxu0 %v12488_v11  ;;  %v17639_v11 = vld [vmem:[#allocation51_spill] sm:$0xff] }
 0x2aa   : > { %12491 = vmatprep.subr.bf16.mxu0 %v12490_v7  ;;  %v17642_v7 = vld [vmem:[#allocation56_spill] sm:$0xff] }
 0x2ae   : > { %12185 = vmatpush3.bf16.xpose.msra.mxu1 %v17633_v56  ;;  %v17650_v56 = vld [vmem:[#allocation67_spill] sm:$0xff] }
 0x2af   : > { %12187 = vmatprep.subr.bf16.mxu1 %v17634_v34  ;;  %v17652_v34 = vld [vmem:[#allocation73_spill] sm:$0xff] }
 0x2b1   : > { %12493 = vmatpush3.bf16.xpose.msra.mxu0 %v12492_v27  ;;  %v17648_v27 = vld [vmem:[#allocation8_spill] sm:$0xff] }
 0x2b2   : > { %12495 = vmatprep.subr.bf16.mxu0 %v17635_v37  ;;  %v17653_v37 = vld [vmem:[#allocation19_spill] sm:$0xff] }
 0x2b6   : > { %12189 = vmatpush3.bf16.xpose.msra.mxu1 %v17636_v8  ;;  %v17654_v8 = vpack.c.bf16 %v17652_v34, %v17653_v37 }
 0x2b7   : > { %12191 = vmatprep.subr.bf16.mxu1 %v14869_v55  ;;  %v17644_v55 = vld [vmem:[#allocation58_spill] sm:$0xff] }
 0x2b8   : > { %11231 = vmatmul.mubr.f32.vlgmr.msra.gmra.mrb[32].mxu0 %v17637_v26 }
 0x2b9   : > { %12497 = vmatpush3.bf16.xpose.msra.mxu0 %v17638_v1  ;;  %11264 = vmatprep.mubr.f32.mxu0 %v17637_v26  ;;  %v17656_v1 = vpack.c.bf16 %v14754_v6, %v14762_v47  ;;  %v17663_v47 = vpack.c.bf16 %v14617_v13, %v14625_v57  ;;  %v17664_v6 = vpack.c.bf16 %v14796_v39, %v14802_v30  ;;  %v17686_v39 = vand.u32 4294901760, %v17652_v34 }
 0x2ba   : > { %12499 = vmatprep.subr.bf16.mxu0 %v17639_v11  ;;  %v17660_v11 = vpack.c.bf16 %v14775_v32, %v14783_v53  ;;  %v17668_v13 = vpack.c.bf16 %v14655_v28, %v14663_v52  ;;  %v17669_v30 = vpack.c.bf16 %v14834_v51, %v14840_v24  ;;  %v17670_v57 = vpack.c.bf16 %v14675_v60, %v14682_v54  ;;  %v17675_v52 = vld [vmem:[#allocation26_spill] sm:$0xff]  ;;  %v17678_v60 = vld [vmem:[#allocation37_spill] sm:$0xff]  ;;  %v17682_v32 = vld [vmem:[#allocation40_spill] sm:$0xff] }
 0x2bb   : > { %v17674_v28 = vpack.c.bf16 %v14713_v33, %v14720_v2  ;;  %v17676_v54 = vld [vmem:[#allocation18_spill] sm:$0xff]  ;;  %v17683_v2 = vld [vmem:[#allocation20_spill] sm:$0xff]  ;;  %v17685_v53 = vand.u32 4294901760, %v17653_v37  ;;  %v431_v24 = vld [vmem:[%s15156_s18 + $0x88] sm:$0xff] }
 0x2bc   : > { %v17684_v33 = vld [vmem:[#allocation46_spill] sm:$0xff] }
 0x2bd   : > { %v430_v51 = vld [vmem:[%s15156_s18 + $0x80] sm:$0xff] }
 0x2be   : > { %12193 = vmatpush3.bf16.xpose.msra.mxu1 %v17640_v9  ;;  %v17661_v9 = vld [vmem:[#allocation63_spill] sm:$0xff] }
 0x2bf   : > { %12195 = vmatprep.subr.bf16.mxu1 %v14889_v25  ;;  %v17649_v25 = vpack.c.bf16 %v14733_v12, %v14743_v20  ;;  %v17658_v12 = vld [vmem:[#allocation59_spill] sm:$0xff]  ;;  %v17659_v20 = vpack.c.bf16 %v14601_v41, %v14606_v4  ;;  %v17666_v41 = vpack.c.bf16 %v14637_v10, %v14644_v42  ;;  %v17667_v4 = vpack.c.bf16 %v14816_v3, %v14821_v19 }
 0x2c0   : > { %v17671_v42 = vpack.c.bf16 %v14854_v31, %v14859_v21  ;;  %v17672_v19 = vpack.c.bf16 %v14693_v63, %v14701_v18  ;;  %v17673_v10 = vpack.c.bf16 %v14872_v0, %v14884_v59  ;;  %v17677_v21 = vld [vmem:[#allocation66_spill] sm:$0xff]  ;;  %v17679_v63 = vld [vmem:[#allocation75_spill] sm:$0xff]  ;;  %v17680_v18 = vld [vmem:[#allocation36_spill] sm:$0xff]  ;;  %v12272_v3 = vpack.c.bf16 %v17686_v39, %v17685_v53 }
 0x2c1   : > { %12501 = vmatpush3.bf16.xpose.msra.mxu0 %v17641_v22  ;;  %v17662_v22 = vld [vmem:[#allocation69_spill] sm:$0xff]  ;;  %v17681_v0 = vld [vmem:[#allocation76_spill] sm:$0xff]  ;;  %v414_v31 = vld [vmem:[%s15156_s18] sm:$0xff]  ;;  %v15168_v59 = vsel %vm4236_vm3, %v430_v51, 0 }
 0x2c2   : > { %12503 = vmatprep.subr.bf16.mxu0 %v17642_v7  ;;  %v17665_v7 = vld [vmem:[#allocation70_spill] sm:$0xff]  ;;  %v17693_v51 = vld [vmem:[#allocation4_spill] sm:$0xff] }
 0x2c6   : > { %12197 = vmatpush3.bf16.xpose.msra.mxu1 %v17643_v61  ;;  %v415_v61 = vld [vmem:[%s15156_s18 + $0x8] sm:$0xff] }
 0x2c7   : > { %12199 = vmatprep.subr.bf16.mxu1 %v14903_v46  ;;  %v17651_v46 = vld [vmem:[#allocation50_spill] sm:$0xff] }
 0x2c9   : > { %12505 = vmatpush3.bf16.xpose.msra.mxu0 %v17644_v55  ;;  %v15175_v55 = vsel %vm4236_vm3, %v414_v31, 0 }
 0x2ca   : > { %12507 = vmatprep.subr.bf16.mxu0 %v17645_v16  ;;  %v432_v16 = vld [vmem:[%s15156_s18 + $0x90] sm:$0xff] }
 0x2cb   : > { %v15188_v37 = vsel %vm4236_vm3, %v432_v16, 0  ;;  %v437_v16 = vld [vmem:[%s15156_s18 + $0xb8] sm:$0xff] }
 0x2ce   : > { %12201 = vmatpush3.bf16.xpose.msra.mxu1 %v17646_v58  ;;  %v433_v58 = vld [vmem:[%s15156_s18 + $0x98] sm:$0xff] }
 0x2cf   : > { %12203 = vmatprep.subr.bf16.mxu1 %v14924_v17  ;;  %v17655_v17 = vld [vmem:[#allocation61_spill] sm:$0xff] }
 0x2d1   : > { %12509 = vmatpush3.bf16.xpose.msra.mxu0 %v17647_v43  ;;  %v17687_v43 = vld [vmem:[#allocation54_spill] sm:$0xff] }
 0x2d2   : > { %12511 = vmatprep.subr.bf16.mxu0 %v17648_v27  ;;  %v17177_v27 = vand.u32 4294901760, %v15168_v59 }
 0x2d6   : > { %12205 = vmatpush3.bf16.xpose.msra.mxu1 %v14880_v49  ;;  %v17657_v49 = vld [vmem:[#allocation55_spill] sm:$0xff] }
 0x2d7   : > { %12207 = vmatprep.subr.bf16.mxu1 %v17649_v25 }
 0x2d9   : > { %12513 = vmatpush3.bf16.xpose.msra.mxu0 %v17650_v56  ;;  %v15183_v56 = vsel %vm4236_vm3, %v415_v61, 0  ;;  %v436_v61 = vld [vmem:[%s15156_s18 + $0xb0] sm:$0xff] }
 0x2da   : > { %12515 = vmatprep.subr.bf16.mxu0 %v17651_v46  ;;  %v17173_v46 = vand.u32 4294901760, %v15175_v55  ;;  %v17172_v34 = vand.u32 4294901760, %v15183_v56 }
 0x2dd   : > { %10925 = vmatmul.mubr.f32.vlgmr.msra.gmra.mrb[0].mxu1 %v17623_v44 }
 0x2de   : > { %12209 = vmatpush3.bf16.xpose.msra.mxu1 %v17654_v8  ;;  %10958 = vmatprep.mubr.f32.mxu1 %v17655_v17  ;;  %v15191_v8 = vsel %vm4236_vm3, %v433_v58, 0  ;;  %v17694_v58 = vld [vmem:[#allocation5_spill] sm:$0xff] }
 0x2df   : > { %12211 = vmatprep.subr.bf16.mxu1 %v17656_v1  ;;  %v417_v1 = vld [vmem:[%s15156_s18 + $0x18] sm:$0xff] }
 0x2e1   : > { %12517 = vmatpush3.bf16.xpose.msra.mxu0 %v17657_v49 }
 0x2e2   : > { %12519 = vmatprep.subr.bf16.mxu0 %v17658_v12  ;;  %v17171_v12 = vand.u32 4294901760, %v15188_v37 }
 0x2e6   : > { %12213 = vmatpush3.bf16.xpose.msra.mxu1 %v17659_v20  ;;  %v17168_v20 = vand.u32 4294901760, %v15191_v8 }
 0x2e7   : > { %12215 = vmatprep.subr.bf16.mxu1 %v17660_v11  ;;  %v15207_v11 = vpack.c.bf16 %v17172_v34, %v17173_v46  ;;  %v424_v34 = vld [vmem:[%s15156_s18 + $0x50] sm:$0xff]  ;;  %v425_v46 = vld [vmem:[%s15156_s18 + $0x58] sm:$0xff] }
 0x2e9   : > { %12521 = vmatpush3.bf16.xpose.msra.mxu0 %v17661_v9  ;;  %v15213_v9 = vpack.c.bf16 %v17168_v20, %v17171_v12  ;;  %v440_v20 = vld [vmem:[%s15156_s18 + $0xd0] sm:$0xff] }
 0x2ea   : > { %12523 = vmatprep.subr.bf16.mxu0 %v17662_v22 }
 0x2eb   : > { %17688 = vst [vmem:[#allocation17_spill] sm:$0xff] %v15213_v9 }
 0x2ee   : > { %12217 = vmatpush3.bf16.xpose.msra.mxu1 %v17663_v47  ;;  %v15219_v47 = vsel %vm4236_vm3, %v417_v1, 0 }
 0x2ef   : > { %12219 = vmatprep.subr.bf16.mxu1 %v17664_v6  ;;  %v17689_v6 = vld [vmem:[#allocation53_spill] sm:$0xff] }
 0x2f1   : > { %12525 = vmatpush3.bf16.xpose.msra.mxu0 %v17665_v7 }
 0x2f6   : > { %12221 = vmatpush3.bf16.xpose.msra.mxu1 %v17666_v41  ;;  %v17164_v41 = vand.u32 4294901760, %v15219_v47 }
 0x2f7   : > { %12223 = vmatprep.subr.bf16.mxu1 %v17667_v4  ;;  %v434_v4 = vld [vmem:[%s15156_s18 + $0xa0] sm:$0xff] }
 0x2f8   : > { %11265 = vmatmul.mubr.f32.vlgmr.msra.gmra.mrb[32].mxu0 %v17637_v26  ;;  %v15171_v26 = vsel %vm4236_vm3, %v431_v24, 0 }
 0x2f9   : > { %v17174_v25 = vand.u32 4294901760, %v15171_v26 }
 0x2fb   : > { %v15199_v49 = vpack.c.bf16 %v17174_v25, %v17177_v27  ;;  %v442_v27 = vld [vmem:[%s15156_s18 + $0xe0] sm:$0xff] }
 0x2fd   : > { %12719 = vmatprep.subr.bf16.mxu0 %v15199_v49 }
 0x2fe   : > { %12225 = vmatpush3.bf16.xpose.msra.mxu1 %v17668_v13  ;;  %12721 = vmatpush3.bf16.xpose.msra.mxu0 %v15207_v11  ;;  %v435_v13 = vld [vmem:[%s15156_s18 + $0xa8] sm:$0xff] }
 0x2ff   : > { %12227 = vmatprep.subr.bf16.mxu1 %v17669_v30  ;;  %12723 = vmatprep.subr.bf16.mxu0 %v15213_v9  ;;  %v17690_v30 = vld [vmem:[#allocation3_spill] sm:$0xff] }
 0x306   : > { %12229 = vmatpush3.bf16.xpose.msra.mxu1 %v17670_v57  ;;  %v15231_v57 = vsel %vm4236_vm3, %v434_v4, 0  ;;  %v420_v4 = vld [vmem:[%s15156_s18 + $0x30] sm:$0xff] }
 0x307   : > { %12231 = vmatprep.subr.bf16.mxu1 %v17671_v42  ;;  %v15234_v42 = vsel %vm4236_vm3, %v435_v13, 0  ;;  %v421_v13 = vld [vmem:[%s15156_s18 + $0x38] sm:$0xff] }
 0x308   : > { %v17732_v9 = vand.u32 4294901760, %v15234_v42 }
 0x30e   : > { %12233 = vmatpush3.bf16.xpose.msra.mxu1 %v17672_v19  ;;  %v17163_v19 = vand.u32 4294901760, %v15231_v57 }
 0x30f   : > { %12235 = vmatprep.subr.bf16.mxu1 %v17673_v10  ;;  %v17162_v10 = vand.u32 4294901760, %v15234_v42 }
 0x311   : > { %v15250_v53 = vpack.c.bf16 %v17162_v10, %v17163_v19  ;;  %v422_v10 = vld [vmem:[%s15156_s18 + $0x40] sm:$0xff]  ;;  %v423_v19 = vld [vmem:[%s15156_s18 + $0x48] sm:$0xff] }
 0x313   : > { %17692 = vst [vmem:[#allocation72_spill] sm:$0xff] %v15250_v53 }
 0x316   : > { %12237 = vmatpush3.bf16.xpose.msra.mxu1 %v17674_v28  ;;  %v418_v28 = vld [vmem:[%s15156_s18 + $0x20] sm:$0xff] }
 0x317   : > { %12239 = vmatprep.subr.bf16.mxu1 %v17675_v52  ;;  %v15253_v39 = vsel %vm4236_vm3, %v418_v28, 0 }
 0x318   : > { %v17161_v24 = vand.u32 4294901760, %v15253_v39 }
 0x31d   : > { %10959 = vmatmul.mubr.f32.vlgmr.msra.gmra.mrb[0].mxu1 %v17655_v17  ;;  %v416_v17 = vld [vmem:[%s15156_s18 + $0x10] sm:$0xff] }
 0x31e   : > { %12241 = vmatpush3.bf16.xpose.msra.mxu1 %v17676_v54  ;;  %10992 = vmatprep.mubr.f32.mxu1 %v17677_v21  ;;  %v15216_v22 = vsel %vm4236_vm3, %v416_v17, 0  ;;  %v15270_v17 = vsel %vm4236_vm3, %v437_v16, 0 }
 0x31f   : > { %12243 = vmatprep.subr.bf16.mxu1 %v17678_v60  ;;  %v17167_v7 = vand.u32 4294901760, %v15216_v22 }
 0x326   : > { %12245 = vmatpush3.bf16.xpose.msra.mxu1 %v17679_v63 }
 0x327   : > { %12247 = vmatprep.subr.bf16.mxu1 %v17680_v18 }
 0x32e   : > { %12249 = vmatpush3.bf16.xpose.msra.mxu1 %v17681_v0 }
 0x32f   : > { %12251 = vmatprep.subr.bf16.mxu1 %v17682_v32 }
 0x336   : > { %12253 = vmatpush3.bf16.xpose.msra.mxu1 %v17683_v2 }
 0x337   : > { %12255 = vmatprep.subr.bf16.mxu1 %v14824_v45 }
 0x33e   : > { %12257 = vmatpush3.bf16.xpose.msra.mxu1 %v14666_v62 }
 0x33f   : > { %12259 = vmatprep.subr.bf16.mxu1 %v14844_v5 }
 0x346   : > { %12261 = vmatpush3.bf16.xpose.msra.mxu1 %v14685_v38 }
 0x347   : > { %12263 = vmatprep.subr.bf16.mxu1 %v14862_v48 }
 0x34e   : > { %12265 = vmatpush3.bf16.xpose.msra.mxu1 %v14704_v50 }
 0x34f   : > { %12267 = vmatprep.subr.bf16.mxu1 %v14887_v40 }
 0x356   : > { %12269 = vmatpush3.bf16.xpose.msra.mxu1 %v17615_v36 }
 0x357   : > { %12271 = vmatprep.subr.bf16.mxu1 %v17684_v33  ;;  %v15244_v33 = vpack.c.bf16 %v17164_v41, %v17167_v7 }
 0x359   : > { %17691 = vst [vmem:[#allocation65_spill] sm:$0xff] %v15244_v33  ;;  %12725 = vmatpush3.bf16.xpose.msra.mxu0 %v15244_v33 }
 0x35a   : > { %12727 = vmatprep.subr.bf16.mxu0 %v15250_v53 }
 0x35d   : > { %10993 = vmatmul.mubr.f32.vlgmr.msra.gmra.mrb[0].mxu1 %v17677_v21  ;;  %v419_v21 = vld [vmem:[%s15156_s18 + $0x28] sm:$0xff] }
 0x35e   : > { %12273 = vmatpush3.bf16.xpose.msra.mxu1 %v12272_v3  ;;  %11026 = vmatprep.mubr.f32.mxu1 %v17623_v44  ;;  %v15256_v3 = vsel %vm4236_vm3, %v419_v21, 0  ;;  %v15289_v21 = vsel %vm4236_vm3, %v420_v4, 0 }
 0x35f   : > { %12275 = vmatprep.subr.bf16.mxu1 %v17687_v43  ;;  %v17158_v31 = vand.u32 4294901760, %v15256_v3  ;;  %v15267_v43 = vsel %vm4236_vm3, %v436_v61, 0  ;;  %v17697_v61 = vld [vmem:[#allocation6_spill] sm:$0xff]  ;;  %v17166_v16 = vand.u32 4294901760, %v15289_v21 }
 0x360   : > { %v17160_v1 = vand.u32 4294901760, %v15267_v43 }
 0x366   : > { %12277 = vmatpush3.bf16.xpose.msra.mxu1 %v17689_v6  ;;  %v17159_v6 = vand.u32 4294901760, %v15270_v17 }
 0x367   : > { %12279 = vmatprep.subr.bf16.mxu1 %v17690_v30  ;;  %v15280_v30 = vpack.c.bf16 %v17158_v31, %v17161_v24  ;;  %v438_v31 = vld [vmem:[%s15156_s18 + $0xc0] sm:$0xff] }
 0x368   : > { %v15286_v28 = vpack.c.bf16 %v17159_v6, %v17160_v1  ;;  %v439_v6 = vld [vmem:[%s15156_s18 + $0xc8] sm:$0xff]  ;;  %v17698_v1 = vld [vmem:[#allocation10_spill] sm:$0xff]  ;;  %v15303_v4 = vsel %vm4236_vm3, %v438_v31, 0 }
 0x369   : > { %17695 = vst [vmem:[#allocation27_spill] sm:$0xff] %v15280_v30  ;;  %12729 = vmatpush3.bf16.xpose.msra.mxu0 %v15280_v30  ;;  %v17170_v24 = vand.u32 4294901760, %v15303_v4  ;;  %v17711_v30 = vand.u32 4294901760, %v15168_v59 }
 0x36a   : > { %17696 = vst [vmem:[#allocation28_spill] sm:$0xff] %v15286_v28  ;;  %12731 = vmatprep.subr.bf16.mxu0 %v15286_v28 }
 0x36e   : > { %12281 = vmatpush3.bf16.xpose.msra.mxu1 %v17693_v51  ;;  %v15292_v51 = vsel %vm4236_vm3, %v421_v13, 0  ;;  %v15306_v13 = vsel %vm4236_vm3, %v439_v6, 0  ;;  %v15328_v6 = vsel %vm4236_vm3, %v423_v19, 0 }
 0x36f   : > { %12283 = vmatprep.subr.bf16.mxu1 %v17694_v58  ;;  %v17165_v58 = vand.u32 4294901760, %v15292_v51  ;;  %v17175_v7 = vand.u32 4294901760, %v15328_v6 }
 0x371   : > { %v15316_v41 = vpack.c.bf16 %v17165_v58, %v17166_v16  ;;  %v17701_v58 = vld [vmem:[#allocation12_spill] sm:$0xff] }
 0x373   : > { %17699 = vst [vmem:[#allocation74_spill] sm:$0xff] %v15316_v41  ;;  %12733 = vmatpush3.bf16.xpose.msra.mxu0 %v15316_v41  ;;  %v444_v41 = vld [vmem:[%s15156_s18 + $0xf0] sm:$0xff] }
 0x376   : > { %12285 = vmatpush3.bf16.xpose.msra.mxu1 %v17697_v61  ;;  %v17169_v61 = vand.u32 4294901760, %v15306_v13 }
 0x377   : > { %12287 = vmatprep.subr.bf16.mxu1 %v17698_v1  ;;  %v15325_v1 = vsel %vm4236_vm3, %v422_v10, 0  ;;  %v15339_v10 = vsel %vm4236_vm3, %v440_v20, 0 }
 0x378   : > { %v15322_v31 = vpack.c.bf16 %v17169_v61, %v17170_v24  ;;  %v17176_v16 = vand.u32 4294901760, %v15325_v1  ;;  %v441_v61 = vld [vmem:[%s15156_s18 + $0xd8] sm:$0xff]  ;;  %v17179_v12 = vand.u32 4294901760, %v15339_v10 }
 0x379   : > { %v17702_v24 = vld [vmem:[#allocation13_spill] sm:$0xff]  ;;  %v15342_v19 = vsel %vm4236_vm3, %v441_v61, 0  ;;  %v15364_v61 = vsel %vm4236_vm3, %v425_v46, 0 }
 0x37a   : > { %17700 = vst [vmem:[#allocation29_spill] sm:$0xff] %v15322_v31  ;;  %12735 = vmatprep.subr.bf16.mxu0 %v15322_v31  ;;  %v15352_v25 = vpack.c.bf16 %v17175_v7, %v17176_v16  ;;  %v427_v7 = vld [vmem:[%s15156_s18 + $0x68] sm:$0xff] }
 0x37c   : > { %17703 = vst [vmem:[#allocation30_spill] sm:$0xff] %v15352_v25  ;;  %12737 = vmatpush3.bf16.xpose.msra.mxu0 %v15352_v25  ;;  %v17706_v25 = vand.u32 4294901760, %v15364_v61 }
 0x37e   : > { %12289 = vmatpush3.bf16.xpose.msra.mxu1 %v17701_v58  ;;  %v17178_v58 = vand.u32 4294901760, %v15342_v19 }
 0x37f   : > { %12291 = vmatprep.subr.bf16.mxu1 %v17702_v24  ;;  %v15361_v24 = vsel %vm4236_vm3, %v424_v34, 0  ;;  %v15375_v34 = vsel %vm4236_vm3, %v442_v27, 0 }
 0x380   : > { %v15358_v20 = vpack.c.bf16 %v17178_v58, %v17179_v12  ;;  %v443_v58 = vld [vmem:[%s15156_s18 + $0xe8] sm:$0xff]  ;;  %v17189_v12 = vand.u32 4294901760, %v15375_v34  ;;  %v17705_v16 = vand.u32 4294901760, %v15361_v24 }
 0x381   : > { %v15378_v46 = vsel %vm4236_vm3, %v443_v58, 0  ;;  %v15400_v58 = vsel %vm4236_vm3, %v427_v7, 0 }
 0x382   : > { %17704 = vst [vmem:[#allocation79_spill] sm:$0xff] %v15358_v20  ;;  %12739 = vmatprep.subr.bf16.mxu0 %v15358_v20  ;;  %v426_v20 = vld [vmem:[%s15156_s18 + $0x60] sm:$0xff]  ;;  %v15388_v31 = vpack.c.bf16 %v17706_v25, %v17705_v16  ;;  %v17196_v16 = vand.u32 4294901760, %v15400_v58 }
 0x383   : > { %v15397_v27 = vsel %vm4236_vm3, %v426_v20, 0  ;;  %v15411_v20 = vsel %vm4236_vm3, %v444_v41, 0 }
 0x384   : > { %17707 = vst [vmem:[#allocation82_spill] sm:$0xff] %v15388_v31  ;;  %12741 = vmatpush3.bf16.xpose.msra.mxu0 %v15388_v31  ;;  %v17197_v25 = vand.u32 4294901760, %v15397_v27  ;;  %v428_v31 = vld [vmem:[%s15156_s18 + $0x70] sm:$0xff] }
 0x385   : > { %v15433_v41 = vsel %vm4236_vm3, %v428_v31, 0  ;;  %v17713_v31 = vand.u32 4294901760, %v15171_v26 }
 0x386   : > { %12293 = vmatpush3.bf16.xpose.msra.mxu1 %v15000_v29  ;;  %v17188_v29 = vand.u32 4294901760, %v15378_v46  ;;  %v15424_v28 = vpack.c.bf16 %v17196_v16, %v17197_v25  ;;  %v17207_v16 = vand.u32 4294901760, %v15433_v41 }
 0x387   : > { %12295 = vmatprep.subr.bf16.mxu1 %v15002_v23 }
 0x388   : > { %v15394_v23 = vpack.c.bf16 %v17188_v29, %v17189_v12  ;;  %v445_v29 = vld [vmem:[%s15156_s18 + $0xf8] sm:$0xff]  ;;  %v17201_v12 = vand.u32 4294901760, %v15411_v20  ;;  %17709 = vst [vmem:[#allocation39_spill] sm:$0xff] %v15424_v28 }
 0x389   : > { %v15414_v7 = vsel %vm4236_vm3, %v445_v29, 0 }
 0x38a   : > { %17708 = vst [vmem:[#allocation35_spill] sm:$0xff] %v15394_v23  ;;  %12743 = vmatprep.subr.bf16.mxu0 %v15394_v23  ;;  %v17200_v23 = vand.u32 4294901760, %v15414_v7 }
 0x38c   : > { %12745 = vmatpush3.bf16.xpose.msra.mxu0 %v15424_v28 }
 0x38e   : > { %12297 = vmatpush3.bf16.xpose.msra.mxu1 %v15010_v35  ;;  %v429_v35 = vld [vmem:[%s15156_s18 + $0x78] sm:$0xff] }
 0x38f   : > { %12299 = vmatprep.subr.bf16.mxu1 %v15012_v15  ;;  %v15430_v15 = vpack.c.bf16 %v17200_v23, %v17201_v12  ;;  %v15436_v29 = vsel %vm4236_vm3, %v429_v35, 0  ;;  %v15446_v23 = vsub.f32 %v15168_v59, %v17711_v30  ;;  %v15451_v35 = vsub.f32 %v15171_v26, %v17713_v31 }
 0x390   : > { %v17206_v25 = vand.u32 4294901760, %v15436_v29  ;;  %v17716_v31 = vand.u32 4294901760, %v15175_v55 }
 0x391   : > { %17710 = vst [vmem:[#allocation85_spill] sm:$0xff] %v15430_v15  ;;  %12747 = vmatprep.subr.bf16.mxu0 %v15430_v15  ;;  %17712 = vst [vmem:[#allocation88_spill] sm:$0xff] %v15446_v23  ;;  %v17209_v12 = vand.u32 4294901760, %v15446_v23 }
 0x392   : > { %17714 = vst [vmem:[#allocation42_spill] sm:$0xff] %v15451_v35  ;;  %v15460_v15 = vpack.c.bf16 %v17206_v25, %v17207_v16  ;;  %v15473_v28 = vsub.f32 %v15175_v55, %v17716_v31  ;;  %v17718_v25 = vand.u32 4294901760, %v15183_v56 }
 0x393   : > { %v4630_v59 = vsub.f32 %v15446_v23, %v17209_v12 }
 0x394   : > { %17715 = vst [vmem:[#allocation45_spill] sm:$0xff] %v15460_v15  ;;  %12749 = vmatpush3.bf16.xpose.msra.mxu0 %v15460_v15  ;;  %17717 = vst [vmem:[#allocation7_spill] sm:$0xff] %v15473_v28  ;;  %v15478_v16 = vsub.f32 %v15183_v56, %v17718_v25  ;;  %v17210_v55 = vand.u32 4294901760, %v15473_v28  ;;  %v17723_v56 = vand.u32 4294901760, %v15191_v8 }
 0x395   : > { %v4631_v30 = vand.u32 4294901760, %v4630_v59 }
 0x396   : > { %12301 = vmatpush3.bf16.xpose.msra.mxu1 %v15018_v14  ;;  %v17208_v14 = vand.u32 4294901760, %v15451_v35  ;;  %17719 = vst [vmem:[#allocation57_spill] sm:$0xff] %v15478_v16  ;;  %v17211_v31 = vand.u32 4294901760, %v15478_v16  ;;  %v15495_v25 = vsub.f32 %v15191_v8, %v17723_v56 }
 0x397   : > { %12303 = vmatprep.subr.bf16.mxu1 %v17675_v52 }
 0x398   : > { %v4637_v26 = vsub.f32 %v15451_v35, %v17208_v14  ;;  %17724 = vst [vmem:[#allocation14_spill] sm:$0xff] %v15495_v25  ;;  %v4525_v8 = vsub.f32 %v15478_v16, %v17211_v31 }
 0x39a   : > { %v4638_v52 = vand.u32 4294901760, %v4637_v26  ;;  %v17721_v26 = vand.u32 4294901760, %v15188_v37  ;;  %v4526_v12 = vand.u32 4294901760, %v4525_v8  ;;  %v17730_v8 = vand.u32 4294901760, %v15231_v57 }
 0x39c   : > { %v15482_v59 = vpack.c.bf16 %v4638_v52, %v4631_v30  ;;  %v15487_v14 = vsub.f32 %v15188_v37, %v17721_v26  ;;  %v17727_v37 = vand.u32 4294901760, %v15219_v47  ;;  %v4518_v26 = vsub.f32 %v15473_v28, %v17210_v55 }
 0x39d   : > { %11027 = vmatmul.mubr.f32.vlgmr.msra.gmra.mrb[0].mxu1 %v17623_v44 }
 0x39e   : > { %12305 = vmatpush3.bf16.xpose.msra.mxu1 %v17676_v54  ;;  %11060 = vmatprep.mubr.f32.mxu1 %v17623_v44  ;;  %17720 = vst [vmem:[#allocation9_spill] sm:$0xff] %v15482_v59  ;;  %17722 = vst [vmem:[#allocation11_spill] sm:$0xff] %v15487_v14  ;;  %v17725_v54 = vand.u32 4294901760, %v15216_v22  ;;  %v17217_v52 = vand.u32 4294901760, %v15487_v14 }
 0x39f   : > { %12307 = vmatprep.subr.bf16.mxu1 %v17678_v60  ;;  %v15506_v60 = vsub.f32 %v15219_v47, %v17727_v37  ;;  %12751 = vmatprep.subr.bf16.mxu0 %v15482_v59  ;;  %v4519_v37 = vand.u32 4294901760, %v4518_v26 }
 0x3a0   : > { %v15500_v30 = vsub.f32 %v15216_v22, %v17725_v54  ;;  %v17220_v22 = vand.u32 4294901760, %v15495_v25  ;;  %v4644_v54 = vsub.f32 %v15487_v14, %v17217_v52 }
 0x3a1   : > { %17728 = vst [vmem:[#allocation16_spill] sm:$0xff] %v15506_v60  ;;  %v17223_v47 = vand.u32 4294901760, %v15506_v60  ;;  %v15530_v53 = vpack.c.bf16 %v4526_v12, %v4519_v37  ;;  %v17734_v12 = vand.u32 4294901760, %v15253_v39 }
 0x3a2   : > { %17726 = vst [vmem:[#allocation15_spill] sm:$0xff] %v15500_v30  ;;  %v17242_v56 = vand.u32 4294901760, %v15500_v30  ;;  %v4651_v55 = vsub.f32 %v15495_v25, %v17220_v22  ;;  %v4645_v59 = vand.u32 4294901760, %v4644_v54  ;;  %v15536_v22 = vsub.f32 %v15231_v57, %v17730_v8 }
 0x3a3   : > { %v4539_v15 = vsub.f32 %v15506_v60, %v17223_v47  ;;  %17729 = vst [vmem:[#allocation22_spill] sm:$0xff] %v15530_v53  ;;  %v15541_v54 = vsub.f32 %v15234_v42, %v17732_v9 }
 0x3a4   : > { %v4532_v31 = vsub.f32 %v15500_v30, %v17242_v56  ;;  %v4652_v52 = vand.u32 4294901760, %v4651_v55  ;;  %17731 = vst [vmem:[#allocation31_spill] sm:$0xff] %v15536_v22  ;;  %v15549_v55 = vsub.f32 %v15253_v39, %v17734_v12 }
 0x3a5   : > { %v4540_v26 = vand.u32 4294901760, %v4539_v15  ;;  %17733 = vst [vmem:[#allocation32_spill] sm:$0xff] %v15541_v54  ;;  %v17224_v9 = vand.u32 4294901760, %v15541_v54 }
 0x3a6   : > { %v4533_v33 = vand.u32 4294901760, %v4532_v31  ;;  %12309 = vmatpush3.bf16.xpose.msra.mxu1 %v17679_v63  ;;  %v15544_v47 = vpack.c.bf16 %v4652_v52, %v4645_v59  ;;  %17735 = vst [vmem:[#allocation77_spill] sm:$0xff] %v15549_v55  ;;  %v17736_v63 = vand.u32 4294901760, %v15256_v3  ;;  %v17225_v31 = vand.u32 4294901760, %v15536_v22 }
 0x3a7   : > { %12311 = vmatprep.subr.bf16.mxu1 %v17680_v18  ;;  %v17226_v18 = vand.u32 4294901760, %v15549_v55  ;;  %v4665_v59 = vsub.f32 %v15541_v54, %v17224_v9 }
 0x3a8   : > { %v15554_v15 = vsub.f32 %v15256_v3, %v17736_v63  ;;  %v15556_v57 = vpack.c.bf16 %v4540_v26, %v4533_v33  ;;  %v4658_v39 = vsub.f32 %v15536_v22, %v17225_v31  ;;  %v17738_v63 = vand.u32 4294901760, %v15267_v43 }
 0x3a9   : > { %v4546_v33 = vsub.f32 %v15549_v55, %v17226_v18  ;;  %v4666_v37 = vand.u32 4294901760, %v4665_v59  ;;  %v17740_v31 = vand.u32 4294901760, %v15270_v17  ;;  %v17742_v59 = vand.u32 4294901760, %v15289_v21 }
 0x3aa   : > { %17737 = vst [vmem:[#allocation81_spill] sm:$0xff] %v15554_v15  ;;  %v17229_v42 = vand.u32 4294901760, %v15554_v15  ;;  %v4659_v52 = vand.u32 4294901760, %v4658_v39  ;;  %v15580_v9 = vsub.f32 %v15267_v43, %v17738_v63 }
 0x3ab   : > { %v4547_v26 = vand.u32 4294901760, %v4546_v33  ;;  %v15585_v18 = vsub.f32 %v15270_v17, %v17740_v31  ;;  %v17744_v33 = vand.u32 4294901760, %v15292_v51 }
 0x3ac   : > { %v4553_v3 = vsub.f32 %v15554_v15, %v17229_v42  ;;  %v15575_v12 = vpack.c.bf16 %v4666_v37, %v4659_v52  ;;  %17739 = vst [vmem:[#allocation83_spill] sm:$0xff] %v15580_v9  ;;  %v17227_v43 = vand.u32 4294901760, %v15580_v9  ;;  %v17748_v42 = vand.u32 4294901760, %v15306_v13 }
 0x3ad   : > { %17741 = vst [vmem:[#allocation41_spill] sm:$0xff] %v15585_v18  ;;  %v17228_v52 = vand.u32 4294901760, %v15585_v18 }
 0x3ae   : > { %v4554_v8 = vand.u32 4294901760, %v4553_v3  ;;  %12313 = vmatpush3.bf16.xpose.msra.mxu1 %v17681_v0  ;;  %v15593_v0 = vsub.f32 %v15289_v21, %v17742_v59  ;;  %v15598_v3 = vsub.f32 %v15292_v51, %v17744_v33  ;;  %v4672_v31 = vsub.f32 %v15580_v9, %v17227_v43 }
 0x3af   : > { %12315 = vmatprep.subr.bf16.mxu1 %v17682_v32  ;;  %v4679_v21 = vsub.f32 %v15585_v18, %v17228_v52  ;;  %v17746_v43 = vand.u32 4294901760, %v15303_v4 }
 0x3b0   : > { %v15588_v39 = vpack.c.bf16 %v4554_v8, %v4547_v26  ;;  %17743 = vst [vmem:[#allocation33_spill] sm:$0xff] %v15593_v0  ;;  %17745 = vst [vmem:[#allocation34_spill] sm:$0xff] %v15598_v3  ;;  %v17230_v17 = vand.u32 4294901760, %v15593_v0  ;;  %v17233_v32 = vand.u32 4294901760, %v15598_v3  ;;  %v4673_v26 = vand.u32 4294901760, %v4672_v31 }
 0x3b1   : > { %v4680_v8 = vand.u32 4294901760, %v4679_v21  ;;  %v15622_v52 = vsub.f32 %v15303_v4, %v17746_v43  ;;  %v17750_v21 = vand.u32 4294901760, %v15325_v1 }
 0x3b2   : > { %v4560_v51 = vsub.f32 %v15593_v0, %v17230_v17  ;;  %v4567_v37 = vsub.f32 %v15598_v3, %v17233_v32  ;;  %v15627_v17 = vsub.f32 %v15306_v13, %v17748_v42  ;;  %v17756_v32 = vand.u32 4294901760, %v15342_v19 }
 0x3b3   : > { %v15617_v33 = vpack.c.bf16 %v4680_v8, %v4673_v26  ;;  %17747 = vst [vmem:[#allocation68_spill] sm:$0xff] %v15622_v52  ;;  %v17231_v4 = vand.u32 4294901760, %v15622_v52 }
 0x3b4   : > { %v4561_v63 = vand.u32 4294901760, %v4560_v51  ;;  %v4568_v59 = vand.u32 4294901760, %v4567_v37  ;;  %17749 = vst [vmem:[#allocation84_spill] sm:$0xff] %v15627_v17  ;;  %v17752_v51 = vand.u32 4294901760, %v15328_v6  ;;  %v17232_v43 = vand.u32 4294901760, %v15627_v17 }
 0x3b5   : > { %v4686_v42 = vsub.f32 %v15622_v52, %v17231_v4  ;;  %v17754_v4 = vand.u32 4294901760, %v15339_v10 }
 0x3b6   : > { %12317 = vmatpush3.bf16.xpose.msra.mxu1 %v17683_v2  ;;  %v15630_v31 = vpack.c.bf16 %v4568_v59, %v4561_v63  ;;  %v15635_v2 = vsub.f32 %v15325_v1, %v17750_v21  ;;  %v15640_v37 = vsub.f32 %v15328_v6, %v17752_v51  ;;  %v4693_v1 = vsub.f32 %v15627_v17, %v17232_v43 }
 0x3b7   : > { %12319 = vmatprep.subr.bf16.mxu1 %v14824_v45  ;;  %v4687_v8 = vand.u32 4294901760, %v4686_v42  ;;  %v15664_v43 = vsub.f32 %v15339_v10, %v17754_v4 }
 0x3b8   : > { %17751 = vst [vmem:[#allocation87_spill] sm:$0xff] %v15635_v2  ;;  %17753 = vst [vmem:[#allocation21_spill] sm:$0xff] %v15640_v37  ;;  %v17234_v13 = vand.u32 4294901760, %v15635_v2  ;;  %v17238_v45 = vand.u32 4294901760, %v15640_v37  ;;  %v4694_v63 = vand.u32 4294901760, %v4693_v1  ;;  %v17758_v1 = vand.u32 4294901760, %v15361_v24 }
 0x3b9   : > { %17755 = vst [vmem:[#allocation71_spill] sm:$0xff] %v15664_v43  ;;  %v17235_v10 = vand.u32 4294901760, %v15664_v43 }
 0x3ba   : > { %v4574_v6 = vsub.f32 %v15635_v2, %v17234_v13  ;;  %v4581_v26 = vsub.f32 %v15640_v37, %v17238_v45  ;;  %v15659_v51 = vpack.c.bf16 %v4694_v63, %v4687_v8  ;;  %v15669_v13 = vsub.f32 %v15342_v19, %v17756_v32  ;;  %v4230_v63 = vld [vmem:[%s16936_s6] sm:$0xff] }
 0x3bb   : > { %v4700_v32 = vsub.f32 %v15664_v43, %v17235_v10  ;;  %v17764_v45 = vand.u32 4294901760, %v15378_v46 }
 0x3bc   : > { %v4575_v59 = vand.u32 4294901760, %v4574_v6  ;;  %v4582_v21 = vand.u32 4294901760, %v4581_v26  ;;  %17757 = vst [vmem:[#allocation91_spill] sm:$0xff] %v15669_v13  ;;  %v17760_v6 = vand.u32 4294901760, %v15364_v61  ;;  %v17236_v4 = vand.u32 4294901760, %v15669_v13 }
 0x3be   : > { %12321 = vmatpush3.bf16.xpose.msra.mxu1 %v14666_v62  ;;  %v15672_v42 = vpack.c.bf16 %v4582_v21, %v4575_v59  ;;  %v15677_v62 = vsub.f32 %v15361_v24, %v17758_v1  ;;  %v15682_v26 = vsub.f32 %v15364_v61, %v17760_v6  ;;  %v4707_v24 = vsub.f32 %v15669_v13, %v17236_v4 }
 0x3bf   : > { %12323 = vmatprep.subr.bf16.mxu1 %v14844_v5  ;;  %v4701_v59 = vand.u32 4294901760, %v4700_v32  ;;  %v17762_v4 = vand.u32 4294901760, %v15375_v34  ;;  %v4238_v32 = vsel %vm4236_vm3, %v4230_v63, 0 }
 0x3c0   : > { %17759 = vst [vmem:[#allocation38_spill] sm:$0xff] %v15677_v62  ;;  %17761 = vst [vmem:[#allocation43_spill] sm:$0xff] %v15682_v26  ;;  %v17237_v19 = vand.u32 4294901760, %v15677_v62  ;;  %v17239_v5 = vand.u32 4294901760, %v15682_v26  ;;  %v4708_v21 = vand.u32 4294901760, %v4707_v24 }
 0x3c2   : > { %v4588_v61 = vsub.f32 %v15677_v62, %v17237_v19  ;;  %v4595_v8 = vsub.f32 %v15682_v26, %v17239_v5  ;;  %v15704_v10 = vpack.c.bf16 %v4708_v21, %v4701_v59  ;;  %v15709_v19 = vsub.f32 %v15375_v34, %v17762_v4 }
 0x3c3   : > { %v15714_v5 = vsub.f32 %v15378_v46, %v17764_v45  ;;  %v17768_v46 = vand.u32 4294901760, %v15400_v58 }
 0x3c4   : > { %v4589_v1 = vand.u32 4294901760, %v4588_v61  ;;  %v4596_v6 = vand.u32 4294901760, %v4595_v8  ;;  %17763 = vst [vmem:[#allocation89_spill] sm:$0xff] %v15709_v19  ;;  %v17240_v8 = vand.u32 4294901760, %v15709_v19 }
 0x3c5   : > { %17765 = vst [vmem:[#allocation90_spill] sm:$0xff] %v15714_v5  ;;  %v17241_v34 = vand.u32 4294901760, %v15714_v5  ;;  %v15731_v45 = vsub.f32 %v15400_v58, %v17768_v46 }
 0x3c6   : > { %12325 = vmatpush3.bf16.xpose.msra.mxu1 %v14685_v38  ;;  %v15718_v24 = vpack.c.bf16 %v4596_v6, %v4589_v1  ;;  %v17766_v38 = vand.u32 4294901760, %v15397_v27 }
 0x3c7   : > { %12327 = vmatprep.subr.bf16.mxu1 %v14862_v48  ;;  %17769 = vst [vmem:[#allocation92_spill] sm:$0xff] %v15731_v45  ;;  %v15733_v48 = vand.u32 4294901760, %v4238_v32  ;;  %v4721_v59 = vsub.f32 %v15714_v5, %v17241_v34  ;;  %v17247_v58 = vand.u32 4294901760, %v15731_v45 }
 0x3c8   : > { %v15723_v61 = vsub.f32 %v15397_v27, %v17766_v38  ;;  %v4714_v27 = vsub.f32 %v15709_v19, %v17240_v8 }
 0x3c9   : > { %v4722_v38 = vand.u32 4294901760, %v4721_v59  ;;  %v15751_v46 = vsub.f32 %v4238_v32, %v15733_v48  ;;  %v4609_v34 = vsub.f32 %v15731_v45, %v17247_v58 }
 0x3ca   : > { %17767 = vst [vmem:[#allocation78_spill] sm:$0xff] %v15723_v61  ;;  %v17244_v4 = vand.u32 4294901760, %v15723_v61  ;;  %v4715_v6 = vand.u32 4294901760, %v4714_v27 }
 0x3cb   : > { %v15735_v63 = vpop.f32.mrb[32].mxu0  ;;  %17772 = vst [vmem:[#allocation80_spill] sm:$0xff] %v15751_v46  ;;  %v15770_v59 = vand.u32 4294901760, %v15751_v46 }
 0x3cc   : > { %17770 = vst [vmem:[#allocation44_spill] sm:$0xff] %v15735_v63  ;;  %v15743_v21 = vpop.f32.mrb[33].mxu0  ;;  %v4602_v1 = vsub.f32 %v15723_v61, %v17244_v4  ;;  %v15757_v56 = vpack.c.bf16 %v4722_v38, %v4715_v6  ;;  %v17773_v4 = vand.u32 4294901760, %v15411_v20 }
 0x3cd   : > { %17771 = vst [vmem:[#allocation47_spill] sm:$0xff] %v15743_v21  ;;  %v4610_v21 = vand.u32 4294901760, %v4609_v34  ;;  %17777 = vst [vmem:[#allocation24_spill] sm:$0xff] %v15770_v59  ;;  %v17780_v34 = vand.u32 4294901760, %v15436_v29 }
 0x3ce   : > { %12329 = vmatpush3.bf16.xpose.msra.mxu1 %v14704_v50  ;;  %v4603_v8 = vand.u32 4294901760, %v4602_v1  ;;  %v15762_v27 = vsub.f32 %v15411_v20, %v17773_v4  ;;  %v17775_v50 = vand.u32 4294901760, %v15414_v7 }
 0x3cf   : > { %12331 = vmatprep.subr.bf16.mxu1 %v14887_v40  ;;  %v17778_v40 = vand.u32 4294901760, %v15433_v41  ;;  %v15782_v20 = vsub.f32 %v15436_v29, %v17780_v34  ;;  %v4451_v29 = vsub.f32 %v15751_v46, %v15770_v59  ;;  %v15805_v34 = vpack.c.bf16 %v15451_v35, %v15446_v23  ;;  %v17807_v23 = vld [vmem:[#allocation9_spill] sm:$0xff] }
 0x3d0   : > { %17774 = vst [vmem:[#allocation49_spill] sm:$0xff] %v15762_v27  ;;  %v15767_v32 = vsub.f32 %v15414_v7, %v17775_v50  ;;  %v15772_v1 = vpack.c.bf16 %v4610_v21, %v4603_v8  ;;  %v17246_v4 = vand.u32 4294901760, %v15762_v27 }
 0x3d1   : > { %v15777_v6 = vsub.f32 %v15433_v41, %v17778_v40  ;;  %17781 = vst [vmem:[#allocation48_spill] sm:$0xff] %v15782_v20  ;;  %v17253_v50 = vand.u32 4294901760, %v15782_v20  ;;  %v4452_v59 = vand.u32 4294901760, %v4451_v29  ;;  %v15835_v29 = vpack.c.bf16 %v15554_v15, %v15549_v55  ;;  %v17791_v15 = vld [vmem:[#allocation29_spill] sm:$0xff] }
 0x3d2   : > { %17776 = vst [vmem:[#allocation2_spill] sm:$0xff] %v15767_v32  ;;  %v17245_v7 = vand.u32 4294901760, %v15767_v32  ;;  %v4728_v8 = vsub.f32 %v15762_v27, %v17246_v4  ;;  %v15855_v55 = vpack.c.bf16 %v15640_v37, %v15635_v2  ;;  %v15873_v37 = vpack.c.bf16 %v15714_v5, %v15709_v19  ;;  %v17799_v2 = vld [vmem:[#allocation35_spill] sm:$0xff]  ;;  %v4233_v5 = vld [vmem:[%s16936_s6 + $0x18] sm:$0xff] }
 0x3d3   : > { %17779 = vst [vmem:[#allocation62_spill] sm:$0xff] %v15777_v6  ;;  %v17254_v38 = vand.u32 4294901760, %v15777_v6  ;;  %v4623_v40 = vsub.f32 %v15782_v20, %v17253_v50  ;;  %v15815_v50 = vpack.c.bf16 %v15478_v16, %v15473_v28 }
 0x3d4   : > { %v4735_v41 = vsub.f32 %v15767_v32, %v17245_v7  ;;  %v4729_v7 = vand.u32 4294901760, %v4728_v8  ;;  %v15820_v8 = vpack.c.bf16 %v15495_v25, %v15487_v14  ;;  %17792 = vst [vmem:[#allocation56_spill] sm:$0xff] %v15855_v55  ;;  %17798 = vst [vmem:[#allocation60_spill] sm:$0xff] %v15873_v37  ;;  %v15898_v25 = vpack.c.bf16 %v15767_v32, %v15762_v27  ;;  %v4234_v14 = vld [vmem:[%s16936_s6 + $0x20] sm:$0xff] }
 0x3d5   : > { %v4616_v21 = vsub.f32 %v15777_v6, %v17254_v38  ;;  %v4624_v58 = vand.u32 4294901760, %v4623_v40  ;;  %v15840_v40 = vpack.c.bf16 %v15585_v18, %v15580_v9  ;;  %v15845_v38 = vpack.c.bf16 %v15598_v3, %v15593_v0  ;;  %v17793_v18 = vld [vmem:[#allocation30_spill] sm:$0xff]  ;;  %v17795_v3 = vld [vmem:[#allocation79_spill] sm:$0xff] }
 0x3d6   : > { %12333 = vmatpush3.bf16.xpose.msra.mxu1 %v17615_v36  ;;  %v4736_v4 = vand.u32 4294901760, %v4735_v41  ;;  %v17782_v41 = vld [vmem:[#allocation17_spill] sm:$0xff]  ;;  %v15860_v9 = vpack.c.bf16 %v15669_v13, %v15664_v43  ;;  %v15865_v0 = vpack.c.bf16 %v15682_v26, %v15677_v62  ;;  %v4232_v43 = vld [vmem:[%s16936_s6 + $0x10] sm:$0xff]  ;;  %v15882_v26 = vpack.c.bf16 %v15731_v45, %v15723_v61  ;;  %17802 = vst [vmem:[#allocation64_spill] sm:$0xff] %v15898_v25 }
 0x3d7   : > { %12527 = vmatprep.subr.bf16.mxu1 %v15199_v49  ;;  %v4617_v36 = vand.u32 4294901760, %v4616_v21  ;;  %v17785_v21 = vld [vmem:[#allocation27_spill] sm:$0xff]  ;;  %17786 = vst [vmem:[#allocation51_spill] sm:$0xff] %v15840_v40  ;;  %17788 = vst [vmem:[#allocation23_spill] sm:$0xff] %v15845_v38  ;;  %v17803_v45 = vld [vmem:[#allocation85_spill] sm:$0xff]  ;;  %v4247_v61 = vsel %vm4236_vm3, %v4233_v5, 0 }
 0x3d8   : > { %v15808_v63 = vpack.c.bf16 %v4736_v4, %v4729_v7  ;;  %v15825_v4 = vpack.c.bf16 %v15506_v60, %v15500_v30  ;;  %v17784_v7 = vld [vmem:[#allocation72_spill] sm:$0xff]  ;;  %17794 = vst [vmem:[#allocation86_spill] sm:$0xff] %v15860_v9  ;;  %17796 = vst [vmem:[#allocation58_spill] sm:$0xff] %v15865_v0  ;;  %v4244_v60 = vsel %vm4236_vm3, %v4232_v43, 0  ;;  %v17801_v30 = vld [vmem:[#allocation39_spill] sm:$0xff]  ;;  %v15904_v43 = vpack.c.bf16 %v15782_v20, %v15777_v6 }
 0x3d9   : > { %v15810_v46 = vpack.c.bf16 %v4624_v58, %v4617_v36  ;;  %v17783_v58 = vld [vmem:[#allocation65_spill] sm:$0xff]  ;;  %v17787_v36 = vld [vmem:[#allocation28_spill] sm:$0xff]  ;;  %17800 = vst [vmem:[#allocation25_spill] sm:$0xff] %v15882_v26  ;;  %v15890_v19 = vand.u32 4294901760, %v4244_v60  ;;  %v15915_v32 = vand.u32 4294901760, %v4247_v61  ;;  %v4250_v27 = vsel %vm4236_vm3, %v4234_v14, 0 }
 0x3da   : > { %17804 = vst [vmem:[#allocation8_spill] sm:$0xff] %v15904_v43  ;;  %v4235_v5 = vld [vmem:[%s16936_s6 + $0x28] sm:$0xff]  ;;  %v17806_v6 = vld [vmem:[#allocation45_spill] sm:$0xff]  ;;  %v15930_v35 = vand.u32 4294901760, %v4250_v27 }
 0x3db   : > { %v15910_v16 = vsub.f32 %v4244_v60, %v15890_v19  ;;  %v15928_v28 = vsub.f32 %v4247_v61, %v15915_v32  ;;  %v4253_v14 = vsel %vm4236_vm3, %v4235_v5, 0 }
 0x3dd   : > { %11061 = vmatmul.mubr.f32.vlgmr.msra.gmra.mrb[0].mxu1 %v17623_v44  ;;  %v15830_v44 = vpack.c.bf16 %v15541_v54, %v15536_v22  ;;  %v17789_v54 = vld [vmem:[#allocation74_spill] sm:$0xff]  ;;  %v15850_v22 = vpack.c.bf16 %v15627_v17, %v15622_v52  ;;  %v4231_v17 = vld [vmem:[%s16936_s6 + $0x8] sm:$0xff]  ;;  %v15922_v20 = vand.u32 4294901760, %v15910_v16 }
 0x3de   : > { %12529 = vmatpush3.bf16.xpose.msra.mxu1 %v15207_v11  ;;  %11298 = vmatprep.mubr.f32.mxu1 %v4452_v59  ;;  %v17797_v52 = vld [vmem:[#allocation82_spill] sm:$0xff]  ;;  %v4241_v13 = vsel %vm4236_vm3, %v4231_v17, 0 }
 0x3df   : > { %12531 = vmatprep.subr.bf16.mxu1 %v17782_v41  ;;  %17790 = vst [vmem:[#allocation52_spill] sm:$0xff] %v15850_v22  ;;  %v15884_v62 = vand.u32 4294901760, %v4241_v13 }
 0x3e1   : > { %v15894_v17 = vsub.f32 %v4241_v13, %v15884_v62 }
 0x3e3   : > { %v15913_v13 = vand.u32 4294901760, %v15894_v17 }
 0x3e5   : > { %17805 = vst [vmem:[#allocation67_spill] sm:$0xff] %v15913_v13  ;;  %v4462_v60 = vsub.f32 %v15894_v17, %v15913_v13  ;;  %v15942_v13 = vand.u32 4294901760, %v4253_v14 }
 0x3e6   : > { %12533 = vmatpush3.bf16.xpose.msra.mxu1 %v17783_v58 }
 0x3e7   : > { %12535 = vmatprep.subr.bf16.mxu1 %v17784_v7 }
 0x3ee   : > { %12537 = vmatpush3.bf16.xpose.msra.mxu1 %v17785_v21 }
 0x3ef   : > { %12539 = vmatprep.subr.bf16.mxu1 %v17787_v36 }
 0x3f6   : > { %12541 = vmatpush3.bf16.xpose.msra.mxu1 %v17789_v54 }
 0x3f7   : > { %12543 = vmatprep.subr.bf16.mxu1 %v17791_v15 }
 0x3fe   : > { %12545 = vmatpush3.bf16.xpose.msra.mxu1 %v17793_v18 }
 0x3ff   : > { %12547 = vmatprep.subr.bf16.mxu1 %v17795_v3 }
 0x406   : > { %12549 = vmatpush3.bf16.xpose.msra.mxu1 %v17797_v52 }
 0x407   : > { %12551 = vmatprep.subr.bf16.mxu1 %v17799_v2  ;;  %v15937_v2 = vand.u32 4294901760, %v15928_v28 }
 0x40e   : > { %12553 = vmatpush3.bf16.xpose.msra.mxu1 %v17801_v30  ;;  %v4463_v30 = vand.u32 4294901760, %v4462_v60  ;;  %v15951_v60 = vsub.f32 %v4253_v14, %v15942_v13 }
 0x40f   : > { %12555 = vmatprep.subr.bf16.mxu1 %v17803_v45  ;;  %v4473_v45 = vsub.f32 %v15910_v16, %v15922_v20 }
 0x411   : > { %v4474_v61 = vand.u32 4294901760, %v4473_v45 }
 0x416   : > { %12557 = vmatpush3.bf16.xpose.msra.mxu1 %v17806_v6  ;;  %v15940_v6 = vsub.f32 %v4250_v27, %v15930_v35 }
 0x417   : > { %12559 = vmatprep.subr.bf16.mxu1 %v17807_v23  ;;  %v4484_v23 = vsub.f32 %v15928_v28, %v15937_v2 }
 0x418   : > { %v15948_v5 = vand.u32 4294901760, %v15940_v6 }
 0x419   : > { %v4485_v27 = vand.u32 4294901760, %v4484_v23 }
 0x41d   : > { %11299 = vmatmul.mubr.f32.vlgmr.msra.gmra.mrb[2].mxu1 %v4452_v59  ;;  %v4495_v59 = vsub.f32 %v15940_v6, %v15948_v5 }
 0x41e   : > { %12561 = vmatpush3.bf16.xpose.msra.mxu1 %v15530_v53  ;;  %11300 = vmatprep.mubr.f32.mxu1 %v4463_v30  ;;  %v15957_v53 = vand.u32 4294901760, %v15951_v60 }
 0x41f   : > { %12563 = vmatprep.subr.bf16.mxu1 %v15544_v47  ;;  %v4496_v45 = vand.u32 4294901760, %v4495_v59  ;;  %v17819_v59 = vld [vmem:[#allocation42_spill] sm:$0xff] }
 0x420   : > { %v4506_v14 = vsub.f32 %v15951_v60, %v15957_v53  ;;  %v17820_v23 = vand.u32 4294901760, %v17819_v59 }
 0x421   : > { %11301 = vmatmul.mubr.f32.gmra.mrb[4].mxu1 %v4463_v30 }
 0x422   : > { %11302 = vmatprep.mubr.f32.mxu1 %v4474_v61  ;;  %v4507_v30 = vand.u32 4294901760, %v4506_v14  ;;  %v17815_v14 = vld [vmem:[#allocation39_spill] sm:$0xff] }
 0x425   : > { %11303 = vmatmul.mubr.f32.gmra.mrb[6].mxu1 %v4474_v61  ;;  %v17808_v61 = vld [vmem:[#allocation80_spill] sm:$0xff] }
 0x426   : > { %12565 = vmatpush3.bf16.xpose.msra.mxu1 %v15556_v57  ;;  %11304 = vmatprep.mubr.f32.mxu1 %v4485_v27 }
 0x427   : > { %12567 = vmatprep.subr.bf16.mxu1 %v15575_v12 }
 0x429   : > { %11305 = vmatmul.mubr.f32.gmra.mrb[8].mxu1 %v4485_v27 }
 0x42a   : > { %11306 = vmatprep.mubr.f32.mxu1 %v4496_v45 }
 0x42d   : > { %11307 = vmatmul.mubr.f32.gmra.mrb[10].mxu1 %v4496_v45  ;;  %v17813_v45 = vld [vmem:[#allocation24_spill] sm:$0xff] }
 0x42e   : > { %12569 = vmatpush3.bf16.xpose.msra.mxu1 %v15588_v39  ;;  %11308 = vmatprep.mubr.f32.mxu1 %v4507_v30 }
 0x42f   : > { %12571 = vmatprep.subr.bf16.mxu1 %v15617_v33 }
 0x431   : > { %11309 = vmatmul.mubr.f32.gmra.mrb[12].mxu1 %v4507_v30  ;;  %v17817_v30 = vld [vmem:[#allocation88_spill] sm:$0xff] }
 0x432   : > { %11342 = vmatprep.mubr.f32.mxu1 %v15733_v48 }
 0x436   : > { %12573 = vmatpush3.bf16.xpose.msra.mxu1 %v15630_v31 }
 0x437   : > { %12575 = vmatprep.subr.bf16.mxu1 %v15659_v51 }
 0x43e   : > { %12577 = vmatpush3.bf16.xpose.msra.mxu1 %v15672_v42 }
 0x43f   : > { %12579 = vmatprep.subr.bf16.mxu1 %v15704_v10 }
 0x446   : > { %12581 = vmatpush3.bf16.xpose.msra.mxu1 %v15718_v24 }
 0x447   : > { %12583 = vmatprep.subr.bf16.mxu1 %v15757_v56 }
 0x44e   : > { %12585 = vmatpush3.bf16.xpose.msra.mxu1 %v15772_v1 }
 0x44f   : > { %12587 = vmatprep.subr.bf16.mxu1 %v15808_v63 }
 0x456   : > { %12589 = vmatpush3.bf16.xpose.msra.mxu1 %v15810_v46 }
 0x457   : > { %12591 = vmatprep.subr.bf16.mxu1 %v15805_v34 }
 0x45d   : > { %11343 = vmatmul.mubr.f32.vlgmr.msra.gmra.mrb[2].mxu1 %v15733_v48 }
 0x45e   : > { %12593 = vmatpush3.bf16.xpose.msra.mxu1 %v15815_v50  ;;  %11344 = vmatprep.mubr.f32.mxu1 %v15884_v62 }
 0x45f   : > { %12595 = vmatprep.subr.bf16.mxu1 %v15820_v8 }
 0x461   : > { %11345 = vmatmul.mubr.f32.gmra.mrb[4].mxu1 %v15884_v62 }
 0x462   : > { %11346 = vmatprep.mubr.f32.mxu1 %v15890_v19 }
 0x465   : > { %11347 = vmatmul.mubr.f32.gmra.mrb[6].mxu1 %v15890_v19 }
 0x466   : > { %12597 = vmatpush3.bf16.xpose.msra.mxu1 %v15825_v4  ;;  %11348 = vmatprep.mubr.f32.mxu1 %v15915_v32 }
 0x467   : > { %12599 = vmatprep.subr.bf16.mxu1 %v15830_v44 }
 0x469   : > { %11349 = vmatmul.mubr.f32.gmra.mrb[8].mxu1 %v15915_v32 }
 0x46a   : > { %11350 = vmatprep.mubr.f32.mxu1 %v15930_v35 }
 0x46d   : > { %11351 = vmatmul.mubr.f32.gmra.mrb[10].mxu1 %v15930_v35 }
 0x46e   : > { %12601 = vmatpush3.bf16.xpose.msra.mxu1 %v15835_v29  ;;  %11352 = vmatprep.mubr.f32.mxu1 %v15942_v13 }
 0x46f   : > { %12603 = vmatprep.subr.bf16.mxu1 %v15840_v40 }
 0x471   : > { %11353 = vmatmul.mubr.f32.gmra.mrb[12].mxu1 %v15942_v13 }
 0x472   : > { %11386 = vmatprep.mubr.f32.mxu1 %v17808_v61 }
 0x476   : > { %12605 = vmatpush3.bf16.xpose.msra.mxu1 %v15845_v38 }
 0x477   : > { %12607 = vmatprep.subr.bf16.mxu1 %v15850_v22  ;;  %v17828_v22 = vld [vmem:[#allocation14_spill] sm:$0xff] }
 0x478   : > { %v17829_v38 = vand.u32 4294901760, %v17828_v22  ;;  %v17835_v22 = vld [vmem:[#allocation31_spill] sm:$0xff] }
 0x47e   : > { %12609 = vmatpush3.bf16.xpose.msra.mxu1 %v15855_v55 }
 0x47f   : > { %12611 = vmatprep.subr.bf16.mxu1 %v15860_v9  ;;  %v17826_v9 = vld [vmem:[#allocation11_spill] sm:$0xff] }
 0x480   : > { %v17827_v55 = vand.u32 4294901760, %v17826_v9  ;;  %v17837_v9 = vld [vmem:[#allocation32_spill] sm:$0xff] }
 0x482   : > { %v16056_v40 = vpack.c.bf16 %v17829_v38, %v17827_v55  ;;  %v17836_v55 = vand.u32 4294901760, %v17835_v22  ;;  %v17838_v38 = vand.u32 4294901760, %v17837_v9  ;;  %v17847_v22 = vld [vmem:[#allocation41_spill] sm:$0xff] }
 0x486   : > { %12613 = vmatpush3.bf16.xpose.msra.mxu1 %v15865_v0 }
 0x487   : > { %12615 = vmatprep.subr.bf16.mxu1 %v15873_v37 }
 0x48e   : > { %12617 = vmatpush3.bf16.xpose.msra.mxu1 %v15882_v26  ;;  %v17824_v26 = vld [vmem:[#allocation57_spill] sm:$0xff] }
 0x48f   : > { %12619 = vmatprep.subr.bf16.mxu1 %v15898_v25  ;;  %v17825_v37 = vand.u32 4294901760, %v17824_v26 }
 0x496   : > { %12621 = vmatpush3.bf16.xpose.msra.mxu1 %v15904_v43  ;;  %v17822_v43 = vld [vmem:[#allocation7_spill] sm:$0xff] }
 0x497   : > { %12623 = vmatprep.subr.bf16.mxu1 %v15199_v49  ;;  %v17823_v25 = vand.u32 4294901760, %v17822_v43  ;;  %v17831_v43 = vld [vmem:[#allocation15_spill] sm:$0xff] }
 0x498   : > { %v17832_v26 = vand.u32 4294901760, %v17831_v43 }
 0x499   : > { %v16050_v0 = vpack.c.bf16 %v17825_v37, %v17823_v25  ;;  %v17833_v25 = vld [vmem:[#allocation16_spill] sm:$0xff] }
 0x49a   : > { %v17834_v37 = vand.u32 4294901760, %v17833_v25  ;;  %v17845_v25 = vld [vmem:[#allocation83_spill] sm:$0xff] }
 0x49c   : > { %v16067_v59 = vpack.c.bf16 %v17834_v37, %v17832_v26  ;;  %v17846_v37 = vand.u32 4294901760, %v17845_v25  ;;  %v17857_v25 = vld [vmem:[#allocation84_spill] sm:$0xff] }
 0x49d   : > { %11387 = vmatmul.mubr.f32.vlgmr.msra.gmra.mrb[2].mxu1 %v17808_v61  ;;  %v17818_v61 = vand.u32 4294901760, %v17817_v30  ;;  %v17840_v30 = vld [vmem:[#allocation77_spill] sm:$0xff] }
 0x49e   : > { %12625 = vmatpush3.bf16.xpose.msra.mxu1 %v15207_v11  ;;  %11388 = vmatprep.mubr.f32.mxu1 %v15894_v17 }
 0x49f   : > { %12627 = vmatprep.subr.bf16.mxu1 %v17782_v41 }
 0x4a1   : > { %11389 = vmatmul.mubr.f32.gmra.mrb[4].mxu1 %v15894_v17 }
 0x4a2   : > { %11390 = vmatprep.mubr.f32.mxu1 %v15910_v16 }
 0x4a5   : > { %11391 = vmatmul.mubr.f32.gmra.mrb[6].mxu1 %v15910_v16  ;;  %v17810_v16 = vld [vmem:[#allocation44_spill] sm:$0xff] }
 0x4a6   : > { %12629 = vmatpush3.bf16.xpose.msra.mxu1 %v17783_v58  ;;  %11392 = vmatprep.mubr.f32.mxu1 %v15928_v28 }
 0x4a7   : > { %12631 = vmatprep.subr.bf16.mxu1 %v17784_v7 }
 0x4a9   : > { %11393 = vmatmul.mubr.f32.gmra.mrb[8].mxu1 %v15928_v28  ;;  %v17812_v28 = vld [vmem:[#allocation47_spill] sm:$0xff] }
 0x4aa   : > { %11394 = vmatprep.mubr.f32.mxu1 %v15940_v6 }
 0x4ad   : > { %11395 = vmatmul.mubr.f32.gmra.mrb[10].mxu1 %v15940_v6  ;;  %v17814_v6 = vld [vmem:[#allocation35_spill] sm:$0xff] }
 0x4ae   : > { %12633 = vmatpush3.bf16.xpose.msra.mxu1 %v17785_v21  ;;  %11396 = vmatprep.mubr.f32.mxu1 %v15951_v60 }
 0x4af   : > { %12635 = vmatprep.subr.bf16.mxu1 %v17787_v36 }
 0x4b0   : > { %v16020_v17 = vpop.f32.mrb[0].mxu1 }
 0x4b1   : > { %17809 = vst [vmem:[#allocation50_spill] sm:$0xff] %v16020_v17  ;;  %v16024_v27 = vpop.f32.mrb[1].mxu1  ;;  %11397 = vmatmul.mubr.f32.gmra.mrb[12].mxu1 %v15951_v60  ;;  %v17816_v60 = vld [vmem:[#allocation85_spill] sm:$0xff] }
 0x4b2   : > { %17811 = vst [vmem:[#allocation73_spill] sm:$0xff] %v16024_v27  ;;  %11430 = vmatprep.mubr.f32.mxu1 %v17813_v45  ;;  %v16042_v27 = vpack.c.bf16 %v17820_v23, %v17818_v61  ;;  %v17821_v17 = vld [vmem:[#allocation45_spill] sm:$0xff]  ;;  %v17830_v23 = vld [vmem:[#allocation67_spill] sm:$0xff]  ;;  %v17841_v61 = vand.u32 4294901760, %v17840_v30 }
 0x4b6   : > { %12637 = vmatpush3.bf16.xpose.msra.mxu1 %v17789_v54 }
 0x4b7   : > { %12639 = vmatprep.subr.bf16.mxu1 %v17791_v15 }
 0x4be   : > { %12641 = vmatpush3.bf16.xpose.msra.mxu1 %v17793_v18 }
 0x4bf   : > { %12643 = vmatprep.subr.bf16.mxu1 %v17795_v3 }
 0x4c6   : > { %12645 = vmatpush3.bf16.xpose.msra.mxu1 %v17797_v52 }
 0x4c7   : > { %12647 = vmatprep.subr.bf16.mxu1 %v17814_v6 }
 0x4ce   : > { %12649 = vmatpush3.bf16.xpose.msra.mxu1 %v17815_v14 }
 0x4cf   : > { %12651 = vmatprep.subr.bf16.mxu1 %v17816_v60 }
 0x4d6   : > { %12653 = vmatpush3.bf16.xpose.msra.mxu1 %v17821_v17 }
 0x4d7   : > { %12655 = vmatprep.subr.bf16.mxu1 %v16042_v27 }
 0x4dd   : > { %11431 = vmatmul.mubr.f32.vlgmr.msra.gmra.mrb[2].mxu1 %v17813_v45  ;;  %v16074_v45 = vpack.c.bf16 %v17838_v38, %v17836_v55  ;;  %v17852_v38 = vld [vmem:[#allocation34_spill] sm:$0xff] }
 0x4de   : > { %12657 = vmatpush3.bf16.xpose.msra.mxu1 %v16050_v0  ;;  %11432 = vmatprep.mubr.f32.mxu1 %v17830_v23  ;;  %v17853_v30 = vand.u32 4294901760, %v17852_v38 }
 0x4df   : > { %12659 = vmatprep.subr.bf16.mxu1 %v16056_v40  ;;  %17839 = vst [vmem:[#allocation19_spill] sm:$0xff] %v16074_v45 }
 0x4e1   : > { %11433 = vmatmul.mubr.f32.gmra.mrb[4].mxu1 %v17830_v23  ;;  %v17842_v23 = vld [vmem:[#allocation81_spill] sm:$0xff] }
 0x4e2   : > { %11434 = vmatprep.mubr.f32.mxu1 %v15922_v20  ;;  %v17843_v43 = vand.u32 4294901760, %v17842_v23  ;;  %v17855_v23 = vld [vmem:[#allocation68_spill] sm:$0xff] }
 0x4e4   : > { %v16085_v26 = vpack.c.bf16 %v17843_v43, %v17841_v61  ;;  %v17856_v43 = vand.u32 4294901760, %v17855_v23  ;;  %v17869_v23 = vld [vmem:[#allocation38_spill] sm:$0xff] }
 0x4e5   : > { %11435 = vmatmul.mubr.f32.gmra.mrb[6].mxu1 %v15922_v20  ;;  %v17848_v20 = vand.u32 4294901760, %v17847_v22  ;;  %v17860_v22 = vld [vmem:[#allocation87_spill] sm:$0xff] }
 0x4e6   : > { %12661 = vmatpush3.bf16.xpose.msra.mxu1 %v16067_v59  ;;  %11436 = vmatprep.mubr.f32.mxu1 %v15937_v2  ;;  %17844 = vst [vmem:[#allocation61_spill] sm:$0xff] %v16085_v26 }
 0x4e7   : > { %12663 = vmatprep.subr.bf16.mxu1 %v16074_v45  ;;  %v16092_v55 = vpack.c.bf16 %v17848_v20, %v17846_v37  ;;  %v17862_v20 = vld [vmem:[#allocation21_spill] sm:$0xff] }
 0x4e9   : > { %11437 = vmatmul.mubr.f32.gmra.mrb[8].mxu1 %v15937_v2  ;;  %17849 = vst [vmem:[#allocation55_spill] sm:$0xff] %v16092_v55  ;;  %v17850_v2 = vld [vmem:[#allocation33_spill] sm:$0xff] }
 0x4ea   : > { %11438 = vmatprep.mubr.f32.mxu1 %v15948_v5  ;;  %v17851_v9 = vand.u32 4294901760, %v17850_v2  ;;  %v17863_v2 = vand.u32 4294901760, %v17862_v20 }
 0x4ec   : > { %v16103_v61 = vpack.c.bf16 %v17853_v30, %v17851_v9  ;;  %v17864_v9 = vld [vmem:[#allocation71_spill] sm:$0xff] }
 0x4ed   : > { %11439 = vmatmul.mubr.f32.gmra.mrb[10].mxu1 %v15948_v5  ;;  %v17858_v5 = vand.u32 4294901760, %v17857_v25  ;;  %v17865_v38 = vand.u32 4294901760, %v17864_v9  ;;  %v17866_v30 = vld [vmem:[#allocation91_spill] sm:$0xff] }
 0x4ee   : > { %12665 = vmatpush3.bf16.xpose.msra.mxu1 %v16085_v26  ;;  %11440 = vmatprep.mubr.f32.mxu1 %v15957_v53  ;;  %17854 = vst [vmem:[#allocation59_spill] sm:$0xff] %v16103_v61  ;;  %v17867_v26 = vand.u32 4294901760, %v17866_v30  ;;  %v17871_v25 = vld [vmem:[#allocation43_spill] sm:$0xff] }
 0x4ef   : > { %12667 = vmatprep.subr.bf16.mxu1 %v16092_v55  ;;  %v16110_v37 = vpack.c.bf16 %v17858_v5, %v17856_v43  ;;  %v17870_v43 = vand.u32 4294901760, %v17869_v23  ;;  %v17872_v5 = vand.u32 4294901760, %v17871_v25  ;;  %v6205_v23 = vld [vmem:[%s16938_s8] sm:$0xff] }
 0x4f0   : > { %v16124_v45 = vpack.c.bf16 %v17867_v26, %v17865_v38  ;;  %v17877_v26 = vld [vmem:[#allocation78_spill] sm:$0xff]  ;;  %v17879_v38 = vld [vmem:[#allocation92_spill] sm:$0xff] }
 0x4f1   : > { %11441 = vmatmul.mubr.f32.gmra.mrb[12].mxu1 %v15957_v53  ;;  %17859 = vst [vmem:[#allocation63_spill] sm:$0xff] %v16110_v37  ;;  %v17861_v53 = vand.u32 4294901760, %v17860_v22  ;;  %v17873_v22 = vld [vmem:[#allocation89_spill] sm:$0xff]  ;;  %v17878_v9 = vand.u32 4294901760, %v17877_v26  ;;  %v17880_v30 = vand.u32 4294901760, %v17879_v38  ;;  %v17885_v38 = vld [vmem:[#allocation62_spill] sm:$0xff] }
 0x4f2   : > { %11474 = vmatprep.mubr.f32.mxu1 %v15733_v48  ;;  %17868 = vst [vmem:[#allocation69_spill] sm:$0xff] %v16124_v45  ;;  %v17874_v20 = vand.u32 4294901760, %v17873_v22 }
 0x4f3   : > { %v16118_v55 = vpack.c.bf16 %v17863_v2, %v17861_v53  ;;  %v17875_v53 = vld [vmem:[#allocation90_spill] sm:$0xff] }
 0x4f4   : > { %v17876_v2 = vand.u32 4294901760, %v17875_v53  ;;  %v6208_v53 = vsel %vm4236_vm3, %v6205_v23, 0 }
 0x4f6   : > { %12669 = vmatpush3.bf16.xpose.msra.mxu1 %v16103_v61  ;;  %v16138_v61 = vpack.c.bf16 %v17876_v2, %v17874_v20  ;;  %v16158_v2 = vand.u32 4294901760, %v6208_v53 }
 0x4f7   : > { %12671 = vmatprep.subr.bf16.mxu1 %v16110_v37  ;;  %v16132_v37 = vpack.c.bf16 %v17872_v5, %v17870_v43  ;;  %v17881_v43 = vld [vmem:[#allocation49_spill] sm:$0xff]  ;;  %v17883_v5 = vld [vmem:[#allocation2_spill] sm:$0xff] }
 0x4f8   : > { %v17882_v25 = vand.u32 4294901760, %v17881_v43  ;;  %v17884_v22 = vand.u32 4294901760, %v17883_v5  ;;  %v16162_v26 = vsub.f32 %v6208_v53, %v16158_v2  ;;  %v17887_v43 = vld [vmem:[#allocation48_spill] sm:$0xff]  ;;  %v17889_v53 = vld [vmem:[#allocation22_spill] sm:$0xff] }
 0x4f9   : > { %v17888_v5 = vand.u32 4294901760, %v17887_v43  ;;  %v5453_v43 = vld [vmem:[%s16935_s5 + $0x10] sm:$0xff] }
 0x4fa   : > { %v16155_v20 = vpack.c.bf16 %v17884_v22, %v17882_v25 }
 0x4fe   : > { %12673 = vmatpush3.bf16.xpose.msra.mxu1 %v16118_v55 }
 0x4ff   : > { %12675 = vmatprep.subr.bf16.mxu1 %v16124_v45  ;;  %v16146_v45 = vpack.c.bf16 %v17880_v30, %v17878_v9  ;;  %v16166_v9 = vand.u32 4294901760, %v16162_v26  ;;  %v17886_v30 = vand.u32 4294901760, %v17885_v38  ;;  %v5452_v38 = vld [vmem:[%s16935_s5 + $0x8] sm:$0xff] }
 0x501   : > { %v16172_v25 = vpack.c.bf16 %v17888_v5, %v17886_v30  ;;  %v6313_v23 = vsub.f32 %v16162_v26, %v16166_v9 }
 0x503   : > { %v6314_v22 = vand.u32 4294901760, %v6313_v23 }
 0x505   : > { %11562 = vmatprep.mubr.f32.mxu0 %v6314_v22 }
 0x506   : > { %12677 = vmatpush3.bf16.xpose.msra.mxu1 %v16132_v37  ;;  %11563 = vmatmul.mubr.f32.vlgmr.msra.gmra.mrb[34].mxu0 %v6314_v22 }
 0x507   : > { %12679 = vmatprep.subr.bf16.mxu1 %v16138_v61  ;;  %12753 = vmatpush3.bf16.xpose.msra.mxu0 %v17889_v53 }
 0x508   : > { %12755 = vmatprep.subr.bf16.mxu0 %v15544_v47  ;;  %v6206_v47 = vld [vmem:[%s16938_s8 + $0x8] sm:$0xf] }
 0x50e   : > { %12681 = vmatpush3.bf16.xpose.msra.mxu1 %v16146_v45 }
 0x50f   : > { %12683 = vmatprep.subr.bf16.mxu1 %v16155_v20  ;;  %12757 = vmatpush3.bf16.xpose.msra.mxu0 %v15556_v57  ;;  %v6211_v57 = vsel %vm4236_vm3, %v6206_v47, 0  ;;  %v17890_v47 = vld [vmem:[#allocation51_spill] sm:$0xff] }
 0x510   : > { %12759 = vmatprep.subr.bf16.mxu0 %v15575_v12  ;;  %v16219_v12 = vand.u32 4294901760, %v6211_v57 }
 0x516   : > { %12685 = vmatpush3.bf16.xpose.msra.mxu1 %v16172_v25 }
 0x517   : > { %12687 = vmatprep.subr.bf16.mxu1 %v15199_v49  ;;  %12761 = vmatpush3.bf16.xpose.msra.mxu0 %v15588_v39  ;;  %v16225_v39 = vsub.f32 %v6211_v57, %v16219_v12 }
 0x518   : > { %12763 = vmatprep.subr.bf16.mxu0 %v15617_v33 }
 0x519   : > { %v16228_v33 = vand.u32 4294901760, %v16225_v39 }
 0x51d   : > { %11475 = vmatmul.mubr.f32.vlgmr.msra.gmra.mrb[2].mxu1 %v15733_v48 }
 0x51e   : > { %12689 = vmatpush3.bf16.xpose.msra.mxu1 %v15207_v11  ;;  %11476 = vmatprep.mubr.f32.mxu1 %v15884_v62 }
 0x51f   : > { %12691 = vmatprep.subr.bf16.mxu1 %v17782_v41  ;;  %12765 = vmatpush3.bf16.xpose.msra.mxu0 %v15630_v31 }
 0x520   : > { %12767 = vmatprep.subr.bf16.mxu0 %v15659_v51  ;;  %v6324_v51 = vsub.f32 %v16225_v39, %v16228_v33 }
 0x521   : > { %11477 = vmatmul.mubr.f32.gmra.mrb[4].mxu1 %v15884_v62 }
 0x522   : > { %11478 = vmatprep.mubr.f32.mxu1 %v15890_v19 }
 0x525   : > { %11479 = vmatmul.mubr.f32.gmra.mrb[6].mxu1 %v15890_v19 }
 0x526   : > { %12693 = vmatpush3.bf16.xpose.msra.mxu1 %v17783_v58  ;;  %11480 = vmatprep.mubr.f32.mxu1 %v15915_v32 }
 0x527   : > { %12695 = vmatprep.subr.bf16.mxu1 %v17784_v7  ;;  %12769 = vmatpush3.bf16.xpose.msra.mxu0 %v15672_v42  ;;  %v6325_v42 = vand.u32 4294901760, %v6324_v51 }
 0x528   : > { %12771 = vmatprep.subr.bf16.mxu0 %v15704_v10 }
 0x529   : > { %11481 = vmatmul.mubr.f32.gmra.mrb[8].mxu1 %v15915_v32  ;;  %11564 = vmatprep.mubr.f32.mxu0 %v6325_v42 }
 0x52a   : > { %11482 = vmatprep.mubr.f32.mxu1 %v15930_v35  ;;  %11565 = vmatmul.mubr.f32.gmra.mrb[36].mxu0 %v6325_v42 }
 0x52b   : > { %11598 = vmatprep.mubr.f32.mxu0 %v16158_v2 }
 0x52d   : > { %11483 = vmatmul.mubr.f32.gmra.mrb[10].mxu1 %v15930_v35 }
 0x52e   : > { %12697 = vmatpush3.bf16.xpose.msra.mxu1 %v17785_v21  ;;  %11484 = vmatprep.mubr.f32.mxu1 %v15942_v13 }
 0x52f   : > { %12699 = vmatprep.subr.bf16.mxu1 %v17787_v36  ;;  %12773 = vmatpush3.bf16.xpose.msra.mxu0 %v15718_v24 }
 0x530   : > { %12775 = vmatprep.subr.bf16.mxu0 %v15757_v56  ;;  %v5481_v56 = vsel %vm5476_vm4, %v17812_v28, 0 }
 0x531   : > { %11485 = vmatmul.mubr.f32.gmra.mrb[12].mxu1 %v15942_v13  ;;  %v16230_v31 = vand.u32 4294901760, %v5481_v56 }
 0x532   : > { %11518 = vmatprep.mubr.f32.mxu1 %v15733_v48 }
 0x533   : > { %v16238_v10 = vsub.f32 %v5481_v56, %v16230_v31  ;;  %v5455_v56 = vld [vmem:[%s16935_s5 + $0x20] sm:$0xff] }
 0x535   : > { %v5618_v24 = vand.u32 4294901760, %v16238_v10 }
 0x536   : > { %12701 = vmatpush3.bf16.xpose.msra.mxu1 %v17789_v54 }
 0x537   : > { %12703 = vmatprep.subr.bf16.mxu1 %v17791_v15  ;;  %12777 = vmatpush3.bf16.xpose.msra.mxu0 %v15772_v1  ;;  %v5451_v1 = vld [vmem:[%s16935_s5] sm:$0xff] }
 0x538   : > { %12779 = vmatprep.subr.bf16.mxu0 %v15808_v63  ;;  %v5478_v63 = vsel %vm5476_vm4, %v17810_v16, 0 }
 0x53e   : > { %12705 = vmatpush3.bf16.xpose.msra.mxu1 %v17793_v18 }
 0x53f   : > { %12707 = vmatprep.subr.bf16.mxu1 %v17795_v3  ;;  %12781 = vmatpush3.bf16.xpose.msra.mxu0 %v15810_v46  ;;  %v5619_v46 = vsub.f32 %v16238_v10, %v5618_v24 }
 0x540   : > { %12783 = vmatprep.subr.bf16.mxu0 %v15805_v34  ;;  %v16258_v34 = vand.u32 4294901760, %v5478_v63 }
 0x542   : > { %v16290_v23 = vsub.f32 %v5478_v63, %v16258_v34 }
 0x544   : > { %v17309_v51 = vand.u32 4294901760, %v16290_v23 }
 0x546   : > { %12709 = vmatpush3.bf16.xpose.msra.mxu1 %v17797_v52  ;;  %11599 = vmatmul.mubr.f32.vlgmr.msra.gmra.mrb[34].mxu0 %v16158_v2 }
 0x547   : > { %12711 = vmatprep.subr.bf16.mxu1 %v17814_v6  ;;  %12785 = vmatpush3.bf16.xpose.msra.mxu0 %v15815_v50  ;;  %v5620_v50 = vand.u32 4294901760, %v5619_v46  ;;  %v5471_v46 = vsel %vm5457_vm5, %v5455_v56, 0 }
 0x548   : > { %11600 = vmatprep.mubr.f32.mxu0 %v16219_v12  ;;  %12787 = vmatprep.subr.bf16.mxu0 %v15820_v8  ;;  %v5459_v8 = vsel %vm5457_vm5, %v5451_v1, 0  ;;  %v5456_v1 = vld [vmem:[%s16935_s5 + $0x28] sm:$0xff] }
 0x549   : > { %v16270_v30 = vand.u32 4294901760, %v5459_v8  ;;  %v5474_v56 = vsel %vm5457_vm5, %v5456_v1, 0  ;;  %v17893_v1 = vld [vmem:[#allocation56_spill] sm:$0xff] }
 0x54a   : > { %11601 = vmatmul.mubr.f32.gmra.mrb[36].mxu0 %v16219_v12 }
 0x54b   : > { %11634 = vmatprep.mubr.f32.mxu0 %v16162_v26 }
 0x54e   : > { %12713 = vmatpush3.bf16.xpose.msra.mxu1 %v17815_v14 }
 0x54f   : > { %12715 = vmatprep.subr.bf16.mxu1 %v17816_v60  ;;  %12789 = vmatpush3.bf16.xpose.msra.mxu0 %v15825_v4  ;;  %v16282_v4 = vsub.f32 %v5459_v8, %v16270_v30  ;;  %v17891_v8 = vld [vmem:[#allocation23_spill] sm:$0xff] }
 0x550   : > { %12791 = vmatprep.subr.bf16.mxu0 %v15830_v44  ;;  %v5454_v44 = vld [vmem:[%s16935_s5 + $0x18] sm:$0xff] }
 0x551   : > { %v5468_v57 = vsel %vm5457_vm5, %v5454_v44, 0  ;;  %v17892_v44 = vld [vmem:[#allocation52_spill] sm:$0xff] }
 0x552   : > { %v16315_v63 = vand.u32 4294901760, %v5468_v57 }
 0x556   : > { %12717 = vmatpush3.bf16.xpose.msra.mxu1 %v17821_v17 }
 0x557   : > { %5484 = vmatprep.subr.mxu1 %v16230_v31  ;;  %12793 = vmatpush3.bf16.xpose.msra.mxu0 %v15835_v29 }
 0x558   : > { %12795 = vmatprep.subr.bf16.mxu0 %v17890_v47  ;;  %v13556_v47 = vmov 0.0  }
 0x55d   : > { %11519 = vmatmul.mubr.f32.vlgmr.msra.gmra.mrb[2].mxu1 %v15733_v48  ;;  %v5462_v48 = vsel %vm5457_vm5, %v5452_v38, 0 }
 0x55e   : > { %5486 = vmatpush1.msra.mxu1 %v16258_v34  ;;  %11520 = vmatprep.mubr.f32.mxu1 %v15884_v62  ;;  %v16278_v5 = vand.u32 4294901760, %v5462_v48 }
 0x55f   : > { %5621 = vmatprep.subr.mxu1 %v5620_v50  ;;  %12797 = vmatpush3.bf16.xpose.msra.mxu0 %v17891_v8  ;;  %v16346_v8 = vand.u32 4294901760, %v5474_v56 }
 0x560   : > { %v16293_v22 = vsub.f32 %v5462_v48, %v16278_v5  ;;  %12799 = vmatprep.subr.bf16.mxu0 %v17892_v44  ;;  %v17894_v44 = vld [vmem:[#allocation86_spill] sm:$0xff] }
 0x561   : > { %11521 = vmatmul.mubr.f32.gmra.mrb[4].mxu1 %v15884_v62  ;;  %v5465_v62 = vsel %vm5457_vm5, %v5453_v43, 0  ;;  %v16332_v43 = vsub.f32 %v5468_v57, %v16315_v63 }
 0x562   : > { %11522 = vmatprep.mubr.f32.mxu1 %v15890_v19  ;;  %v16298_v53 = vand.u32 4294901760, %v5465_v62  ;;  %v17308_v29 = vand.u32 4294901760, %v16293_v22 }
 0x564   : > { %v16313_v42 = vsub.f32 %v5465_v62, %v16298_v53  ;;  %v5564_v50 = vsub.f32 %v16293_v22, %v17308_v29  ;;  %v16334_v62 = vand.u32 4294901760, %v5471_v46 }
 0x565   : > { %11523 = vmatmul.mubr.f32.gmra.mrb[6].mxu1 %v15890_v19  ;;  %v5552_v19 = vand.u32 4294901760, %v16282_v4 }
 0x566   : > { %11524 = vmatprep.mubr.f32.mxu1 %v15915_v32  ;;  %v5574_v48 = vand.u32 4294901760, %v16313_v42  ;;  %v16344_v57 = vsub.f32 %v5471_v46, %v16334_v62  ;;  %v16356_v46 = vsub.f32 %v5474_v56, %v16346_v8 }
 0x567   : > { %12801 = vmatpush3.bf16.xpose.msra.mxu0 %v17893_v1  ;;  %v17895_v1 = vld [vmem:[#allocation58_spill] sm:$0xff] }
 0x568   : > { %12803 = vmatprep.subr.bf16.mxu0 %v17894_v44  ;;  %v17896_v44 = vld [vmem:[#allocation60_spill] sm:$0xff] }
 0x569   : > { %11525 = vmatmul.mubr.f32.gmra.mrb[8].mxu1 %v15915_v32  ;;  %v5553_v32 = vsub.f32 %v16282_v4, %v5552_v19 }
 0x56a   : > { %11526 = vmatprep.mubr.f32.mxu1 %v15930_v35 }
 0x56b   : > { %v5554_v38 = vand.u32 4294901760, %v5553_v32  ;;  %v17310_v32 = vand.u32 4294901760, %v16332_v43 }
 0x56d   : > { %11527 = vmatmul.mubr.f32.gmra.mrb[10].mxu1 %v15930_v35  ;;  %v5625_v35 = vsub.f32 %v16290_v23, %v17309_v51  ;;  %v5565_v51 = vand.u32 4294901760, %v5564_v50  ;;  %v5586_v50 = vsub.f32 %v16332_v43, %v17310_v32 }
 0x56e   : > { %11528 = vmatprep.mubr.f32.mxu1 %v15942_v13 }
 0x56f   : > { %v5626_v29 = vand.u32 4294901760, %v5625_v35  ;;  %12805 = vmatpush3.bf16.xpose.msra.mxu0 %v17895_v1 }
 0x570   : > { %12807 = vmatprep.subr.bf16.mxu0 %v17896_v44 }
 0x571   : > { %11529 = vmatmul.mubr.f32.gmra.mrb[12].mxu1 %v15942_v13  ;;  %v5575_v13 = vsub.f32 %v16313_v42, %v5574_v48 }
 0x572   : > { %5549 = vmatprep.mubr.f32.mxu1 %v13556_v47 }
 0x573   : > { %v5576_v35 = vand.u32 4294901760, %v5575_v13  ;;  %v5607_v13 = vand.u32 4294901760, %v16356_v46 }
 0x575   : > { %5555 = vmatmul.mubr.f32.vlgmr.msra.gmra.mrb[2].mxu1 %v5554_v38  ;;  %v17311_v38 = vand.u32 4294901760, %v16344_v57  ;;  %v5608_v56 = vsub.f32 %v16356_v46, %v5607_v13 }
 0x576   : > { %5627 = vmatpush1.msra.mxu1 %v5626_v29  ;;  %5560 = vmatprep.mubr.f32.mxu1 %v13556_v47  ;;  %v5587_v29 = vand.u32 4294901760, %v5586_v50  ;;  %v17897_v50 = vld [vmem:[#allocation25_spill] sm:$0xff] }
 0x577   : > { %5735 = vmatprep.subr.mxu1 %v16238_v10  ;;  %12809 = vmatpush3.bf16.xpose.msra.mxu0 %v17897_v50  ;;  %v17902_v10 = vand.u32 4294901760, %v16332_v43 }
 0x579   : > { %5566 = vmatmul.mubr.f32.gmra.mrb[4].mxu1 %v5565_v51  ;;  %v5597_v51 = vsub.f32 %v16344_v57, %v17311_v38  ;;  %v17898_v38 = vld [vmem:[#allocation64_spill] sm:$0xff] }
 0x57a   : > { %5571 = vmatprep.mubr.f32.mxu1 %v13556_v47  ;;  %12811 = vmatprep.subr.bf16.mxu0 %v17898_v38 }
 0x57b   : > { %v5598_v32 = vand.u32 4294901760, %v5597_v51 }
 0x57d   : > { %5577 = vmatmul.mubr.f32.gmra.mrb[6].mxu1 %v5576_v35  ;;  %v5609_v35 = vand.u32 4294901760, %v5608_v56 }
 0x57e   : > { %5582 = vmatprep.mubr.f32.mxu1 %v13556_v47 }
 0x581   : > { %5588 = vmatmul.mubr.f32.gmra.mrb[8].mxu1 %v5587_v29  ;;  %v17899_v29 = vld [vmem:[#allocation8_spill] sm:$0xff] }
 0x582   : > { %5593 = vmatprep.mubr.f32.mxu1 %v13556_v47  ;;  %12813 = vmatpush3.bf16.xpose.msra.mxu0 %v17899_v29 }
 0x583   : > { %12815 = vmatprep.subr.bf16.mxu0 %v15199_v49 }
 0x585   : > { %5599 = vmatmul.mubr.f32.gmra.mrb[10].mxu1 %v5598_v32 }
 0x586   : > { %5604 = vmatprep.mubr.f32.mxu1 %v13556_v47 }
 0x589   : > { %5610 = vmatmul.mubr.f32.gmra.mrb[12].mxu1 %v5609_v35  ;;  %11635 = vmatmul.mubr.f32.vlgmr.msra.gmra.mrb[34].mxu0 %v16162_v26  ;;  %v17900_v26 = vand.u32 4294901760, %v16290_v23 }
 0x58a   : > { %5690 = vmatprep.mubr.f32.mxu1 %v13556_v47  ;;  %12817 = vmatpush3.bf16.xpose.msra.mxu0 %v15207_v11 }
 0x58b   : > { %11636 = vmatprep.mubr.f32.mxu0 %v16225_v39  ;;  %12819 = vmatprep.subr.bf16.mxu0 %v17782_v41 }
 0x58d   : > { %5692 = vmatmul.mubr.f32.vlgmr.msra.gmra.mrb[2].mxu1 %v16270_v30  ;;  %11637 = vmatmul.mubr.f32.gmra.mrb[36].mxu0 %v16225_v39  ;;  %v17901_v39 = vand.u32 4294901760, %v16293_v22 }
 0x58e   : > { %5738 = vmatpush1.msra.mxu1 %v16290_v23  ;;  %5697 = vmatprep.mubr.f32.mxu1 %v13556_v47 }
 0x58f   : > { %5851 = vmatprep.subr.mxu1 %v16230_v31  ;;  %11670 = vmatprep.mubr.f32.mxu0 %v16166_v9 }
 0x591   : > { %5699 = vmatmul.mubr.f32.gmra.mrb[4].mxu1 %v16278_v5 }
 0x592   : > { %5704 = vmatprep.mubr.f32.mxu1 %v13556_v47  ;;  %12821 = vmatpush3.bf16.xpose.msra.mxu0 %v17783_v58 }
 0x593   : > { %12823 = vmatprep.subr.bf16.mxu0 %v17784_v7 }
 0x595   : > { %5706 = vmatmul.mubr.f32.gmra.mrb[6].mxu1 %v16298_v53 }
 0x596   : > { %5711 = vmatprep.mubr.f32.mxu1 %v13556_v47 }
 0x599   : > { %5713 = vmatmul.mubr.f32.gmra.mrb[8].mxu1 %v16315_v63 }
 0x59a   : > { %5718 = vmatprep.mubr.f32.mxu1 %v13556_v47  ;;  %12825 = vmatpush3.bf16.xpose.msra.mxu0 %v17785_v21 }
 0x59b   : > { %12827 = vmatprep.subr.bf16.mxu0 %v17787_v36 }
 0x59d   : > { %5720 = vmatmul.mubr.f32.gmra.mrb[10].mxu1 %v16334_v62 }
 0x59e   : > { %5725 = vmatprep.mubr.f32.mxu1 %v13556_v47 }
 0x5a1   : > { %5727 = vmatmul.mubr.f32.gmra.mrb[12].mxu1 %v16346_v8 }
 0x5a2   : > { %5801 = vmatprep.mubr.f32.mxu1 %v13556_v47  ;;  %12829 = vmatpush3.bf16.xpose.msra.mxu0 %v17789_v54 }
 0x5a3   : > { %12831 = vmatprep.subr.bf16.mxu0 %v17791_v15 }
 0x5a5   : > { %5804 = vmatmul.mubr.f32.vlgmr.msra.gmra.mrb[2].mxu1 %v16282_v4 }
 0x5a6   : > { %5853 = vmatpush1.msra.mxu1 %v16258_v34  ;;  %5809 = vmatprep.mubr.f32.mxu1 %v13556_v47 }
 0x5a7   : > { %5974 = vmatprep.subr.mxu1 %v5618_v24 }
 0x5a9   : > { %5812 = vmatmul.mubr.f32.gmra.mrb[4].mxu1 %v16293_v22 }
 0x5aa   : > { %5817 = vmatprep.mubr.f32.mxu1 %v13556_v47  ;;  %12833 = vmatpush3.bf16.xpose.msra.mxu0 %v17793_v18 }
 0x5ab   : > { %12835 = vmatprep.subr.bf16.mxu0 %v17795_v3 }
 0x5ad   : > { %5820 = vmatmul.mubr.f32.gmra.mrb[6].mxu1 %v16313_v42 }
 0x5ae   : > { %5825 = vmatprep.mubr.f32.mxu1 %v13556_v47 }
 0x5b1   : > { %5828 = vmatmul.mubr.f32.gmra.mrb[8].mxu1 %v16332_v43 }
 0x5b2   : > { %5833 = vmatprep.mubr.f32.mxu1 %v13556_v47  ;;  %12837 = vmatpush3.bf16.xpose.msra.mxu0 %v17797_v52 }
 0x5b3   : > { %12839 = vmatprep.subr.bf16.mxu0 %v17814_v6 }
 0x5b5   : > { %5836 = vmatmul.mubr.f32.gmra.mrb[10].mxu1 %v16344_v57 }
 0x5b6   : > { %5841 = vmatprep.mubr.f32.mxu1 %v13556_v47 }
 0x5b9   : > { %5844 = vmatmul.mubr.f32.gmra.mrb[12].mxu1 %v16356_v46 }
 0x5ba   : > { %5916 = vmatprep.mubr.f32.mxu1 %v13556_v47  ;;  %12841 = vmatpush3.bf16.xpose.msra.mxu0 %v17815_v14 }
 0x5bb   : > { %12843 = vmatprep.subr.bf16.mxu0 %v17816_v60 }
 0x5bd   : > { %5920 = vmatmul.mubr.f32.vlgmr.msra.gmra.mrb[2].mxu1 %v5552_v19 }
 0x5be   : > { %5978 = vmatpush1.msra.mxu1 %v17900_v26  ;;  %5925 = vmatprep.mubr.f32.mxu1 %v13556_v47 }
 0x5bf   : > { %6085 = vmatprep.subr.mxu1 %v16230_v31  ;;  %v17903_v31 = vand.u32 4294901760, %v16344_v57 }
 0x5c1   : > { %5929 = vmatmul.mubr.f32.gmra.mrb[4].mxu1 %v17901_v39 }
 0x5c2   : > { %5934 = vmatprep.mubr.f32.mxu1 %v13556_v47  ;;  %12845 = vmatpush3.bf16.xpose.msra.mxu0 %v17821_v17 }
 0x5c3   : > { %12847 = vmatprep.subr.bf16.mxu0 %v16042_v27  ;;  %v17906_v27 = vld [vmem:[#allocation55_spill] sm:$0xff] }
 0x5c5   : > { %5938 = vmatmul.mubr.f32.gmra.mrb[6].mxu1 %v5574_v48 }
 0x5c6   : > { %5943 = vmatprep.mubr.f32.mxu1 %v13556_v47 }
 0x5c9   : > { %5947 = vmatmul.mubr.f32.gmra.mrb[8].mxu1 %v17902_v10  ;;  %11671 = vmatmul.mubr.f32.vlgmr.msra.gmra.mrb[34].mxu0 %v16166_v9  ;;  %v17908_v9 = vld [vmem:[#allocation63_spill] sm:$0xff] }
 0x5ca   : > { %5952 = vmatprep.mubr.f32.mxu1 %v13556_v47  ;;  %12849 = vmatpush3.bf16.xpose.msra.mxu0 %v16050_v0  ;;  %v17904_v0 = vld [vmem:[#allocation19_spill] sm:$0xff] }
 0x5cb   : > { %11672 = vmatprep.mubr.f32.mxu0 %v16228_v33  ;;  %12851 = vmatprep.subr.bf16.mxu0 %v16056_v40  ;;  %v17905_v40 = vld [vmem:[#allocation61_spill] sm:$0xff] }
 0x5cd   : > { %5956 = vmatmul.mubr.f32.gmra.mrb[10].mxu1 %v17903_v31  ;;  %11673 = vmatmul.mubr.f32.gmra.mrb[36].mxu0 %v16228_v33  ;;  %v17909_v33 = vld [vmem:[#allocation69_spill] sm:$0xff] }
 0x5ce   : > { %5961 = vmatprep.mubr.f32.mxu1 %v13556_v47  ;;  %11706 = vmatprep.mubr.f32.mxu0 %v16158_v2 }
 0x5d1   : > { %5965 = vmatmul.mubr.f32.gmra.mrb[12].mxu1 %v5607_v13 }
 0x5d2   : > { %6041 = vmatprep.mubr.f32.mxu1 %v13556_v47  ;;  %12853 = vmatpush3.bf16.xpose.msra.mxu0 %v16067_v59  ;;  %v17907_v59 = vld [vmem:[#allocation59_spill] sm:$0xff] }
 0x5d3   : > { %12855 = vmatprep.subr.bf16.mxu0 %v17904_v0 }
 0x5d5   : > { %6043 = vmatmul.mubr.f32.vlgmr.msra.gmra.mrb[2].mxu1 %v16270_v30 }
 0x5d6   : > { %6087 = vmatpush1.msra.mxu1 %v16258_v34  ;;  %6048 = vmatprep.mubr.f32.mxu1 %v13556_v47 }
 0x5d9   : > { %6050 = vmatmul.mubr.f32.gmra.mrb[4].mxu1 %v16278_v5 }
 0x5da   : > { %6055 = vmatprep.mubr.f32.mxu1 %v13556_v47  ;;  %12857 = vmatpush3.bf16.xpose.msra.mxu0 %v17905_v40 }
 0x5db   : > { %12859 = vmatprep.subr.bf16.mxu0 %v17906_v27 }
 0x5dd   : > { %6057 = vmatmul.mubr.f32.gmra.mrb[6].mxu1 %v16298_v53 }
 0x5de   : > { %6062 = vmatprep.mubr.f32.mxu1 %v13556_v47 }
 0x5e1   : > { %6064 = vmatmul.mubr.f32.gmra.mrb[8].mxu1 %v16315_v63 }
 0x5e2   : > { %6069 = vmatprep.mubr.f32.mxu1 %v13556_v47  ;;  %12861 = vmatpush3.bf16.xpose.msra.mxu0 %v17907_v59 }
 0x5e3   : > { %12863 = vmatprep.subr.bf16.mxu0 %v17908_v9 }
 0x5e5   : > { %6071 = vmatmul.mubr.f32.gmra.mrb[10].mxu1 %v16334_v62 }
 0x5e6   : > { %6076 = vmatprep.mubr.f32.mxu1 %v13556_v47 }
 0x5e9   : > { %6078 = vmatmul.mubr.f32.gmra.mrb[12].mxu1 %v16346_v8 }
 0x5ea   : > { %6150 = vmatprep.mubr.f32.mxu1 %v13556_v47  ;;  %12865 = vmatpush3.bf16.xpose.msra.mxu0 %v16118_v55 }
 0x5eb   : > { %12867 = vmatprep.subr.bf16.mxu0 %v17909_v33 }
 0x5ed   : > { %6152 = vmatmul.mubr.f32.vlgmr.msra.gmra.mrb[2].mxu1 %v16270_v30 }
 0x5ee   : > { %6157 = vmatprep.mubr.f32.mxu1 %v13556_v47 }
 0x5f1   : > { %6159 = vmatmul.mubr.f32.gmra.mrb[4].mxu1 %v16278_v5 }
 0x5f2   : > { %6164 = vmatprep.mubr.f32.mxu1 %v13556_v47  ;;  %12869 = vmatpush3.bf16.xpose.msra.mxu0 %v16132_v37 }
 0x5f3   : > { %12871 = vmatprep.subr.bf16.mxu0 %v16138_v61 }
 0x5f5   : > { %6166 = vmatmul.mubr.f32.gmra.mrb[6].mxu1 %v16298_v53 }
 0x5f6   : > { %6171 = vmatprep.mubr.f32.mxu1 %v13556_v47 }
 0x5f9   : > { %6173 = vmatmul.mubr.f32.gmra.mrb[8].mxu1 %v16315_v63 }
 0x5fa   : > { %6178 = vmatprep.mubr.f32.mxu1 %v13556_v47  ;;  %12873 = vmatpush3.bf16.xpose.msra.mxu0 %v16146_v45 }
 0x5fb   : > { %12875 = vmatprep.subr.bf16.mxu0 %v16155_v20 }
 0x5fd   : > { %6180 = vmatmul.mubr.f32.gmra.mrb[10].mxu1 %v16334_v62 }
 0x5fe   : > { %6185 = vmatprep.mubr.f32.mxu1 %v13556_v47 }
 0x601   : > { %6187 = vmatmul.mubr.f32.gmra.mrb[12].mxu1 %v16346_v8 }
 0x602   : > { %7858 = vmatprep.mubr.f32.mxu1 %v13556_v47  ;;  %12877 = vmatpush3.bf16.xpose.msra.mxu0 %v16172_v25 }
 0x603   : > { %12879 = vmatprep.subr.bf16.mxu0 %v15199_v49  ;;  %v7117_v49 = vld [vmem:[%s16937_s7] sm:$0xff] }
 0x609   : > { %11707 = vmatmul.mubr.f32.vlgmr.msra.gmra.mrb[34].mxu0 %v16158_v2 }
 0x60a   : > { %12881 = vmatpush3.bf16.xpose.msra.mxu0 %v15207_v11  ;;  %11708 = vmatprep.mubr.f32.mxu0 %v16219_v12  ;;  %v7121_v11 = vsel %vm7119_vm6, %v7117_v49, 0 }
 0x60b   : > { %12883 = vmatprep.subr.bf16.mxu0 %v17782_v41 }
 0x60d   : > { %11709 = vmatmul.mubr.f32.gmra.mrb[36].mxu0 %v16219_v12 }
 0x60e   : > { %11742 = vmatprep.mubr.f32.mxu0 %v16158_v2 }
 0x612   : > { %12885 = vmatpush3.bf16.xpose.msra.mxu0 %v17783_v58 }
 0x613   : > { %12887 = vmatprep.subr.bf16.mxu0 %v17784_v7 }
 0x61a   : > { %12889 = vmatpush3.bf16.xpose.msra.mxu0 %v17785_v21 }
 0x61b   : > { %12891 = vmatprep.subr.bf16.mxu0 %v17787_v36 }
 0x622   : > { %12893 = vmatpush3.bf16.xpose.msra.mxu0 %v17789_v54  ;;  %v16518_v54 = vand.u32 4294901760, %v7121_v11 }
 0x623   : > { %12895 = vmatprep.subr.bf16.mxu0 %v17791_v15  ;;  %v7118_v15 = vld [vmem:[%s16937_s7 + $0x8] sm:$0xf] }
 0x624   : > { %v16524_v41 = vsub.f32 %v7121_v11, %v16518_v54  ;;  %v7124_v58 = vsel %vm7119_vm6, %v7118_v15, 0 }
 0x626   : > { %v7205_v55 = vand.u32 4294901760, %v16524_v41 }
 0x628   : > { %v16545_v22 = vsub.f32 %v16524_v41, %v7205_v55 }
 0x62a   : > { %12897 = vmatpush3.bf16.xpose.msra.mxu0 %v17793_v18 }
 0x62b   : > { %12899 = vmatprep.subr.bf16.mxu0 %v17795_v3 }
 0x632   : > { %12901 = vmatpush3.bf16.xpose.msra.mxu0 %v17797_v52 }
 0x633   : > { %12903 = vmatprep.subr.bf16.mxu0 %v17814_v6  ;;  %v16526_v6 = vand.u32 4294901760, %v7124_v58 }
 0x635   : > { %v16536_v34 = vsub.f32 %v7124_v58, %v16526_v6 }
 0x637   : > { %v7216_v46 = vand.u32 4294901760, %v16536_v34 }
 0x63a   : > { %12905 = vmatpush3.bf16.xpose.msra.mxu0 %v17815_v14 }
 0x63b   : > { %12907 = vmatprep.subr.bf16.mxu0 %v17816_v60 }
 0x642   : > { %12909 = vmatpush3.bf16.xpose.msra.mxu0 %v17821_v17 }
 0x649   : > { %11743 = vmatmul.mubr.f32.vlgmr.msra.gmra.mrb[34].mxu0 %v16158_v2 }
 0x64a   : > { %11744 = vmatprep.mubr.f32.mxu0 %v16219_v12 }
 0x64d   : > { %11745 = vmatmul.mubr.f32.gmra.mrb[36].mxu0 %v16219_v12 }
 0x64e   : > { %7202 = vmatprep.mubr.f32.mxu0 %v13556_v47 }
 0x6c0   : > { %v6153_v18 = vpop.f32.mrb[2].mxu1 }
 0x6c1   : > { %v6193_v3 = vmax.f32 %v6153_v18, 0.0  ;;  %v6155_v52 = vpop.f32.mrb[3].mxu1 }
 0x6c2   : > { %v6194_v7 = vmax.f32 %v6155_v52, 0.0 }
 0x6c3   : > { %v7128_v21 = vand.u32 4294901760, %v6193_v3 }
 0x6c4   : > { %v7126_v36 = vand.u32 4294901760, %v6194_v7  ;;  %v6160_v17 = vpop.f32.mrb[4].mxu1 }
 0x6c5   : > { %v16528_v14 = vsub.f32 %v6193_v3, %v7128_v21  ;;  %v6195_v60 = vmax.f32 %v6160_v17, 0.0  ;;  %v6162_v45 = vpop.f32.mrb[5].mxu1 }
 0x6c6   : > { %v16531_v61 = vsub.f32 %v6194_v7, %v7126_v36  ;;  %v6196_v37 = vmax.f32 %v6162_v45, 0.0 }
 0x6c7   : > { %v7233_v20 = vand.u32 4294901760, %v16528_v14  ;;  %v7132_v2 = vand.u32 4294901760, %v6195_v60 }
 0x6c8   : > { %v7227_v25 = vand.u32 4294901760, %v16531_v61  ;;  %v7130_v12 = vand.u32 4294901760, %v6196_v37  ;;  %v6167_v24 = vpop.f32.mrb[6].mxu1 }
 0x6c9   : > { %v16538_v30 = vpack.c.bf16 %v7132_v2, %v7128_v21  ;;  %v16540_v5 = vsub.f32 %v6195_v60, %v7132_v2  ;;  %v6197_v4 = vmax.f32 %v6167_v24, 0.0  ;;  %v6169_v23 = vpop.f32.mrb[7].mxu1  ;;  %v7234_v19 = vsub.f32 %v16528_v14, %v7233_v20 }
 0x6ca   : > { %v16548_v53 = vsub.f32 %v6196_v37, %v7130_v12  ;;  %v6198_v42 = vmax.f32 %v6169_v23, 0.0  ;;  %v16550_v63 = vpack.c.bf16 %v7130_v12, %v7126_v36  ;;  %v7228_v32 = vsub.f32 %v16531_v61, %v7227_v25 }
 0x6cb   : > { %v7245_v48 = vand.u32 4294901760, %v16540_v5  ;;  %v12936_v43 = vpack.c.bf16 %v16540_v5, %v16528_v14  ;;  %v7136_v62 = vand.u32 4294901760, %v6197_v4  ;;  %v7235_v10 = vand.u32 4294901760, %v7234_v19 }
 0x6cc   : > { %v7239_v57 = vand.u32 4294901760, %v16548_v53  ;;  %v7134_v8 = vand.u32 4294901760, %v6198_v42  ;;  %v6174_v38 = vpop.f32.mrb[8].mxu1  ;;  %12911 = vmatprep.subr.bf16.mxu0 %v16550_v63  ;;  %v12934_v51 = vpack.c.bf16 %v16548_v53, %v16531_v61  ;;  %v7229_v40 = vand.u32 4294901760, %v7228_v32 }
 0x6cd   : > { %v7246_v13 = vsub.f32 %v16540_v5, %v7245_v48  ;;  %v16562_v1 = vsub.f32 %v6197_v4, %v7136_v62  ;;  %v6199_v56 = vmax.f32 %v6174_v38, 0.0  ;;  %v6176_v44 = vpop.f32.mrb[9].mxu1  ;;  %12913 = vmatpush1.bf16.msra.mxu0 %v16538_v30  ;;  %v16565_v35 = vpack.c.bf16 %v7245_v48, %v7233_v20 }
 0x6ce   : > { %v16567_v50 = vsub.f32 %v6198_v42, %v7134_v8  ;;  %v6200_v29 = vmax.f32 %v6176_v44, 0.0  ;;  %v7240_v26 = vsub.f32 %v16548_v53, %v7239_v57  ;;  %v16570_v39 = vpack.c.bf16 %v7239_v57, %v7227_v25 }
 0x6cf   : > { %v7257_v31 = vand.u32 4294901760, %v16562_v1  ;;  %v7140_v0 = vand.u32 4294901760, %v6199_v56  ;;  %v7247_v27 = vand.u32 4294901760, %v7246_v13 }
 0x6d0   : > { %v7251_v59 = vand.u32 4294901760, %v16567_v50  ;;  %v7138_v9 = vand.u32 4294901760, %v6200_v29  ;;  %v6181_v33 = vpop.f32.mrb[10].mxu1  ;;  %v7241_v49 = vand.u32 4294901760, %v7240_v26 }
 0x6d1   : > { %v7258_v11 = vsub.f32 %v16562_v1, %v7257_v31  ;;  %v16575_v15 = vpack.c.bf16 %v7140_v0, %v7136_v62  ;;  %v16577_v18 = vsub.f32 %v6199_v56, %v7140_v0  ;;  %v6201_v3 = vmax.f32 %v6181_v33, 0.0  ;;  %v6183_v52 = vpop.f32.mrb[11].mxu1 }
 0x6d2   : > { %v16579_v58 = vsub.f32 %v6200_v29, %v7138_v9  ;;  %v6202_v7 = vmax.f32 %v6183_v52, 0.0  ;;  %v16581_v21 = vpack.c.bf16 %v7138_v9, %v7134_v8  ;;  %v12922_v36 = vpack.c.bf16 %v7241_v49, %v7229_v40 }
 0x6d3   : > { %v7259_v17 = vand.u32 4294901760, %v7258_v11  ;;  %v7269_v60 = vand.u32 4294901760, %v16577_v18  ;;  %v12940_v45 = vpack.c.bf16 %v16577_v18, %v16562_v1  ;;  %v7144_v37 = vand.u32 4294901760, %v6201_v3 }
 0x6d4   : > { %v7263_v20 = vand.u32 4294901760, %v16579_v58  ;;  %v7142_v2 = vand.u32 4294901760, %v6202_v7  ;;  %v6188_v25 = vpop.f32.mrb[12].mxu1  ;;  %12915 = vmatprep.subr.bf16.mxu0 %v16581_v21  ;;  %v12924_v12 = vpack.c.bf16 %v7247_v27, %v7235_v10  ;;  %v7252_v24 = vsub.f32 %v16567_v50, %v7251_v59 }
 0x6d5   : > { %v7270_v4 = vsub.f32 %v16577_v18, %v7269_v60  ;;  %v16590_v23 = vsub.f32 %v6201_v3, %v7144_v37  ;;  %v6203_v19 = vmax.f32 %v6188_v25, 0.0  ;;  %v6190_v42 = vpop.f32.mrb[13].mxu1  ;;  %12917 = vmatpush1.bf16.msra.mxu0 %v16575_v15  ;;  %v12938_v48 = vpack.c.bf16 %v16579_v58, %v16567_v50 }
 0x6d6   : > { %v7274_v62 = vsub.f32 %v6202_v7, %v7142_v2  ;;  %v6204_v32 = vmax.f32 %v6190_v42, 0.0  ;;  %v7253_v57 = vand.u32 4294901760, %v7252_v24  ;;  %v7264_v8 = vsub.f32 %v16579_v58, %v7263_v20 }
 0x6d7   : > { %v7271_v38 = vand.u32 4294901760, %v7270_v4  ;;  %v7281_v13 = vand.u32 4294901760, %v16590_v23  ;;  %v7148_v56 = vand.u32 4294901760, %v6203_v19  ;;  %v16597_v44 = vpack.c.bf16 %v7263_v20, %v7251_v59 }
 0x6d8   : > { %v7275_v29 = vand.u32 4294901760, %v7274_v62  ;;  %v7146_v26 = vand.u32 4294901760, %v6204_v32  ;;  %v7265_v10 = vand.u32 4294901760, %v7264_v8  ;;  %v16599_v0 = vpack.c.bf16 %v7269_v60, %v7257_v31 }
 0x6d9   : > { %v16601_v40 = vpack.c.bf16 %v7148_v56, %v7144_v37  ;;  %v7292_v27 = vsub.f32 %v6203_v19, %v7148_v56  ;;  %v12928_v50 = vpack.c.bf16 %v7271_v38, %v7259_v17  ;;  %v7282_v11 = vsub.f32 %v16590_v23, %v7281_v13 }
 0x6da   : > { %v7286_v9 = vsub.f32 %v6204_v32, %v7146_v26  ;;  %v16603_v33 = vpack.c.bf16 %v7146_v26, %v7142_v2  ;;  %v12926_v49 = vpack.c.bf16 %v7265_v10, %v7253_v57  ;;  %v7207_v59 = vand.u32 4294901760, %v16545_v22 }
 0x6db   : > { %v7293_v3 = vand.u32 4294901760, %v7292_v27  ;;  %v12944_v52 = vpack.c.bf16 %v7292_v27, %v16590_v23  ;;  %v7276_v31 = vsub.f32 %v7274_v62, %v7275_v29  ;;  %v7217_v7 = vsub.f32 %v16536_v34, %v7216_v46 }
 0x6dc   : > { %v7287_v58 = vand.u32 4294901760, %v7286_v9  ;;  %12919 = vmatprep.subr.bf16.mxu0 %v16603_v33  ;;  %v12942_v17 = vpack.c.bf16 %v7286_v9, %v7274_v62  ;;  %v7283_v25 = vand.u32 4294901760, %v7282_v11 }
 0x6dd   : > { %v7294_v60 = vsub.f32 %v7292_v27, %v7293_v3  ;;  %12921 = vmatpush1.bf16.msra.mxu0 %v16601_v40  ;;  %v12968_v37 = vpack.c.bf16 %v7293_v3, %v7281_v13  ;;  %v7277_v22 = vand.u32 4294901760, %v7276_v31  ;;  %v7218_v23 = vand.u32 4294901760, %v7217_v7 }
 0x6de   : > { %12923 = vmatprep.subr.bf16.mxu0 %v12922_v36  ;;  %v7288_v20 = vsub.f32 %v7286_v9, %v7287_v58  ;;  %v12966_v2 = vpack.c.bf16 %v7287_v58, %v7275_v29 }
 0x6df   : > { %v7295_v24 = vand.u32 4294901760, %v7294_v60 }
 0x6e0   : > { %7208 = vmatmul.mubr.f32.vlgmr.msra.gmra.mrb[34].mxu0 %v7207_v59  ;;  %v7289_v4 = vand.u32 4294901760, %v7288_v20 }
 0x6e1   : > { %12925 = vmatpush1.bf16.msra.mxu0 %v12924_v12  ;;  %7213 = vmatprep.mubr.f32.mxu0 %v13556_v47  ;;  %v12932_v19 = vpack.c.bf16 %v7295_v24, %v7283_v25  ;;  %v10627_v25 = vld [vmem:[%s16939_s9 + $0x18] sm:$0xf] }
 0x6e2   : > { %12927 = vmatprep.subr.bf16.mxu0 %v12926_v49  ;;  %v12930_v42 = vpack.c.bf16 %v7289_v4, %v7277_v22  ;;  %v8341_v22 = vsel %vm7776_vm7, %v10627_v25, 0 }
 0x6e4   : > { %7219 = vmatmul.mubr.f32.gmra.mrb[36].mxu0 %v7218_v23  ;;  %v16751_v23 = vand.u32 4294901760, %v8341_v22 }
 0x6e5   : > { %12929 = vmatpush1.bf16.msra.mxu0 %v12928_v50  ;;  %7349 = vmatprep.mubr.f32.mxu0 %v13556_v47 }
 0x6e6   : > { %12931 = vmatprep.subr.bf16.mxu0 %v12930_v42  ;;  %v8424_v42 = vsub.f32 %v8341_v22, %v16751_v23 }
 0x6e9   : > { %12933 = vmatpush1.bf16.msra.mxu0 %v12932_v19 }
 0x6ea   : > { %12935 = vmatprep.subr.bf16.mxu0 %v12934_v51 }
 0x6ec   : > { %7351 = vmatmul.mubr.f32.vlgmr.msra.gmra.mrb[34].mxu0 %v16518_v54 }
 0x6ed   : > { %12937 = vmatpush1.bf16.msra.mxu0 %v12936_v43  ;;  %7356 = vmatprep.mubr.f32.mxu0 %v13556_v47 }
 0x6ee   : > { %12939 = vmatprep.subr.bf16.mxu0 %v12938_v48 }
 0x6f0   : > { %7358 = vmatmul.mubr.f32.gmra.mrb[36].mxu0 %v16526_v6 }
 0x6f1   : > { %12941 = vmatpush1.bf16.msra.mxu0 %v12940_v45  ;;  %7452 = vmatprep.mubr.f32.mxu0 %v13556_v47 }
 0x6f2   : > { %12943 = vmatprep.subr.bf16.mxu0 %v12942_v17 }
 0x6f5   : > { %12945 = vmatpush1.bf16.msra.mxu0 %v12944_v52 }
 0x6f6   : > { %12947 = vmatprep.subr.bf16.mxu0 %v16550_v63 }
 0x6f8   : > { %7455 = vmatmul.mubr.f32.vlgmr.msra.gmra.mrb[34].mxu0 %v16524_v41  ;;  %v7774_v41 = vld [vmem:[%s16939_s9] sm:$0xff] }
 0x6f9   : > { %12949 = vmatpush1.bf16.msra.mxu0 %v16538_v30  ;;  %7460 = vmatprep.mubr.f32.mxu0 %v13556_v47  ;;  %v7778_v14 = vsel %vm7776_vm7, %v7774_v41, 0 }
 0x6fa   : > { %12951 = vmatprep.subr.bf16.mxu0 %v16581_v21  ;;  %v16668_v61 = vand.u32 4294901760, %v7778_v14 }
 0x6fc   : > { %7463 = vmatmul.mubr.f32.gmra.mrb[36].mxu0 %v16536_v34 }
 0x6fd   : > { %12953 = vmatpush1.bf16.msra.mxu0 %v16575_v15  ;;  %7545 = vmatprep.mubr.f32.mxu0 %v13556_v47 }
 0x6fe   : > { %12955 = vmatprep.subr.bf16.mxu0 %v16603_v33 }
 0x701   : > { %12957 = vmatpush1.bf16.msra.mxu0 %v16601_v40 }
 0x702   : > { %12959 = vmatprep.subr.bf16.mxu0 %v16570_v39 }
 0x704   : > { %7549 = vmatmul.mubr.f32.vlgmr.msra.gmra.mrb[34].mxu0 %v7205_v55  ;;  %v7775_v55 = vld [vmem:[%s16939_s9 + $0x8] sm:$0xf] }
 0x705   : > { %12961 = vmatpush1.bf16.msra.mxu0 %v16565_v35  ;;  %7554 = vmatprep.mubr.f32.mxu0 %v13556_v47  ;;  %v7781_v34 = vsel %vm7776_vm7, %v7775_v55, 0 }
 0x706   : > { %12963 = vmatprep.subr.bf16.mxu0 %v16597_v44  ;;  %v16676_v53 = vand.u32 4294901760, %v7781_v34 }
 0x708   : > { %7558 = vmatmul.mubr.f32.gmra.mrb[36].mxu0 %v7216_v46 }
 0x709   : > { %12965 = vmatpush1.bf16.msra.mxu0 %v16599_v0  ;;  %7664 = vmatprep.mubr.f32.mxu0 %v13556_v47 }
 0x70a   : > { %12967 = vmatprep.subr.bf16.mxu0 %v12966_v2 }
 0x70d   : > { %12969 = vmatpush1.bf16.msra.mxu0 %v12968_v37  ;;  %v10626_v37 = vld [vmem:[%s16939_s9 + $0x10] sm:$0xff] }
 0x70e   : > { %12971 = vmatprep.subr.bf16.mxu0 %v16550_v63  ;;  %v8338_v2 = vsel %vm7776_vm7, %v10626_v37, 0 }
 0x70f   : > { %v8412_v24 = vand.u32 4294901760, %v8338_v2 }
 0x710   : > { %7666 = vmatmul.mubr.f32.vlgmr.msra.gmra.mrb[34].mxu0 %v16518_v54 }
 0x711   : > { %12973 = vmatpush1.bf16.msra.mxu0 %v16538_v30  ;;  %7671 = vmatprep.mubr.f32.mxu0 %v13556_v47  ;;  %v8413_v4 = vsub.f32 %v8338_v2, %v8412_v24 }
 0x712   : > { %12975 = vmatprep.subr.bf16.mxu0 %v16581_v21 }
 0x713   : > { %v8414_v19 = vand.u32 4294901760, %v8413_v4 }
 0x714   : > { %7673 = vmatmul.mubr.f32.gmra.mrb[36].mxu0 %v16526_v6 }
 0x715   : > { %12977 = vmatpush1.bf16.msra.mxu0 %v16575_v15  ;;  %7755 = vmatprep.mubr.f32.mxu0 %v13556_v47  ;;  %v16689_v15 = vsub.f32 %v7781_v34, %v16676_v53  ;;  %v8415_v41 = vsub.f32 %v8413_v4, %v8414_v19 }
 0x716   : > { %12979 = vmatprep.subr.bf16.mxu0 %v16603_v33 }
 0x717   : > { %v7872_v57 = vand.u32 4294901760, %v16689_v15  ;;  %v8416_v55 = vand.u32 4294901760, %v8415_v41 }
 0x719   : > { %12981 = vmatpush1.bf16.msra.mxu0 %v16601_v40  ;;  %v7873_v40 = vsub.f32 %v16689_v15, %v7872_v57 }
 0x71b   : > { %v7874_v11 = vand.u32 4294901760, %v7873_v40 }
 0x71c   : > { %7757 = vmatmul.mubr.f32.vlgmr.msra.gmra.mrb[34].mxu0 %v16518_v54 }
 0x71d   : > { %7762 = vmatprep.mubr.f32.mxu0 %v13556_v47 }
 0x720   : > { %7764 = vmatmul.mubr.f32.gmra.mrb[36].mxu0 %v16526_v6  ;;  %v16674_v6 = vsub.f32 %v7778_v14, %v16668_v61  ;;  %v8425_v14 = vand.u32 4294901760, %v8424_v42 }
 0x722   : > { %v7861_v39 = vand.u32 4294901760, %v16674_v6  ;;  %v8426_v34 = vsub.f32 %v8424_v42, %v8425_v14 }
 0x724   : > { %v7862_v32 = vsub.f32 %v16674_v6, %v7861_v39 }
 0x726   : > { %v7863_v0 = vand.u32 4294901760, %v7862_v32 }
 0x7ef   : > { %v7758_v54 = vpop.f32.mrb[34].mxu0 }
 0x7f0   : > { %v16671_v30 = vmax.f32 %v7758_v54, 0.0  ;;  %v7760_v5 = vpop.f32.mrb[35].mxu0  ;;  %v8427_v54 = vand.u32 4294901760, %v8426_v34 }
 0x7f1   : > { %v16678_v63 = vmax.f32 %v7760_v5, 0.0 }
 0x7f2   : > { %v7792_v43 = vand.u32 4294901760, %v16671_v30 }
 0x7f3   : > { %v7790_v46 = vand.u32 4294901760, %v16678_v63  ;;  %v16682_v51 = vpop.f32.mrb[36].mxu0 }
 0x7f4   : > { %v7772_v1 = vmax.f32 %v16682_v51, 0.0  ;;  %v16685_v35 = vpop.f32.mrb[37].mxu0  ;;  %v7888_v18 = vsub.f32 %v16671_v30, %v7792_v43 }
 0x7f5   : > { %v7882_v21 = vsub.f32 %v16678_v63, %v7790_v46  ;;  %v7773_v36 = vmax.f32 %v16685_v35, 0.0 }
 0x7f6   : > { %v7785_v45 = vsel %vm7783_vm8, %v7772_v1, 0  ;;  %v7889_v38 = vand.u32 4294901760, %v7888_v18 }
 0x7f7   : > { %v7796_v12 = vand.u32 4294901760, %v7785_v45  ;;  %v7788_v48 = vsel %vm7783_vm8, %v7773_v36, 0  ;;  %v7883_v8 = vand.u32 4294901760, %v7882_v21 }
 0x7f8   : > { %v7794_v62 = vand.u32 4294901760, %v7788_v48  ;;  %v7890_v50 = vsub.f32 %v7888_v18, %v7889_v38 }
 0x7f9   : > { %v7900_v13 = vsub.f32 %v7785_v45, %v7796_v12  ;;  %v16704_v29 = vpack.c.bf16 %v7796_v12, %v7792_v43  ;;  %v7884_v27 = vsub.f32 %v7882_v21, %v7883_v8 }
 0x7fa   : > { %v16702_v56 = vpack.c.bf16 %v7794_v62, %v7790_v46  ;;  %v7894_v44 = vsub.f32 %v7788_v48, %v7794_v62  ;;  %v7891_v59 = vand.u32 4294901760, %v7890_v50 }
 0x7fb   : > { %v7901_v26 = vand.u32 4294901760, %v7900_v13  ;;  %v7885_v3 = vand.u32 4294901760, %v7884_v27  ;;  %v16720_v17 = vpack.c.bf16 %v7900_v13, %v7888_v18 }
 0x7fc   : > { %v7895_v10 = vand.u32 4294901760, %v7894_v44  ;;  %12983 = vmatprep.subr.bf16.mxu1 %v16702_v56  ;;  %v16715_v7 = vpack.c.bf16 %v7894_v44, %v7882_v21 }
 0x7fd   : > { %v7902_v9 = vsub.f32 %v7900_v13, %v7901_v26  ;;  %12985 = vmatpush1.bf16.msra.mxu1 %v16704_v29  ;;  %v16739_v20 = vpack.c.bf16 %v7901_v26, %v7889_v38 }
 0x7fe   : > { %v7896_v33 = vsub.f32 %v7894_v44, %v7895_v10  ;;  %v16729_v60 = vpack.c.bf16 %v7895_v10, %v7883_v8 }
 0x7ff   : > { %v7903_v49 = vand.u32 4294901760, %v7902_v9 }
 0x800   : > { %7864 = vmatmul.mubr.f32.vlgmr.msra.gmra.mrb[14].mxu1 %v7863_v0  ;;  %v7897_v52 = vand.u32 4294901760, %v7896_v33 }
 0x801   : > { %7869 = vmatprep.mubr.f32.mxu1 %v13556_v47  ;;  %v16712_v31 = vpack.c.bf16 %v7903_v49, %v7891_v59  ;;  %v10631_v49 = vld [vmem:[%s16939_s9 + $0x38] sm:$0xf] }
 0x802   : > { %v16710_v58 = vpack.c.bf16 %v7897_v52, %v7885_v3  ;;  %v9447_v51 = vsel %vm7776_vm7, %v10631_v49, 0 }
 0x803   : > { %v16842_v52 = vand.u32 4294901760, %v9447_v51 }
 0x804   : > { %7875 = vmatmul.mubr.f32.gmra.mrb[16].mxu1 %v7874_v11  ;;  %12987 = vmatprep.subr.bf16.mxu1 %v16710_v58 }
 0x805   : > { %12989 = vmatpush1.bf16.msra.mxu1 %v16712_v31  ;;  %7965 = vmatprep.mubr.f32.mxu1 %v13556_v47 }
 0x806   : > { %12991 = vmatprep.subr.bf16.mxu1 %v16715_v7 }
 0x808   : > { %7967 = vmatmul.mubr.f32.vlgmr.msra.gmra.mrb[14].mxu1 %v16668_v61 }
 0x809   : > { %12993 = vmatpush1.bf16.msra.mxu1 %v16720_v17  ;;  %7972 = vmatprep.mubr.f32.mxu1 %v13556_v47 }
 0x80a   : > { %12995 = vmatprep.subr.bf16.mxu1 %v16702_v56 }
 0x80c   : > { %7974 = vmatmul.mubr.f32.gmra.mrb[16].mxu1 %v16676_v53 }
 0x80d   : > { %8052 = vmatprep.mubr.f32.mxu1 %v13556_v47 }
 0x810   : > { %8055 = vmatmul.mubr.f32.vlgmr.msra.gmra.mrb[14].mxu1 %v16674_v6  ;;  %v10629_v6 = vld [vmem:[%s16939_s9 + $0x28] sm:$0xf] }
 0x811   : > { %12997 = vmatpush1.bf16.msra.mxu1 %v16704_v29  ;;  %8060 = vmatprep.mubr.f32.mxu1 %v13556_v47  ;;  %v8894_v43 = vsel %vm7776_vm7, %v10629_v6, 0 }
 0x812   : > { %12999 = vmatprep.subr.bf16.mxu1 %v16729_v60 }
 0x814   : > { %8063 = vmatmul.mubr.f32.gmra.mrb[16].mxu1 %v16689_v15 }
 0x815   : > { %8137 = vmatprep.mubr.f32.mxu1 %v13556_v47 }
 0x818   : > { %8141 = vmatmul.mubr.f32.vlgmr.msra.gmra.mrb[14].mxu1 %v7861_v39  ;;  %v8976_v39 = vand.u32 4294901760, %v8894_v43 }
 0x819   : > { %13001 = vmatpush1.bf16.msra.mxu1 %v16739_v20  ;;  %8146 = vmatprep.mubr.f32.mxu1 %v13556_v47 }
 0x81a   : > { %13003 = vmatprep.subr.bf16.mxu1 %v16702_v56  ;;  %v8977_v18 = vsub.f32 %v8894_v43, %v8976_v39 }
 0x81c   : > { %8150 = vmatmul.mubr.f32.gmra.mrb[16].mxu1 %v7872_v57  ;;  %v8978_v45 = vand.u32 4294901760, %v8977_v18 }
 0x81d   : > { %8232 = vmatprep.mubr.f32.mxu1 %v13556_v47 }
 0x81e   : > { %v8979_v48 = vsub.f32 %v8977_v18, %v8978_v45 }
 0x820   : > { %8234 = vmatmul.mubr.f32.vlgmr.msra.gmra.mrb[14].mxu1 %v16668_v61  ;;  %v8980_v62 = vand.u32 4294901760, %v8979_v48 }
 0x821   : > { %13005 = vmatpush1.bf16.msra.mxu1 %v16704_v29  ;;  %8239 = vmatprep.mubr.f32.mxu1 %v13556_v47 }
 0x822   : > { %13007 = vmatprep.subr.bf16.mxu1 %v16702_v56 }
 0x824   : > { %8241 = vmatmul.mubr.f32.gmra.mrb[16].mxu1 %v16676_v53 }
 0x825   : > { %8315 = vmatprep.mubr.f32.mxu1 %v13556_v47 }
 0x828   : > { %8317 = vmatmul.mubr.f32.vlgmr.msra.gmra.mrb[14].mxu1 %v16668_v61  ;;  %v10628_v61 = vld [vmem:[%s16939_s9 + $0x20] sm:$0xff] }
 0x829   : > { %13009 = vmatpush1.bf16.msra.mxu1 %v16704_v29  ;;  %8322 = vmatprep.mubr.f32.mxu1 %v13556_v47  ;;  %v8891_v5 = vsel %vm7776_vm7, %v10628_v61, 0 }
 0x82a   : > { %13011 = vmatprep.subr.bf16.mxu1 %v16710_v58 }
 0x82c   : > { %8324 = vmatmul.mubr.f32.gmra.mrb[16].mxu1 %v16676_v53  ;;  %v8965_v53 = vand.u32 4294901760, %v8891_v5 }
 0x82d   : > { %8411 = vmatprep.mubr.f32.mxu1 %v13556_v47 }
 0x82e   : > { %v8966_v46 = vsub.f32 %v8891_v5, %v8965_v53 }
 0x830   : > { %8417 = vmatmul.mubr.f32.vlgmr.msra.gmra.mrb[18].mxu1 %v8416_v55  ;;  %v8967_v15 = vand.u32 4294901760, %v8966_v46 }
 0x831   : > { %13013 = vmatpush1.bf16.msra.mxu1 %v16712_v31  ;;  %8422 = vmatprep.mubr.f32.mxu1 %v13556_v47 }
 0x832   : > { %13015 = vmatprep.subr.bf16.mxu1 %v16715_v7  ;;  %v8968_v21 = vsub.f32 %v8966_v46, %v8967_v15 }
 0x834   : > { %8428 = vmatmul.mubr.f32.gmra.mrb[20].mxu1 %v8427_v54  ;;  %v8969_v12 = vand.u32 4294901760, %v8968_v21 }
 0x835   : > { %8518 = vmatprep.mubr.f32.mxu1 %v13556_v47 }
 0x838   : > { %8520 = vmatmul.mubr.f32.vlgmr.msra.gmra.mrb[18].mxu1 %v8412_v24 }
 0x839   : > { %13017 = vmatpush1.bf16.msra.mxu1 %v16720_v17  ;;  %8525 = vmatprep.mubr.f32.mxu1 %v13556_v47 }
 0x83a   : > { %13019 = vmatprep.subr.bf16.mxu1 %v16702_v56 }
 0x83c   : > { %8527 = vmatmul.mubr.f32.gmra.mrb[20].mxu1 %v16751_v23 }
 0x83d   : > { %8605 = vmatprep.mubr.f32.mxu1 %v13556_v47 }
 0x840   : > { %8608 = vmatmul.mubr.f32.vlgmr.msra.gmra.mrb[18].mxu1 %v8413_v4 }
 0x841   : > { %13021 = vmatpush1.bf16.msra.mxu1 %v16704_v29  ;;  %8613 = vmatprep.mubr.f32.mxu1 %v13556_v47 }
 0x842   : > { %13023 = vmatprep.subr.bf16.mxu1 %v16729_v60 }
 0x844   : > { %8616 = vmatmul.mubr.f32.gmra.mrb[20].mxu1 %v8424_v42 }
 0x845   : > { %8690 = vmatprep.mubr.f32.mxu1 %v13556_v47 }
 0x848   : > { %8694 = vmatmul.mubr.f32.vlgmr.msra.gmra.mrb[18].mxu1 %v8414_v19 }
 0x849   : > { %13025 = vmatpush1.bf16.msra.mxu1 %v16739_v20  ;;  %8699 = vmatprep.mubr.f32.mxu1 %v13556_v47 }
 0x84a   : > { %13027 = vmatprep.subr.bf16.mxu1 %v16702_v56 }
 0x84c   : > { %8703 = vmatmul.mubr.f32.gmra.mrb[20].mxu1 %v8425_v14 }
 0x84d   : > { %8785 = vmatprep.mubr.f32.mxu1 %v13556_v47 }
 0x850   : > { %8787 = vmatmul.mubr.f32.vlgmr.msra.gmra.mrb[18].mxu1 %v8412_v24 }
 0x851   : > { %13029 = vmatpush1.bf16.msra.mxu1 %v16704_v29  ;;  %8792 = vmatprep.mubr.f32.mxu1 %v13556_v47 }
 0x852   : > { %13031 = vmatprep.subr.bf16.mxu1 %v16702_v56 }
 0x854   : > { %8794 = vmatmul.mubr.f32.gmra.mrb[20].mxu1 %v16751_v23 }
 0x855   : > { %8868 = vmatprep.mubr.f32.mxu1 %v13556_v47 }
 0x858   : > { %8870 = vmatmul.mubr.f32.vlgmr.msra.gmra.mrb[18].mxu1 %v8412_v24 }
 0x859   : > { %13033 = vmatpush1.bf16.msra.mxu1 %v16704_v29  ;;  %8875 = vmatprep.mubr.f32.mxu1 %v13556_v47 }
 0x85a   : > { %13035 = vmatprep.subr.bf16.mxu1 %v16710_v58 }
 0x85c   : > { %8877 = vmatmul.mubr.f32.gmra.mrb[20].mxu1 %v16751_v23 }
 0x85d   : > { %8964 = vmatprep.mubr.f32.mxu1 %v13556_v47 }
 0x860   : > { %8970 = vmatmul.mubr.f32.vlgmr.msra.gmra.mrb[22].mxu1 %v8969_v12 }
 0x861   : > { %13037 = vmatpush1.bf16.msra.mxu1 %v16712_v31  ;;  %8975 = vmatprep.mubr.f32.mxu1 %v13556_v47 }
 0x862   : > { %13039 = vmatprep.subr.bf16.mxu1 %v16715_v7 }
 0x864   : > { %8981 = vmatmul.mubr.f32.gmra.mrb[24].mxu1 %v8980_v62 }
 0x865   : > { %9071 = vmatprep.mubr.f32.mxu1 %v13556_v47 }
 0x868   : > { %9073 = vmatmul.mubr.f32.vlgmr.msra.gmra.mrb[22].mxu1 %v8965_v53 }
 0x869   : > { %13041 = vmatpush1.bf16.msra.mxu1 %v16720_v17  ;;  %9078 = vmatprep.mubr.f32.mxu1 %v13556_v47 }
 0x86a   : > { %13043 = vmatprep.subr.bf16.mxu1 %v16702_v56 }
 0x86c   : > { %9080 = vmatmul.mubr.f32.gmra.mrb[24].mxu1 %v8976_v39 }
 0x86d   : > { %9158 = vmatprep.mubr.f32.mxu1 %v13556_v47 }
 0x870   : > { %9161 = vmatmul.mubr.f32.vlgmr.msra.gmra.mrb[22].mxu1 %v8966_v46 }
 0x871   : > { %13045 = vmatpush1.bf16.msra.mxu1 %v16704_v29  ;;  %9166 = vmatprep.mubr.f32.mxu1 %v13556_v47 }
 0x872   : > { %13047 = vmatprep.subr.bf16.mxu1 %v16729_v60 }
 0x874   : > { %9169 = vmatmul.mubr.f32.gmra.mrb[24].mxu1 %v8977_v18 }
 0x875   : > { %9243 = vmatprep.mubr.f32.mxu1 %v13556_v47 }
 0x878   : > { %9247 = vmatmul.mubr.f32.vlgmr.msra.gmra.mrb[22].mxu1 %v8967_v15 }
 0x879   : > { %13049 = vmatpush1.bf16.msra.mxu1 %v16739_v20  ;;  %9252 = vmatprep.mubr.f32.mxu1 %v13556_v47  ;;  %v16850_v20 = vsub.f32 %v9447_v51, %v16842_v52 }
 0x87a   : > { %13051 = vmatprep.subr.bf16.mxu1 %v16702_v56 }
 0x87b   : > { %v9537_v41 = vand.u32 4294901760, %v16850_v20 }
 0x87c   : > { %9256 = vmatmul.mubr.f32.gmra.mrb[24].mxu1 %v8978_v45 }
 0x87d   : > { %9338 = vmatprep.mubr.f32.mxu1 %v13556_v47  ;;  %v9538_v46 = vsub.f32 %v16850_v20, %v9537_v41 }
 0x87f   : > { %v9539_v12 = vand.u32 4294901760, %v9538_v46 }
 0x880   : > { %9340 = vmatmul.mubr.f32.vlgmr.msra.gmra.mrb[22].mxu1 %v8965_v53 }
 0x881   : > { %13053 = vmatpush1.bf16.msra.mxu1 %v16704_v29  ;;  %9345 = vmatprep.mubr.f32.mxu1 %v13556_v47 }
 0x884   : > { %9347 = vmatmul.mubr.f32.gmra.mrb[24].mxu1 %v8976_v39 }
 0x885   : > { %9421 = vmatprep.mubr.f32.mxu1 %v13556_v47 }
 0x888   : > { %9423 = vmatmul.mubr.f32.vlgmr.msra.gmra.mrb[22].mxu1 %v8965_v53 }
 0x889   : > { %9428 = vmatprep.mubr.f32.mxu1 %v13556_v47 }
 0x88c   : > { %9430 = vmatmul.mubr.f32.gmra.mrb[24].mxu1 %v8976_v39 }
 0x88d   : > { %9523 = vmatprep.mubr.f32.mxu1 %v13556_v47 }
 0x8fb   : > { %v8318_v32 = vpop.f32.mrb[14].mxu1 }
 0x8fc   : > { %v8320_v57 = vpop.f32.mrb[15].mxu1  ;;  %v8330_v13 = vmin.f32 %v16671_v30, %v8318_v32  ;;  %v10630_v30 = vld [vmem:[%s16939_s9 + $0x30] sm:$0xff] }
 0x8fd   : > { %v8331_v56 = vmin.f32 %v16678_v63, %v8320_v57  ;;  %v9444_v63 = vsel %vm7776_vm7, %v10630_v30, 0 }
 0x8fe   : > { %v16834_v11 = vand.u32 4294901760, %v9444_v63 }
 0x8ff   : > { %v8325_v8 = vpop.f32.mrb[16].mxu1 }
 0x900   : > { %v8327_v38 = vpop.f32.mrb[17].mxu1  ;;  %v8332_v0 = vmin.f32 %v7772_v1, %v8325_v8  ;;  %v16840_v3 = vsub.f32 %v9444_v63, %v16834_v11 }
 0x901   : > { %v8333_v40 = vmin.f32 %v7773_v36, %v8327_v38 }
 0x902   : > { %v9526_v37 = vand.u32 4294901760, %v16840_v3 }
 0x904   : > { %v9527_v42 = vsub.f32 %v16840_v3, %v9526_v37 }
 0x906   : > { %v9528_v43 = vand.u32 4294901760, %v9527_v42 }
 0x92b   : > { %v8871_v44 = vpop.f32.mrb[18].mxu1 }
 0x92c   : > { %v8883_v29 = vmin.f32 %v8330_v13, %v8871_v44  ;;  %v8873_v26 = vpop.f32.mrb[19].mxu1  ;;  %v10632_v44 = vld [vmem:[%s16939_s9 + $0x40] sm:$0xff] }
 0x92d   : > { %v8884_v10 = vmin.f32 %v8331_v56, %v8873_v26  ;;  %v9989_v26 = vsel %vm7776_vm7, %v10632_v44, 0 }
 0x92f   : > { %v8878_v27 = vpop.f32.mrb[20].mxu1 }
 0x930   : > { %v8885_v50 = vmin.f32 %v8332_v0, %v8878_v27  ;;  %v8880_v9 = vpop.f32.mrb[21].mxu1  ;;  %v10063_v0 = vand.u32 4294901760, %v9989_v26 }
 0x931   : > { %v8886_v33 = vmin.f32 %v8333_v40, %v8880_v9 }
 0x932   : > { %v10064_v27 = vsub.f32 %v9989_v26, %v10063_v0 }
 0x934   : > { %v10065_v9 = vand.u32 4294901760, %v10064_v27 }
 0x936   : > { %v10066_v30 = vsub.f32 %v10064_v27, %v10065_v9 }
 0x938   : > { %v10067_v49 = vand.u32 4294901760, %v10066_v30 }
 0x95b   : > { %v9424_v1 = vpop.f32.mrb[22].mxu1 }
 0x95c   : > { %v16837_v35 = vmin.f32 %v8883_v29, %v9424_v1  ;;  %v9426_v36 = vpop.f32.mrb[23].mxu1 }
 0x95d   : > { %v16844_v59 = vmin.f32 %v8884_v10, %v9426_v36  ;;  %v10633_v10 = vld [vmem:[%s16939_s9 + $0x48] sm:$0xf] }
 0x95e   : > { %v9457_v58 = vand.u32 4294901760, %v16837_v35  ;;  %v9992_v40 = vsel %vm7776_vm7, %v10633_v10, 0 }
 0x95f   : > { %v9455_v31 = vand.u32 4294901760, %v16844_v59  ;;  %v9431_v7 = vpop.f32.mrb[24].mxu1 }
 0x960   : > { %v9438_v17 = vmin.f32 %v8885_v50, %v9431_v7  ;;  %v9433_v60 = vpop.f32.mrb[25].mxu1  ;;  %v9551_v2 = vsub.f32 %v16837_v35, %v9457_v58  ;;  %v10074_v50 = vand.u32 4294901760, %v9992_v40 }
 0x961   : > { %v9545_v25 = vsub.f32 %v16844_v59, %v9455_v31  ;;  %v9439_v24 = vmin.f32 %v8886_v33, %v9433_v60 }
 0x962   : > { %v9450_v22 = vsel %vm7783_vm8, %v9438_v17, 0  ;;  %v9552_v55 = vand.u32 4294901760, %v9551_v2  ;;  %v10075_v33 = vsub.f32 %v9992_v40, %v10074_v50 }
 0x963   : > { %v9461_v4 = vand.u32 4294901760, %v9450_v22  ;;  %v9453_v23 = vsel %vm7783_vm8, %v9439_v24, 0  ;;  %v9546_v14 = vand.u32 4294901760, %v9545_v25 }
 0x964   : > { %v9459_v19 = vand.u32 4294901760, %v9453_v23  ;;  %v9553_v15 = vsub.f32 %v9551_v2, %v9552_v55  ;;  %v10076_v63 = vand.u32 4294901760, %v10075_v33 }
 0x965   : > { %v9563_v34 = vsub.f32 %v9450_v22, %v9461_v4  ;;  %v16860_v5 = vpack.c.bf16 %v9461_v4, %v9457_v58  ;;  %v9547_v39 = vsub.f32 %v9545_v25, %v9546_v14 }
 0x966   : > { %v16858_v54 = vpack.c.bf16 %v9459_v19, %v9455_v31  ;;  %v9557_v61 = vsub.f32 %v9453_v23, %v9459_v19  ;;  %v9554_v32 = vand.u32 4294901760, %v9553_v15  ;;  %v10077_v51 = vsub.f32 %v10075_v33, %v10076_v63 }
 0x967   : > { %v9564_v6 = vand.u32 4294901760, %v9563_v34  ;;  %v9548_v48 = vand.u32 4294901760, %v9547_v39  ;;  %v13064_v13 = vpack.c.bf16 %v9563_v34, %v9551_v2 }
 0x968   : > { %v9558_v53 = vand.u32 4294901760, %v9557_v61  ;;  %13055 = vmatprep.subr.bf16.mxu1 %v16858_v54  ;;  %v13062_v38 = vpack.c.bf16 %v9557_v61, %v9545_v25  ;;  %v10078_v1 = vand.u32 4294901760, %v10077_v51 }
 0x969   : > { %v9565_v18 = vsub.f32 %v9563_v34, %v9564_v6  ;;  %13057 = vmatpush1.bf16.msra.mxu1 %v16860_v5  ;;  %v13072_v29 = vpack.c.bf16 %v9564_v6, %v9552_v55  ;;  %v13557_v34 = vmov 1966171168  }
 0x96a   : > { %v9559_v21 = vsub.f32 %v9557_v61, %v9558_v53  ;;  %v13070_v56 = vpack.c.bf16 %v9558_v53, %v9546_v14  ;;  %v10534_v61 = vlaneseq }
 0x96b   : > { %v9566_v45 = vand.u32 4294901760, %v9565_v18 }
 0x96c   : > { %9529 = vmatmul.mubr.f32.vlgmr.msra.gmra.mrb[26].mxu1 %v9528_v43  ;;  %v9560_v62 = vand.u32 4294901760, %v9559_v21  ;;  %v10535_v39 = vshrl.u32 %v10534_v61, 7  ;;  %vm10548_vm9 = vcmp.lt.s32.totalorder %v10534_v61, 256 }
 0x96d   : > { %9534 = vmatprep.mubr.f32.mxu1 %v13556_v47  ;;  %v13060_v8 = vpack.c.bf16 %v9566_v45, %v9554_v32  ;;  %v17910_v45 = vld [vmem:[#allocation50_spill] sm:$0xff] }
 0x96e   : > { %v13058_v57 = vpack.c.bf16 %v9560_v62, %v9548_v48  ;;  %v17912_v62 = vld [vmem:[#allocation73_spill] sm:$0xff] }
 0x96f   : > { %v17913_v32 = vsub.f32 %v17912_v62, %v17812_v28 }
 0x970   : > { %9540 = vmatmul.mubr.f32.gmra.mrb[28].mxu1 %v9539_v12  ;;  %13059 = vmatprep.subr.bf16.mxu1 %v13058_v57  ;;  %v17911_v12 = vsub.f32 %v17910_v45, %v17810_v16 }
 0x971   : > { %13061 = vmatpush1.bf16.msra.mxu1 %v13060_v8  ;;  %9628 = vmatprep.mubr.f32.mxu1 %v13556_v47 }
 0x972   : > { %13063 = vmatprep.subr.bf16.mxu1 %v13062_v38 }
 0x974   : > { %9630 = vmatmul.mubr.f32.vlgmr.msra.gmra.mrb[26].mxu1 %v16834_v11 }
 0x975   : > { %13065 = vmatpush1.bf16.msra.mxu1 %v13064_v13  ;;  %9635 = vmatprep.mubr.f32.mxu1 %v13556_v47 }
 0x976   : > { %13067 = vmatprep.subr.bf16.mxu1 %v16858_v54 }
 0x978   : > { %9637 = vmatmul.mubr.f32.gmra.mrb[30].mxu1 %v16842_v52 }
 0x979   : > { %9713 = vmatprep.mubr.f32.mxu1 %v13556_v47 }
 0x97c   : > { %9716 = vmatmul.mubr.f32.vlgmr.msra.gmra.mrb[26].mxu1 %v16840_v3 }
 0x97d   : > { %13069 = vmatpush1.bf16.msra.mxu1 %v16860_v5  ;;  %9721 = vmatprep.mubr.f32.mxu1 %v13556_v47 }
 0x97e   : > { %13071 = vmatprep.subr.bf16.mxu1 %v13070_v56 }
 0x980   : > { %9724 = vmatmul.mubr.f32.gmra.mrb[32].mxu1 %v16850_v20 }
 0x981   : > { %9796 = vmatprep.mubr.f32.mxu1 %v13556_v47 }
 0x984   : > { %9800 = vmatmul.mubr.f32.vlgmr.msra.gmra.mrb[26].mxu1 %v9526_v37 }
 0x985   : > { %13073 = vmatpush1.bf16.msra.mxu1 %v13072_v29  ;;  %9805 = vmatprep.mubr.f32.mxu1 %v13556_v47 }
 0x986   : > { %13075 = vmatprep.subr.bf16.mxu1 %v16858_v54 }
 0x988   : > { %9809 = vmatmul.mubr.f32.gmra.mrb[34].mxu1 %v9537_v41 }
 0x989   : > { %9889 = vmatprep.mubr.f32.mxu1 %v13556_v47 }
 0x98c   : > { %9891 = vmatmul.mubr.f32.vlgmr.msra.gmra.mrb[26].mxu1 %v16834_v11 }
 0x98d   : > { %13077 = vmatpush1.bf16.msra.mxu1 %v16860_v5  ;;  %9896 = vmatprep.mubr.f32.mxu1 %v13556_v47 }
 0x98e   : > { %13079 = vmatprep.subr.bf16.mxu1 %v16858_v54 }
 0x990   : > { %9898 = vmatmul.mubr.f32.gmra.mrb[36].mxu1 %v16842_v52 }
 0x991   : > { %9970 = vmatprep.mubr.f32.mxu1 %v13556_v47 }
 0x994   : > { %9972 = vmatmul.mubr.f32.vlgmr.msra.gmra.mrb[26].mxu1 %v16834_v11 }
 0x995   : > { %13081 = vmatpush1.bf16.msra.mxu1 %v16860_v5  ;;  %9977 = vmatprep.mubr.f32.mxu1 %v13556_v47 }
 0x996   : > { %13083 = vmatprep.subr.bf16.mxu1 %v13058_v57 }
 0x998   : > { %9979 = vmatmul.mubr.f32.gmra.mrb[38].mxu1 %v16842_v52 }
 0x999   : > { %10062 = vmatprep.mubr.f32.mxu1 %v13556_v47 }
 0x99c   : > { %10068 = vmatmul.mubr.f32.vlgmr.msra.gmra.mrb[40].mxu1 %v10067_v49 }
 0x99d   : > { %13085 = vmatpush1.bf16.msra.mxu1 %v13060_v8  ;;  %10073 = vmatprep.mubr.f32.mxu1 %v13556_v47 }
 0x99e   : > { %13087 = vmatprep.subr.bf16.mxu1 %v13062_v38 }
 0x9a0   : > { %10079 = vmatmul.mubr.f32.gmra.mrb[42].mxu1 %v10078_v1 }
 0x9a1   : > { %10167 = vmatprep.mubr.f32.mxu1 %v13556_v47 }
 0x9a4   : > { %10169 = vmatmul.mubr.f32.vlgmr.msra.gmra.mrb[40].mxu1 %v10063_v0 }
 0x9a5   : > { %13089 = vmatpush1.bf16.msra.mxu1 %v13064_v13  ;;  %10174 = vmatprep.mubr.f32.mxu1 %v13556_v47 }
 0x9a6   : > { %13091 = vmatprep.subr.bf16.mxu1 %v16858_v54 }
 0x9a8   : > { %10176 = vmatmul.mubr.f32.gmra.mrb[44].mxu1 %v10074_v50 }
 0x9a9   : > { %10252 = vmatprep.mubr.f32.mxu1 %v13556_v47 }
 0x9ac   : > { %10255 = vmatmul.mubr.f32.vlgmr.msra.gmra.mrb[40].mxu1 %v10064_v27 }
 0x9ad   : > { %13093 = vmatpush1.bf16.msra.mxu1 %v16860_v5  ;;  %10260 = vmatprep.mubr.f32.mxu1 %v13556_v47 }
 0x9ae   : > { %13095 = vmatprep.subr.bf16.mxu1 %v13070_v56 }
 0x9b0   : > { %10263 = vmatmul.mubr.f32.gmra.mrb[46].mxu1 %v10075_v33 }
 0x9b1   : > { %10335 = vmatprep.mubr.f32.mxu1 %v13556_v47 }
 0x9b4   : > { %10339 = vmatmul.mubr.f32.vlgmr.msra.gmra.mrb[40].mxu1 %v10065_v9 }
 0x9b5   : > { %13097 = vmatpush1.bf16.msra.mxu1 %v13072_v29  ;;  %10344 = vmatprep.mubr.f32.mxu1 %v13556_v47 }
 0x9b6   : > { %13099 = vmatprep.subr.bf16.mxu1 %v16858_v54  ;;  %v10532_v54 = vunpack.c.l.s4 %v13557_v34 }
 0x9b8   : > { %10348 = vmatmul.mubr.f32.gmra.mrb[48].mxu1 %v10076_v63  ;;  %v10533_v46 = vunpack.c.0.s8 %v10532_v54 }
 0x9b9   : > { %10428 = vmatprep.mubr.f32.mxu1 %v13556_v47 }
 0x9ba   : > { %v10536_v8 = vsub.s32 %v10533_v46, %v10535_v39 }
 0x9bc   : > { %10430 = vmatmul.mubr.f32.vlgmr.msra.gmra.mrb[40].mxu1 %v10063_v0 }
 0x9bd   : > { %13101 = vmatpush1.bf16.msra.mxu1 %v16860_v5  ;;  %10435 = vmatprep.mubr.f32.mxu1 %v13556_v47 }
 0x9c0   : > { %10437 = vmatmul.mubr.f32.gmra.mrb[50].mxu1 %v10074_v50 }
 0x9c1   : > { %10509 = vmatprep.mubr.f32.mxu1 %v13556_v47 }
 0x9c4   : > { %10511 = vmatmul.mubr.f32.vlgmr.msra.gmra.mrb[40].mxu1 %v10063_v0 }
 0x9c5   : > { %10516 = vmatprep.mubr.f32.mxu1 %v13556_v47 }
 0x9c8   : > { %10518 = vmatmul.mubr.f32.gmra.mrb[52].mxu1 %v10074_v50 }
 0xa43   : > { %v9541_v11 = vpop.f32.mrb[28].mxu1 }
 0xa44   : > { %v9542_v36 = vpop.f32.mrb[29].mxu1 }
 0xa4b   : > { %v9638_v3 = vpop.f32.mrb[30].mxu1 }
 0xa4c   : > { %v9639_v52 = vpop.f32.mrb[31].mxu1 }
 0xa53   : > { %v9725_v58 = vpop.f32.mrb[32].mxu1 }
 0xa54   : > { %v9726_v31 = vpop.f32.mrb[33].mxu1 }
 0xa5b   : > { %v9810_v7 = vpop.f32.mrb[34].mxu1 }
 0xa5c   : > { %v9811_v17 = vpop.f32.mrb[35].mxu1 }
 0xa63   : > { %v9899_v60 = vpop.f32.mrb[36].mxu1 }
 0xa64   : > { %v9900_v37 = vpop.f32.mrb[37].mxu1 }
 0xa67   : > { %v9973_v20 = vpop.f32.mrb[26].mxu1 }
 0xa68   : > { %v9975_v2 = vpop.f32.mrb[27].mxu1  ;;  %v9983_v6 = vmax.f32 %v16837_v35, %v9973_v20 }
 0xa69   : > { %v9984_v53 = vmax.f32 %v16844_v59, %v9975_v2 }
 0xa6b   : > { %v9980_v25 = vpop.f32.mrb[38].mxu1 }
 0xa6c   : > { %v9981_v24 = vpop.f32.mrb[39].mxu1 }
 0xa73   : > { %v10080_v22 = vpop.f32.mrb[42].mxu1 }
 0xa74   : > { %v10081_v4 = vpop.f32.mrb[43].mxu1 }
 0xa7b   : > { %v10177_v23 = vpop.f32.mrb[44].mxu1 }
 0xa7c   : > { %v10178_v47 = vpop.f32.mrb[45].mxu1 }
 0xa83   : > { %v10264_v19 = vpop.f32.mrb[46].mxu1 }
 0xa84   : > { %v10265_v42 = vpop.f32.mrb[47].mxu1 }
 0xa8b   : > { %v10349_v41 = vpop.f32.mrb[48].mxu1 }
 0xa8c   : > { %v10350_v14 = vpop.f32.mrb[49].mxu1 }
 0xa93   : > { %v10438_v55 = vpop.f32.mrb[50].mxu1 }
 0xa94   : > { %v10439_v5 = vpop.f32.mrb[51].mxu1 }
 0xa97   : > { %v10512_v43 = vpop.f32.mrb[40].mxu1 }
 0xa98   : > { %v10522_v15 = vmax.f32 %v9983_v6, %v10512_v43  ;;  %v10514_v18 = vpop.f32.mrb[41].mxu1 }
 0xa99   : > { %v10523_v21 = vmax.f32 %v9984_v53, %v10514_v18 }
 0xa9a   : > { %v10526_v48 = vadd.f32 %v17911_v12, %v10522_v15 }
 0xa9b   : > { %v10527_v57 = vadd.f32 %v17913_v32, %v10523_v21  ;;  %v10519_v38 = vpop.f32.mrb[52].mxu1 }
 0xa9c   : > { %v10520_v35 = vpop.f32.mrb[53].mxu1 }
 0xa9d   : > { %v10530_v59 = vcombine.low %v10526_v48, %v10527_v57 }
 0xa9f   : > { %v10537_v13 = vrot.slane %v10530_v59, %v10536_v8 }
 0xaa1   : > { %v10544_v56 = vrot.slane %v10537_v13, %v10536_v8 }
 0xaa3   : > { %10550 = vst.msk [vmem:[%s381_s20] sm:$0x3] %vm10548_vm9, %v10544_v56 }
 0xaa4 PF: > { %s20_s13 = sadd.s32 1, %s13554_s13  }
 0xaa5   : > { %p17_p5 = scmp.ge.s32.totalorder %s20_s13, 4  }
 0xaa7   :  { %19 = sbr.rel (!%p17_p5) target bundleno = 1 (0x1), region = 97 }

</bundles_post_ra>
